<compile_context>
chip_gen: v6e
topology: v6e:2x2x1
jax: 0.10.0
libtpu: 0.0.40
codegen_flags: <defaults>
</compile_context>

<pallas_src>
import jax
import jax.numpy as jnp
import numpy as np
from jax import lax
from jax.experimental import pallas as pl
from jax.experimental.pallas import tpu as pltpu

LANE = 128


def _round_up(n, m):
    return ((n + m - 1) // m) * m


# ----------------------------- Pallas kernel ------------------------------- #

def _make_fused_kernel(num_layers, B_BLK, T, H, G_PAD, OUT_PAD, matmul_dtype):
    """Fused kernel for one batch block: L x LSTM layers + final Linear."""

    def kernel(x_ref, *args):
        layer_refs = args[:3 * num_layers]
        wf_ref = args[3 * num_layers]
        bf_ref = args[3 * num_layers + 1]
        out_ref = args[3 * num_layers + 2]
        y_scr = args[3 * num_layers + 3]          # (B_BLK, T, H) inter-layer seq

        # (B_BLK, T, Din) -> (B_BLK*T, Din): leading-dim merge (T % 8 == 0, so
        # this is layout-trivial).
        din = x_ref.shape[-1]
        seq2d = x_ref[...].reshape(B_BLK * T, din)

        for l in range(num_layers):
            wih_ref, whh_ref, b_ref = layer_refs[3 * l:3 * l + 3]
            # Hoisted input projection + bias: one matmul over the whole
            # sequence and batch block (bf16 operands, f32 accumulation).
            xw = (jnp.dot(seq2d.astype(matmul_dtype), wih_ref[...],
                          preferred_element_type=jnp.float32) + b_ref[...])
            xw = xw.reshape(B_BLK, T, G_PAD)
            # Packed W_hh is (H, G_PAD) bf16 (~1 vreg at H=16); holding it
            # across the unrolled loop is spill-free (unlike the old per-gate
            # padded (128, 512) f32 value = 256 KiB).
            whh = whh_ref[...]

            h = jnp.zeros((B_BLK, H), jnp.float32)
            c = jnp.zeros((B_BLK, H), jnp.float32)
            for t in range(T):                    # fully unrolled (small T)
                gates = xw[:, t, :] + jnp.dot(
                    h.astype(matmul_dtype), whh,
                    preferred_element_type=jnp.float32)       # (B_BLK, G_PAD)
                # Gates tightly packed [i|f|g|o] at lane offsets k*H: one
                # sigmoid covers i, f, o; only g needs tanh.
                s = jax.nn.sigmoid(gates[:, :4 * H])
                i = s[:, 0 * H:1 * H]
                f = s[:, 1 * H:2 * H]
                o = s[:, 3 * H:4 * H]
                g = jnp.tanh(gates[:, 2 * H:3 * H])
                c = f * c + i * g                 # f32 gate math / state (v5e)
                h = o * jnp.tanh(c)
                y_scr[:, pl.ds(t, 1), :] = h[:, None, :]
            seq2d = y_scr[...].reshape(B_BLK * T, H)

        # Final Linear on the hidden dim; lane-dense output store (OUT_PAD=128).
        out2d = (jnp.dot(seq2d.astype(matmul_dtype), wf_ref[...],
                         preferred_element_type=jnp.float32) + bf_ref[...])
        out_ref[...] = out2d.reshape(B_BLK, T, OUT_PAD)

    return kernel


# --------------------------- Host-side weight prep -------------------------- #

def _pack_gate_matrix(w, G_PAD, dtype):
    """PyTorch (4H, in_dim) gate-stacked [i;f;g;o] -> (in_dim, G_PAD).
    Gates stay tightly packed at lane offsets {0, H, 2H, 3H}; zero-padded."""
    wt = jnp.asarray(w, jnp.float32).T
    return jnp.pad(wt, ((0, 0), (0, G_PAD - wt.shape[1]))).astype(dtype)


def _pack_gate_bias(b, G_PAD):
    b = jnp.asarray(b, jnp.float32).reshape(1, -1)
    return jnp.pad(b, ((0, 0), (0, G_PAD - b.shape[1])))      # bias kept f32


def sdenet_rir_forward(x, params, *, num_batch_blocks=1,
                       matmul_dtype=jnp.bfloat16):
    """x: (B, seq_len, num_freq_bins), batch_first as in the PyTorch module."""
    B, T, F = x.shape
    H = params["lstm"][0][1].shape[1]                         # w_hh: (4H, H)
    w_f, b_f = params["fcn"]                                  # (OUT, seq_len), (OUT,)
    OUT = w_f.shape[0]
    assert H == w_f.shape[1], "fcn(out) requires lstm_hidden_size == seq_len"
    assert B % num_batch_blocks == 0
    B_BLK = B // num_batch_blocks

    G_PAD = _round_up(4 * H, LANE)
    OUT_PAD = _round_up(OUT, LANE)
    L = len(params["lstm"])

    x = x.astype(jnp.float32)
    inputs = [x]
    in_specs = [pl.BlockSpec((B_BLK, T, F), lambda b: (b, 0, 0))]
    for (w_ih, w_hh, b_ih, b_hh) in params["lstm"]:
        wih_p = _pack_gate_matrix(w_ih, G_PAD, matmul_dtype)   # (Din, G_PAD)
        whh_p = _pack_gate_matrix(w_hh, G_PAD, matmul_dtype)   # (H,   G_PAD)
        bias_p = _pack_gate_bias(b_ih + b_hh, G_PAD)           # (1,   G_PAD) f32
        inputs += [wih_p, whh_p, bias_p]
        # Constant index maps: weights are fetched once, not per grid step.
        in_specs += [pl.BlockSpec(wih_p.shape, lambda b: (0, 0)),
                     pl.BlockSpec(whh_p.shape, lambda b: (0, 0)),
                     pl.BlockSpec(bias_p.shape, lambda b: (0, 0))]

    wf_p = jnp.pad(jnp.asarray(w_f, jnp.float32).T,
                   ((0, 0), (0, OUT_PAD - OUT))).astype(matmul_dtype)
    bf_p = jnp.pad(jnp.asarray(b_f, jnp.float32).reshape(1, -1),
                   ((0, 0), (0, OUT_PAD - OUT)))
    inputs += [wf_p, bf_p]
    in_specs += [pl.BlockSpec(wf_p.shape, lambda b: (0, 0)),
                 pl.BlockSpec(bf_p.shape, lambda b: (0, 0))]

    kernel = _make_fused_kernel(L, B_BLK, T, H, G_PAD, OUT_PAD, matmul_dtype)
    out_pad = pl.pallas_call(
        kernel,
        out_shape=jax.ShapeDtypeStruct((B, T, OUT_PAD), jnp.float32),
        grid_spec=pltpu.PrefetchScalarGridSpec(
            num_scalar_prefetch=0,
            grid=(num_batch_blocks,),
            in_specs=in_specs,
            out_specs=pl.BlockSpec((B_BLK, T, OUT_PAD), lambda b: (b, 0, 0)),
            scratch_shapes=[pltpu.VMEM((B_BLK, T, H), jnp.float32)],
        ),
        # TODO(synk): on v7x use pltpu.CORE_PARALLEL here (with
        # num_batch_blocks=2) to guarantee the 2-TensorCore split.
        compiler_params=pltpu.CompilerParams(
            dimension_semantics=("parallel",)),
    )(*inputs)
    return out_pad[:, :, :OUT]                                 # (B, T, OUT)


# --------------------------- Params & pure-JAX ref -------------------------- #

def init_params(key, num_freq_bins, seq_len, hidden, num_layers, out_size):
    params = {"lstm": [], "fcn": None}
    keys = jax.random.split(key, 4 * num_layers + 2)
    k = 1.0 / float(np.sqrt(hidden))
    idx = 0
    din = num_freq_bins
    for _ in range(num_layers):
        w_ih = jax.random.uniform(keys[idx], (4 * hidden, din), jnp.float32, -k, k); idx += 1
        w_hh = jax.random.uniform(keys[idx], (4 * hidden, hidden), jnp.float32, -k, k); idx += 1
        b_ih = jax.random.uniform(keys[idx], (4 * hidden,), jnp.float32, -k, k); idx += 1
        b_hh = jax.random.uniform(keys[idx], (4 * hidden,), jnp.float32, -k, k); idx += 1
        params["lstm"].append((w_ih, w_hh, b_ih, b_hh))
        din = hidden
    kf = 1.0 / float(np.sqrt(seq_len))
    w = jax.random.uniform(keys[idx], (out_size, seq_len), jnp.float32, -kf, kf); idx += 1
    b = jax.random.uniform(keys[idx], (out_size,), jnp.float32, -kf, kf)
    params["fcn"] = (w, b)
    return params


def sdenet_rir_reference(x, params):
    """Pure-JAX f32 reference (lax.scan LSTM) for correctness checking."""
    def run_layer(h_seq, layer):
        w_ih, w_hh, b_ih, b_hh = layer
        H = w_hh.shape[1]
        B = h_seq.shape[1]

        def step(carry, x_t):
            h, c = carry
            gates = x_t @ w_ih.T + h @ w_hh.T + b_ih + b_hh
            i = jax.nn.sigmoid(gates[:, :H])
            f = jax.nn.sigmoid(gates[:, H:2 * H])
            g = jnp.tanh(gates[:, 2 * H:3 * H])
            o = jax.nn.sigmoid(gates[:, 3 * H:])
            c = f * c + i * g
            h = o * jnp.tanh(c)
            return (h, c), h

        init = (jnp.zeros((B, H), jnp.float32), jnp.zeros((B, H), jnp.float32))
        _, ys = lax.scan(step, init, h_seq)
        return ys

    h = jnp.transpose(x, (1, 0, 2))
    for layer in params["lstm"]:
        h = run_layer(h, layer)
    y = jnp.transpose(h, (1, 0, 2))
    w, b = params["fcn"]
    return y @ w.T + b


# ----------------------------------- main ----------------------------------- #

if __name__ == "__main__":
    # Shapes consistent with the module; lstm_hidden_size == seq_len so
    # Linear(seq_len, 1) applies to the LSTM output's last dim.
    B, SEQ_LEN, NUM_FREQ_BINS = 2, 16, 32
    HIDDEN, NUM_LAYERS, OUT = 16, 2, 1

    key = jax.random.PRNGKey(0)
    k_x, k_p = jax.random.split(key)
    x = jax.random.normal(k_x, (B, SEQ_LEN, NUM_FREQ_BINS), jnp.float32)
    params = init_params(k_p, NUM_FREQ_BINS, SEQ_LEN, HIDDEN, NUM_LAYERS, OUT)

    out = sdenet_rir_forward(x, params)          # whole batch in one block
    out = jax.block_until_ready(out)
    assert out.shape == (B, SEQ_LEN, OUT)

    ref = jax.block_until_ready(sdenet_rir_reference(x, params))
    # bf16 matmul operands (f32 accumulation / f32 state) vs. the f32 reference:
    # tolerance loosened accordingly.
    np.testing.assert_allclose(np.asarray(out), np.asarray(ref),
                               rtol=1e-2, atol=1e-2)
    print("KERNEL_OK")
</pallas_src>

<mosaic_0001>
module attributes {stable_mosaic.version = 11 : i64} {
  func.func @kernel(%arg0: i32, %arg1: memref<2x16x32xf32, #tpu.memory_space<vmem>>, %arg2: memref<32x128xbf16, #tpu.memory_space<vmem>>, %arg3: memref<16x128xbf16, #tpu.memory_space<vmem>>, %arg4: memref<1x128xf32, #tpu.memory_space<vmem>>, %arg5: memref<16x128xbf16, #tpu.memory_space<vmem>>, %arg6: memref<16x128xbf16, #tpu.memory_space<vmem>>, %arg7: memref<1x128xf32, #tpu.memory_space<vmem>>, %arg8: memref<16x128xbf16, #tpu.memory_space<vmem>>, %arg9: memref<1x128xf32, #tpu.memory_space<vmem>>, %arg10: memref<2x16x128xf32, #tpu.memory_space<vmem>>, %arg11: memref<2x16x16xf32, #tpu.memory_space<vmem>>) attributes {dimension_semantics = [#tpu.dimension_semantics<parallel>], iteration_bounds = array<i64: 1>, scalar_prefetch = 0 : i64, scratch_operands = 1 : i64, tpu.core_type = #tpu.core_type<tc>, window_params = [{transform_indices = @transform_0, window_bounds = array<i64: 2, 16, 32>}, {pipeline_mode = #tpu.pipeline_mode<synchronous>, transform_indices = @transform_1, window_bounds = array<i64: 32, 128>}, {pipeline_mode = #tpu.pipeline_mode<synchronous>, transform_indices = @transform_2, window_bounds = array<i64: 16, 128>}, {pipeline_mode = #tpu.pipeline_mode<synchronous>, transform_indices = @transform_3, window_bounds = array<i64: 1, 128>}, {pipeline_mode = #tpu.pipeline_mode<synchronous>, transform_indices = @transform_4, window_bounds = array<i64: 16, 128>}, {pipeline_mode = #tpu.pipeline_mode<synchronous>, transform_indices = @transform_5, window_bounds = array<i64: 16, 128>}, {pipeline_mode = #tpu.pipeline_mode<synchronous>, transform_indices = @transform_6, window_bounds = array<i64: 1, 128>}, {pipeline_mode = #tpu.pipeline_mode<synchronous>, transform_indices = @transform_7, window_bounds = array<i64: 16, 128>}, {pipeline_mode = #tpu.pipeline_mode<synchronous>, transform_indices = @transform_8, window_bounds = array<i64: 1, 128>}, {transform_indices = @transform_9, window_bounds = array<i64: 2, 16, 128>}]} {
    %c0 = arith.constant 0 : index
    %c0_0 = arith.constant 0 : index
    %c0_1 = arith.constant 0 : index
    %0 = vector.load %arg1[%c0, %c0_0, %c0_1] : memref<2x16x32xf32, #tpu.memory_space<vmem>>, vector<2x16x32xf32>
    %1 = vector.shape_cast %0 : vector<2x16x32xf32> to vector<32x32xf32>
    %2 = arith.truncf %1 : vector<32x32xf32> to vector<32x32xbf16>
    %c0_2 = arith.constant 0 : index
    %c0_3 = arith.constant 0 : index
    %3 = vector.load %arg2[%c0_2, %c0_3] : memref<32x128xbf16, #tpu.memory_space<vmem>>, vector<32x128xbf16>
    %cst = arith.constant dense<0.000000e+00> : vector<32x128xf32>
    %4 = tpu.matmul %2, %3, %cst {dimension_numbers = #tpu.dot_dimension_numbers<[1], [0], [0], [1], [0, 0, 1, 1], [], []>} : vector<32x32xbf16>, vector<32x128xbf16>, vector<32x128xf32> -> vector<32x128xf32>
    %c0_4 = arith.constant 0 : index
    %c0_5 = arith.constant 0 : index
    %5 = vector.load %arg4[%c0_4, %c0_5] : memref<1x128xf32, #tpu.memory_space<vmem>>, vector<1x128xf32>
    %6 = vector.broadcast %5 : vector<1x128xf32> to vector<32x128xf32>
    %7 = arith.addf %4, %6 : vector<32x128xf32>
    %8 = vector.shape_cast %7 : vector<32x128xf32> to vector<2x16x128xf32>
    %c0_6 = arith.constant 0 : index
    %c0_7 = arith.constant 0 : index
    %9 = vector.load %arg3[%c0_6, %c0_7] : memref<16x128xbf16, #tpu.memory_space<vmem>>, vector<16x128xbf16>
    %cst_8 = arith.constant 0.000000e+00 : f32
    %10 = vector.broadcast %cst_8 : f32 to vector<2x16xf32>
    %cst_9 = arith.constant 0.000000e+00 : f32
    %11 = vector.broadcast %cst_9 : f32 to vector<2x16xf32>
    %12 = vector.extract_strided_slice %8 {offsets = [0, 0, 0], sizes = [2, 1, 128], strides = [1, 1, 1]} : vector<2x16x128xf32> to vector<2x1x128xf32>
    %13 = vector.shape_cast %12 : vector<2x1x128xf32> to vector<2x128xf32>
    %14 = arith.truncf %10 : vector<2x16xf32> to vector<2x16xbf16>
    %cst_10 = arith.constant dense<0.000000e+00> : vector<2x128xf32>
    %15 = tpu.matmul %14, %9, %cst_10 {dimension_numbers = #tpu.dot_dimension_numbers<[1], [0], [0], [1], [0, 0, 1, 1], [], []>} : vector<2x16xbf16>, vector<16x128xbf16>, vector<2x128xf32> -> vector<2x128xf32>
    %16 = arith.addf %13, %15 : vector<2x128xf32>
    %17 = vector.extract_strided_slice %16 {offsets = [0, 0], sizes = [2, 64], strides = [1, 1]} : vector<2x128xf32> to vector<2x64xf32>
    %18 = arith.negf %17 : vector<2x64xf32>
    %19 = math.exp %18 : vector<2x64xf32>
    %cst_11 = arith.constant 1.000000e+00 : f32
    %20 = vector.broadcast %cst_11 : f32 to vector<2x64xf32>
    %21 = arith.addf %20, %19 : vector<2x64xf32>
    %22 = arith.divf %20, %21 : vector<2x64xf32>
    %23 = vector.extract_strided_slice %22 {offsets = [0, 0], sizes = [2, 16], strides = [1, 1]} : vector<2x64xf32> to vector<2x16xf32>
    %24 = vector.extract_strided_slice %22 {offsets = [0, 16], sizes = [2, 16], strides = [1, 1]} : vector<2x64xf32> to vector<2x16xf32>
    %25 = vector.extract_strided_slice %22 {offsets = [0, 48], sizes = [2, 16], strides = [1, 1]} : vector<2x64xf32> to vector<2x16xf32>
    %26 = vector.extract_strided_slice %16 {offsets = [0, 32], sizes = [2, 16], strides = [1, 1]} : vector<2x128xf32> to vector<2x16xf32>
    %27 = math.tanh %26 : vector<2x16xf32>
    %28 = arith.mulf %24, %11 : vector<2x16xf32>
    %29 = arith.mulf %23, %27 : vector<2x16xf32>
    %30 = arith.addf %28, %29 : vector<2x16xf32>
    %31 = math.tanh %30 : vector<2x16xf32>
    %32 = arith.mulf %25, %31 : vector<2x16xf32>
    %33 = vector.shape_cast %32 : vector<2x16xf32> to vector<2x1x16xf32>
    %c0_12 = arith.constant 0 : index
    %c0_13 = arith.constant 0 : index
    %c0_14 = arith.constant 0 : index
    %34 = vector.load %arg11[%c0_12, %c0_13, %c0_14] : memref<2x16x16xf32, #tpu.memory_space<vmem>>, vector<2x1x16xf32>
    tpu.vector_store %arg11[%c0_12, %c0_13, %c0_14], %33 {strides = array<i32>} : memref<2x16x16xf32, #tpu.memory_space<vmem>>, vector<2x1x16xf32>,
    %35 = vector.extract_strided_slice %8 {offsets = [0, 1, 0], sizes = [2, 1, 128], strides = [1, 1, 1]} : vector<2x16x128xf32> to vector<2x1x128xf32>
    %36 = vector.shape_cast %35 : vector<2x1x128xf32> to vector<2x128xf32>
    %37 = arith.truncf %32 : vector<2x16xf32> to vector<2x16xbf16>
    %cst_15 = arith.constant dense<0.000000e+00> : vector<2x128xf32>
    %38 = tpu.matmul %37, %9, %cst_15 {dimension_numbers = #tpu.dot_dimension_numbers<[1], [0], [0], [1], [0, 0, 1, 1], [], []>} : vector<2x16xbf16>, vector<16x128xbf16>, vector<2x128xf32> -> vector<2x128xf32>
    %39 = arith.addf %36, %38 : vector<2x128xf32>
    %40 = vector.extract_strided_slice %39 {offsets = [0, 0], sizes = [2, 64], strides = [1, 1]} : vector<2x128xf32> to vector<2x64xf32>
    %41 = arith.negf %40 : vector<2x64xf32>
    %42 = math.exp %41 : vector<2x64xf32>
    %cst_16 = arith.constant 1.000000e+00 : f32
    %43 = vector.broadcast %cst_16 : f32 to vector<2x64xf32>
    %44 = arith.addf %43, %42 : vector<2x64xf32>
    %45 = arith.divf %43, %44 : vector<2x64xf32>
    %46 = vector.extract_strided_slice %45 {offsets = [0, 0], sizes = [2, 16], strides = [1, 1]} : vector<2x64xf32> to vector<2x16xf32>
    %47 = vector.extract_strided_slice %45 {offsets = [0, 16], sizes = [2, 16], strides = [1, 1]} : vector<2x64xf32> to vector<2x16xf32>
    %48 = vector.extract_strided_slice %45 {offsets = [0, 48], sizes = [2, 16], strides = [1, 1]} : vector<2x64xf32> to vector<2x16xf32>
    %49 = vector.extract_strided_slice %39 {offsets = [0, 32], sizes = [2, 16], strides = [1, 1]} : vector<2x128xf32> to vector<2x16xf32>
    %50 = math.tanh %49 : vector<2x16xf32>
    %51 = arith.mulf %47, %30 : vector<2x16xf32>
    %52 = arith.mulf %46, %50 : vector<2x16xf32>
    %53 = arith.addf %51, %52 : vector<2x16xf32>
    %54 = math.tanh %53 : vector<2x16xf32>
    %55 = arith.mulf %48, %54 : vector<2x16xf32>
    %56 = vector.shape_cast %55 : vector<2x16xf32> to vector<2x1x16xf32>
    %c0_17 = arith.constant 0 : index
    %c1 = arith.constant 1 : index
    %c0_18 = arith.constant 0 : index
    %57 = vector.load %arg11[%c0_17, %c1, %c0_18] : memref<2x16x16xf32, #tpu.memory_space<vmem>>, vector<2x1x16xf32>
    tpu.vector_store %arg11[%c0_17, %c1, %c0_18], %56 {strides = array<i32>} : memref<2x16x16xf32, #tpu.memory_space<vmem>>, vector<2x1x16xf32>,
    %58 = vector.extract_strided_slice %8 {offsets = [0, 2, 0], sizes = [2, 1, 128], strides = [1, 1, 1]} : vector<2x16x128xf32> to vector<2x1x128xf32>
    %59 = vector.shape_cast %58 : vector<2x1x128xf32> to vector<2x128xf32>
    %60 = arith.truncf %55 : vector<2x16xf32> to vector<2x16xbf16>
    %cst_19 = arith.constant dense<0.000000e+00> : vector<2x128xf32>
    %61 = tpu.matmul %60, %9, %cst_19 {dimension_numbers = #tpu.dot_dimension_numbers<[1], [0], [0], [1], [0, 0, 1, 1], [], []>} : vector<2x16xbf16>, vector<16x128xbf16>, vector<2x128xf32> -> vector<2x128xf32>
    %62 = arith.addf %59, %61 : vector<2x128xf32>
    %63 = vector.extract_strided_slice %62 {offsets = [0, 0], sizes = [2, 64], strides = [1, 1]} : vector<2x128xf32> to vector<2x64xf32>
    %64 = arith.negf %63 : vector<2x64xf32>
    %65 = math.exp %64 : vector<2x64xf32>
    %cst_20 = arith.constant 1.000000e+00 : f32
    %66 = vector.broadcast %cst_20 : f32 to vector<2x64xf32>
    %67 = arith.addf %66, %65 : vector<2x64xf32>
    %68 = arith.divf %66, %67 : vector<2x64xf32>
    %69 = vector.extract_strided_slice %68 {offsets = [0, 0], sizes = [2, 16], strides = [1, 1]} : vector<2x64xf32> to vector<2x16xf32>
    %70 = vector.extract_strided_slice %68 {offsets = [0, 16], sizes = [2, 16], strides = [1, 1]} : vector<2x64xf32> to vector<2x16xf32>
    %71 = vector.extract_strided_slice %68 {offsets = [0, 48], sizes = [2, 16], strides = [1, 1]} : vector<2x64xf32> to vector<2x16xf32>
    %72 = vector.extract_strided_slice %62 {offsets = [0, 32], sizes = [2, 16], strides = [1, 1]} : vector<2x128xf32> to vector<2x16xf32>
    %73 = math.tanh %72 : vector<2x16xf32>
    %74 = arith.mulf %70, %53 : vector<2x16xf32>
    %75 = arith.mulf %69, %73 : vector<2x16xf32>
    %76 = arith.addf %74, %75 : vector<2x16xf32>
    %77 = math.tanh %76 : vector<2x16xf32>
    %78 = arith.mulf %71, %77 : vector<2x16xf32>
    %79 = vector.shape_cast %78 : vector<2x16xf32> to vector<2x1x16xf32>
    %c0_21 = arith.constant 0 : index
    %c2 = arith.constant 2 : index
    %c0_22 = arith.constant 0 : index
    %80 = vector.load %arg11[%c0_21, %c2, %c0_22] : memref<2x16x16xf32, #tpu.memory_space<vmem>>, vector<2x1x16xf32>
    tpu.vector_store %arg11[%c0_21, %c2, %c0_22], %79 {strides = array<i32>} : memref<2x16x16xf32, #tpu.memory_space<vmem>>, vector<2x1x16xf32>,
    %81 = vector.extract_strided_slice %8 {offsets = [0, 3, 0], sizes = [2, 1, 128], strides = [1, 1, 1]} : vector<2x16x128xf32> to vector<2x1x128xf32>
    %82 = vector.shape_cast %81 : vector<2x1x128xf32> to vector<2x128xf32>
    %83 = arith.truncf %78 : vector<2x16xf32> to vector<2x16xbf16>
    %cst_23 = arith.constant dense<0.000000e+00> : vector<2x128xf32>
    %84 = tpu.matmul %83, %9, %cst_23 {dimension_numbers = #tpu.dot_dimension_numbers<[1], [0], [0], [1], [0, 0, 1, 1], [], []>} : vector<2x16xbf16>, vector<16x128xbf16>, vector<2x128xf32> -> vector<2x128xf32>
    %85 = arith.addf %82, %84 : vector<2x128xf32>
    %86 = vector.extract_strided_slice %85 {offsets = [0, 0], sizes = [2, 64], strides = [1, 1]} : vector<2x128xf32> to vector<2x64xf32>
    %87 = arith.negf %86 : vector<2x64xf32>
    %88 = math.exp %87 : vector<2x64xf32>
    %cst_24 = arith.constant 1.000000e+00 : f32
    %89 = vector.broadcast %cst_24 : f32 to vector<2x64xf32>
    %90 = arith.addf %89, %88 : vector<2x64xf32>
    %91 = arith.divf %89, %90 : vector<2x64xf32>
    %92 = vector.extract_strided_slice %91 {offsets = [0, 0], sizes = [2, 16], strides = [1, 1]} : vector<2x64xf32> to vector<2x16xf32>
    %93 = vector.extract_strided_slice %91 {offsets = [0, 16], sizes = [2, 16], strides = [1, 1]} : vector<2x64xf32> to vector<2x16xf32>
    %94 = vector.extract_strided_slice %91 {offsets = [0, 48], sizes = [2, 16], strides = [1, 1]} : vector<2x64xf32> to vector<2x16xf32>
    %95 = vector.extract_strided_slice %85 {offsets = [0, 32], sizes = [2, 16], strides = [1, 1]} : vector<2x128xf32> to vector<2x16xf32>
    %96 = math.tanh %95 : vector<2x16xf32>
    %97 = arith.mulf %93, %76 : vector<2x16xf32>
    %98 = arith.mulf %92, %96 : vector<2x16xf32>
    %99 = arith.addf %97, %98 : vector<2x16xf32>
    %100 = math.tanh %99 : vector<2x16xf32>
    %101 = arith.mulf %94, %100 : vector<2x16xf32>
    %102 = vector.shape_cast %101 : vector<2x16xf32> to vector<2x1x16xf32>
    %c0_25 = arith.constant 0 : index
    %c3 = arith.constant 3 : index
    %c0_26 = arith.constant 0 : index
    %103 = vector.load %arg11[%c0_25, %c3, %c0_26] : memref<2x16x16xf32, #tpu.memory_space<vmem>>, vector<2x1x16xf32>
    tpu.vector_store %arg11[%c0_25, %c3, %c0_26], %102 {strides = array<i32>} : memref<2x16x16xf32, #tpu.memory_space<vmem>>, vector<2x1x16xf32>,
    %104 = vector.extract_strided_slice %8 {offsets = [0, 4, 0], sizes = [2, 1, 128], strides = [1, 1, 1]} : vector<2x16x128xf32> to vector<2x1x128xf32>
    %105 = vector.shape_cast %104 : vector<2x1x128xf32> to vector<2x128xf32>
    %106 = arith.truncf %101 : vector<2x16xf32> to vector<2x16xbf16>
    %cst_27 = arith.constant dense<0.000000e+00> : vector<2x128xf32>
    %107 = tpu.matmul %106, %9, %cst_27 {dimension_numbers = #tpu.dot_dimension_numbers<[1], [0], [0], [1], [0, 0, 1, 1], [], []>} : vector<2x16xbf16>, vector<16x128xbf16>, vector<2x128xf32> -> vector<2x128xf32>
    %108 = arith.addf %105, %107 : vector<2x128xf32>
    %109 = vector.extract_strided_slice %108 {offsets = [0, 0], sizes = [2, 64], strides = [1, 1]} : vector<2x128xf32> to vector<2x64xf32>
    %110 = arith.negf %109 : vector<2x64xf32>
    %111 = math.exp %110 : vector<2x64xf32>
    %cst_28 = arith.constant 1.000000e+00 : f32
    %112 = vector.broadcast %cst_28 : f32 to vector<2x64xf32>
    %113 = arith.addf %112, %111 : vector<2x64xf32>
    %114 = arith.divf %112, %113 : vector<2x64xf32>
    %115 = vector.extract_strided_slice %114 {offsets = [0, 0], sizes = [2, 16], strides = [1, 1]} : vector<2x64xf32> to vector<2x16xf32>
    %116 = vector.extract_strided_slice %114 {offsets = [0, 16], sizes = [2, 16], strides = [1, 1]} : vector<2x64xf32> to vector<2x16xf32>
    %117 = vector.extract_strided_slice %114 {offsets = [0, 48], sizes = [2, 16], strides = [1, 1]} : vector<2x64xf32> to vector<2x16xf32>
    %118 = vector.extract_strided_slice %108 {offsets = [0, 32], sizes = [2, 16], strides = [1, 1]} : vector<2x128xf32> to vector<2x16xf32>
    %119 = math.tanh %118 : vector<2x16xf32>
    %120 = arith.mulf %116, %99 : vector<2x16xf32>
    %121 = arith.mulf %115, %119 : vector<2x16xf32>
    %122 = arith.addf %120, %121 : vector<2x16xf32>
    %123 = math.tanh %122 : vector<2x16xf32>
    %124 = arith.mulf %117, %123 : vector<2x16xf32>
    %125 = vector.shape_cast %124 : vector<2x16xf32> to vector<2x1x16xf32>
    %c0_29 = arith.constant 0 : index
    %c4 = arith.constant 4 : index
    %c0_30 = arith.constant 0 : index
    %126 = vector.load %arg11[%c0_29, %c4, %c0_30] : memref<2x16x16xf32, #tpu.memory_space<vmem>>, vector<2x1x16xf32>
    tpu.vector_store %arg11[%c0_29, %c4, %c0_30], %125 {strides = array<i32>} : memref<2x16x16xf32, #tpu.memory_space<vmem>>, vector<2x1x16xf32>,
    %127 = vector.extract_strided_slice %8 {offsets = [0, 5, 0], sizes = [2, 1, 128], strides = [1, 1, 1]} : vector<2x16x128xf32> to vector<2x1x128xf32>
    %128 = vector.shape_cast %127 : vector<2x1x128xf32> to vector<2x128xf32>
    %129 = arith.truncf %124 : vector<2x16xf32> to vector<2x16xbf16>
    %cst_31 = arith.constant dense<0.000000e+00> : vector<2x128xf32>
    %130 = tpu.matmul %129, %9, %cst_31 {dimension_numbers = #tpu.dot_dimension_numbers<[1], [0], [0], [1], [0, 0, 1, 1], [], []>} : vector<2x16xbf16>, vector<16x128xbf16>, vector<2x128xf32> -> vector<2x128xf32>
    %131 = arith.addf %128, %130 : vector<2x128xf32>
    %132 = vector.extract_strided_slice %131 {offsets = [0, 0], sizes = [2, 64], strides = [1, 1]} : vector<2x128xf32> to vector<2x64xf32>
    %133 = arith.negf %132 : vector<2x64xf32>
    %134 = math.exp %133 : vector<2x64xf32>
    %cst_32 = arith.constant 1.000000e+00 : f32
    %135 = vector.broadcast %cst_32 : f32 to vector<2x64xf32>
    %136 = arith.addf %135, %134 : vector<2x64xf32>
    %137 = arith.divf %135, %136 : vector<2x64xf32>
    %138 = vector.extract_strided_slice %137 {offsets = [0, 0], sizes = [2, 16], strides = [1, 1]} : vector<2x64xf32> to vector<2x16xf32>
    %139 = vector.extract_strided_slice %137 {offsets = [0, 16], sizes = [2, 16], strides = [1, 1]} : vector<2x64xf32> to vector<2x16xf32>
    %140 = vector.extract_strided_slice %137 {offsets = [0, 48], sizes = [2, 16], strides = [1, 1]} : vector<2x64xf32> to vector<2x16xf32>
    %141 = vector.extract_strided_slice %131 {offsets = [0, 32], sizes = [2, 16], strides = [1, 1]} : vector<2x128xf32> to vector<2x16xf32>
    %142 = math.tanh %141 : vector<2x16xf32>
    %143 = arith.mulf %139, %122 : vector<2x16xf32>
    %144 = arith.mulf %138, %142 : vector<2x16xf32>
    %145 = arith.addf %143, %144 : vector<2x16xf32>
    %146 = math.tanh %145 : vector<2x16xf32>
    %147 = arith.mulf %140, %146 : vector<2x16xf32>
    %148 = vector.shape_cast %147 : vector<2x16xf32> to vector<2x1x16xf32>
    %c0_33 = arith.constant 0 : index
    %c5 = arith.constant 5 : index
    %c0_34 = arith.constant 0 : index
    %149 = vector.load %arg11[%c0_33, %c5, %c0_34] : memref<2x16x16xf32, #tpu.memory_space<vmem>>, vector<2x1x16xf32>
    tpu.vector_store %arg11[%c0_33, %c5, %c0_34], %148 {strides = array<i32>} : memref<2x16x16xf32, #tpu.memory_space<vmem>>, vector<2x1x16xf32>,
    %150 = vector.extract_strided_slice %8 {offsets = [0, 6, 0], sizes = [2, 1, 128], strides = [1, 1, 1]} : vector<2x16x128xf32> to vector<2x1x128xf32>
    %151 = vector.shape_cast %150 : vector<2x1x128xf32> to vector<2x128xf32>
    %152 = arith.truncf %147 : vector<2x16xf32> to vector<2x16xbf16>
    %cst_35 = arith.constant dense<0.000000e+00> : vector<2x128xf32>
    %153 = tpu.matmul %152, %9, %cst_35 {dimension_numbers = #tpu.dot_dimension_numbers<[1], [0], [0], [1], [0, 0, 1, 1], [], []>} : vector<2x16xbf16>, vector<16x128xbf16>, vector<2x128xf32> -> vector<2x128xf32>
    %154 = arith.addf %151, %153 : vector<2x128xf32>
    %155 = vector.extract_strided_slice %154 {offsets = [0, 0], sizes = [2, 64], strides = [1, 1]} : vector<2x128xf32> to vector<2x64xf32>
    %156 = arith.negf %155 : vector<2x64xf32>
    %157 = math.exp %156 : vector<2x64xf32>
    %cst_36 = arith.constant 1.000000e+00 : f32
    %158 = vector.broadcast %cst_36 : f32 to vector<2x64xf32>
    %159 = arith.addf %158, %157 : vector<2x64xf32>
    %160 = arith.divf %158, %159 : vector<2x64xf32>
    %161 = vector.extract_strided_slice %160 {offsets = [0, 0], sizes = [2, 16], strides = [1, 1]} : vector<2x64xf32> to vector<2x16xf32>
    %162 = vector.extract_strided_slice %160 {offsets = [0, 16], sizes = [2, 16], strides = [1, 1]} : vector<2x64xf32> to vector<2x16xf32>
    %163 = vector.extract_strided_slice %160 {offsets = [0, 48], sizes = [2, 16], strides = [1, 1]} : vector<2x64xf32> to vector<2x16xf32>
    %164 = vector.extract_strided_slice %154 {offsets = [0, 32], sizes = [2, 16], strides = [1, 1]} : vector<2x128xf32> to vector<2x16xf32>
    %165 = math.tanh %164 : vector<2x16xf32>
    %166 = arith.mulf %162, %145 : vector<2x16xf32>
    %167 = arith.mulf %161, %165 : vector<2x16xf32>
    %168 = arith.addf %166, %167 : vector<2x16xf32>
    %169 = math.tanh %168 : vector<2x16xf32>
    %170 = arith.mulf %163, %169 : vector<2x16xf32>
    %171 = vector.shape_cast %170 : vector<2x16xf32> to vector<2x1x16xf32>
    %c0_37 = arith.constant 0 : index
    %c6 = arith.constant 6 : index
    %c0_38 = arith.constant 0 : index
    %172 = vector.load %arg11[%c0_37, %c6, %c0_38] : memref<2x16x16xf32, #tpu.memory_space<vmem>>, vector<2x1x16xf32>
    tpu.vector_store %arg11[%c0_37, %c6, %c0_38], %171 {strides = array<i32>} : memref<2x16x16xf32, #tpu.memory_space<vmem>>, vector<2x1x16xf32>,
    %173 = vector.extract_strided_slice %8 {offsets = [0, 7, 0], sizes = [2, 1, 128], strides = [1, 1, 1]} : vector<2x16x128xf32> to vector<2x1x128xf32>
    %174 = vector.shape_cast %173 : vector<2x1x128xf32> to vector<2x128xf32>
    %175 = arith.truncf %170 : vector<2x16xf32> to vector<2x16xbf16>
    %cst_39 = arith.constant dense<0.000000e+00> : vector<2x128xf32>
    %176 = tpu.matmul %175, %9, %cst_39 {dimension_numbers = #tpu.dot_dimension_numbers<[1], [0], [0], [1], [0, 0, 1, 1], [], []>} : vector<2x16xbf16>, vector<16x128xbf16>, vector<2x128xf32> -> vector<2x128xf32>
    %177 = arith.addf %174, %176 : vector<2x128xf32>
    %178 = vector.extract_strided_slice %177 {offsets = [0, 0], sizes = [2, 64], strides = [1, 1]} : vector<2x128xf32> to vector<2x64xf32>
    %179 = arith.negf %178 : vector<2x64xf32>
    %180 = math.exp %179 : vector<2x64xf32>
    %cst_40 = arith.constant 1.000000e+00 : f32
    %181 = vector.broadcast %cst_40 : f32 to vector<2x64xf32>
    %182 = arith.addf %181, %180 : vector<2x64xf32>
    %183 = arith.divf %181, %182 : vector<2x64xf32>
    %184 = vector.extract_strided_slice %183 {offsets = [0, 0], sizes = [2, 16], strides = [1, 1]} : vector<2x64xf32> to vector<2x16xf32>
    %185 = vector.extract_strided_slice %183 {offsets = [0, 16], sizes = [2, 16], strides = [1, 1]} : vector<2x64xf32> to vector<2x16xf32>
    %186 = vector.extract_strided_slice %183 {offsets = [0, 48], sizes = [2, 16], strides = [1, 1]} : vector<2x64xf32> to vector<2x16xf32>
    %187 = vector.extract_strided_slice %177 {offsets = [0, 32], sizes = [2, 16], strides = [1, 1]} : vector<2x128xf32> to vector<2x16xf32>
    %188 = math.tanh %187 : vector<2x16xf32>
    %189 = arith.mulf %185, %168 : vector<2x16xf32>
    %190 = arith.mulf %184, %188 : vector<2x16xf32>
    %191 = arith.addf %189, %190 : vector<2x16xf32>
    %192 = math.tanh %191 : vector<2x16xf32>
    %193 = arith.mulf %186, %192 : vector<2x16xf32>
    %194 = vector.shape_cast %193 : vector<2x16xf32> to vector<2x1x16xf32>
    %c0_41 = arith.constant 0 : index
    %c7 = arith.constant 7 : index
    %c0_42 = arith.constant 0 : index
    %195 = vector.load %arg11[%c0_41, %c7, %c0_42] : memref<2x16x16xf32, #tpu.memory_space<vmem>>, vector<2x1x16xf32>
    tpu.vector_store %arg11[%c0_41, %c7, %c0_42], %194 {strides = array<i32>} : memref<2x16x16xf32, #tpu.memory_space<vmem>>, vector<2x1x16xf32>,
    %196 = vector.extract_strided_slice %8 {offsets = [0, 8, 0], sizes = [2, 1, 128], strides = [1, 1, 1]} : vector<2x16x128xf32> to vector<2x1x128xf32>
    %197 = vector.shape_cast %196 : vector<2x1x128xf32> to vector<2x128xf32>
    %198 = arith.truncf %193 : vector<2x16xf32> to vector<2x16xbf16>
    %cst_43 = arith.constant dense<0.000000e+00> : vector<2x128xf32>
    %199 = tpu.matmul %198, %9, %cst_43 {dimension_numbers = #tpu.dot_dimension_numbers<[1], [0], [0], [1], [0, 0, 1, 1], [], []>} : vector<2x16xbf16>, vector<16x128xbf16>, vector<2x128xf32> -> vector<2x128xf32>
    %200 = arith.addf %197, %199 : vector<2x128xf32>
    %201 = vector.extract_strided_slice %200 {offsets = [0, 0], sizes = [2, 64], strides = [1, 1]} : vector<2x128xf32> to vector<2x64xf32>
    %202 = arith.negf %201 : vector<2x64xf32>
    %203 = math.exp %202 : vector<2x64xf32>
    %cst_44 = arith.constant 1.000000e+00 : f32
    %204 = vector.broadcast %cst_44 : f32 to vector<2x64xf32>
    %205 = arith.addf %204, %203 : vector<2x64xf32>
    %206 = arith.divf %204, %205 : vector<2x64xf32>
    %207 = vector.extract_strided_slice %206 {offsets = [0, 0], sizes = [2, 16], strides = [1, 1]} : vector<2x64xf32> to vector<2x16xf32>
    %208 = vector.extract_strided_slice %206 {offsets = [0, 16], sizes = [2, 16], strides = [1, 1]} : vector<2x64xf32> to vector<2x16xf32>
    %209 = vector.extract_strided_slice %206 {offsets = [0, 48], sizes = [2, 16], strides = [1, 1]} : vector<2x64xf32> to vector<2x16xf32>
    %210 = vector.extract_strided_slice %200 {offsets = [0, 32], sizes = [2, 16], strides = [1, 1]} : vector<2x128xf32> to vector<2x16xf32>
    %211 = math.tanh %210 : vector<2x16xf32>
    %212 = arith.mulf %208, %191 : vector<2x16xf32>
    %213 = arith.mulf %207, %211 : vector<2x16xf32>
    %214 = arith.addf %212, %213 : vector<2x16xf32>
    %215 = math.tanh %214 : vector<2x16xf32>
    %216 = arith.mulf %209, %215 : vector<2x16xf32>
    %217 = vector.shape_cast %216 : vector<2x16xf32> to vector<2x1x16xf32>
    %c0_45 = arith.constant 0 : index
    %c8 = arith.constant 8 : index
    %c0_46 = arith.constant 0 : index
    %218 = vector.load %arg11[%c0_45, %c8, %c0_46] : memref<2x16x16xf32, #tpu.memory_space<vmem>>, vector<2x1x16xf32>
    tpu.vector_store %arg11[%c0_45, %c8, %c0_46], %217 {strides = array<i32>} : memref<2x16x16xf32, #tpu.memory_space<vmem>>, vector<2x1x16xf32>,
    %219 = vector.extract_strided_slice %8 {offsets = [0, 9, 0], sizes = [2, 1, 128], strides = [1, 1, 1]} : vector<2x16x128xf32> to vector<2x1x128xf32>
    %220 = vector.shape_cast %219 : vector<2x1x128xf32> to vector<2x128xf32>
    %221 = arith.truncf %216 : vector<2x16xf32> to vector<2x16xbf16>
    %cst_47 = arith.constant dense<0.000000e+00> : vector<2x128xf32>
    %222 = tpu.matmul %221, %9, %cst_47 {dimension_numbers = #tpu.dot_dimension_numbers<[1], [0], [0], [1], [0, 0, 1, 1], [], []>} : vector<2x16xbf16>, vector<16x128xbf16>, vector<2x128xf32> -> vector<2x128xf32>
    %223 = arith.addf %220, %222 : vector<2x128xf32>
    %224 = vector.extract_strided_slice %223 {offsets = [0, 0], sizes = [2, 64], strides = [1, 1]} : vector<2x128xf32> to vector<2x64xf32>
    %225 = arith.negf %224 : vector<2x64xf32>
    %226 = math.exp %225 : vector<2x64xf32>
    %cst_48 = arith.constant 1.000000e+00 : f32
    %227 = vector.broadcast %cst_48 : f32 to vector<2x64xf32>
    %228 = arith.addf %227, %226 : vector<2x64xf32>
    %229 = arith.divf %227, %228 : vector<2x64xf32>
    %230 = vector.extract_strided_slice %229 {offsets = [0, 0], sizes = [2, 16], strides = [1, 1]} : vector<2x64xf32> to vector<2x16xf32>
    %231 = vector.extract_strided_slice %229 {offsets = [0, 16], sizes = [2, 16], strides = [1, 1]} : vector<2x64xf32> to vector<2x16xf32>
    %232 = vector.extract_strided_slice %229 {offsets = [0, 48], sizes = [2, 16], strides = [1, 1]} : vector<2x64xf32> to vector<2x16xf32>
    %233 = vector.extract_strided_slice %223 {offsets = [0, 32], sizes = [2, 16], strides = [1, 1]} : vector<2x128xf32> to vector<2x16xf32>
    %234 = math.tanh %233 : vector<2x16xf32>
    %235 = arith.mulf %231, %214 : vector<2x16xf32>
    %236 = arith.mulf %230, %234 : vector<2x16xf32>
    %237 = arith.addf %235, %236 : vector<2x16xf32>
    %238 = math.tanh %237 : vector<2x16xf32>
    %239 = arith.mulf %232, %238 : vector<2x16xf32>
    %240 = vector.shape_cast %239 : vector<2x16xf32> to vector<2x1x16xf32>
    %c0_49 = arith.constant 0 : index
    %c9 = arith.constant 9 : index
    %c0_50 = arith.constant 0 : index
    %241 = vector.load %arg11[%c0_49, %c9, %c0_50] : memref<2x16x16xf32, #tpu.memory_space<vmem>>, vector<2x1x16xf32>
    tpu.vector_store %arg11[%c0_49, %c9, %c0_50], %240 {strides = array<i32>} : memref<2x16x16xf32, #tpu.memory_space<vmem>>, vector<2x1x16xf32>,
    %242 = vector.extract_strided_slice %8 {offsets = [0, 10, 0], sizes = [2, 1, 128], strides = [1, 1, 1]} : vector<2x16x128xf32> to vector<2x1x128xf32>
    %243 = vector.shape_cast %242 : vector<2x1x128xf32> to vector<2x128xf32>
    %244 = arith.truncf %239 : vector<2x16xf32> to vector<2x16xbf16>
    %cst_51 = arith.constant dense<0.000000e+00> : vector<2x128xf32>
    %245 = tpu.matmul %244, %9, %cst_51 {dimension_numbers = #tpu.dot_dimension_numbers<[1], [0], [0], [1], [0, 0, 1, 1], [], []>} : vector<2x16xbf16>, vector<16x128xbf16>, vector<2x128xf32> -> vector<2x128xf32>
    %246 = arith.addf %243, %245 : vector<2x128xf32>
    %247 = vector.extract_strided_slice %246 {offsets = [0, 0], sizes = [2, 64], strides = [1, 1]} : vector<2x128xf32> to vector<2x64xf32>
    %248 = arith.negf %247 : vector<2x64xf32>
    %249 = math.exp %248 : vector<2x64xf32>
    %cst_52 = arith.constant 1.000000e+00 : f32
    %250 = vector.broadcast %cst_52 : f32 to vector<2x64xf32>
    %251 = arith.addf %250, %249 : vector<2x64xf32>
    %252 = arith.divf %250, %251 : vector<2x64xf32>
    %253 = vector.extract_strided_slice %252 {offsets = [0, 0], sizes = [2, 16], strides = [1, 1]} : vector<2x64xf32> to vector<2x16xf32>
    %254 = vector.extract_strided_slice %252 {offsets = [0, 16], sizes = [2, 16], strides = [1, 1]} : vector<2x64xf32> to vector<2x16xf32>
    %255 = vector.extract_strided_slice %252 {offsets = [0, 48], sizes = [2, 16], strides = [1, 1]} : vector<2x64xf32> to vector<2x16xf32>
    %256 = vector.extract_strided_slice %246 {offsets = [0, 32], sizes = [2, 16], strides = [1, 1]} : vector<2x128xf32> to vector<2x16xf32>
    %257 = math.tanh %256 : vector<2x16xf32>
    %258 = arith.mulf %254, %237 : vector<2x16xf32>
    %259 = arith.mulf %253, %257 : vector<2x16xf32>
    %260 = arith.addf %258, %259 : vector<2x16xf32>
    %261 = math.tanh %260 : vector<2x16xf32>
    %262 = arith.mulf %255, %261 : vector<2x16xf32>
    %263 = vector.shape_cast %262 : vector<2x16xf32> to vector<2x1x16xf32>
    %c0_53 = arith.constant 0 : index
    %c10 = arith.constant 10 : index
    %c0_54 = arith.constant 0 : index
    %264 = vector.load %arg11[%c0_53, %c10, %c0_54] : memref<2x16x16xf32, #tpu.memory_space<vmem>>, vector<2x1x16xf32>
    tpu.vector_store %arg11[%c0_53, %c10, %c0_54], %263 {strides = array<i32>} : memref<2x16x16xf32, #tpu.memory_space<vmem>>, vector<2x1x16xf32>,
    %265 = vector.extract_strided_slice %8 {offsets = [0, 11, 0], sizes = [2, 1, 128], strides = [1, 1, 1]} : vector<2x16x128xf32> to vector<2x1x128xf32>
    %266 = vector.shape_cast %265 : vector<2x1x128xf32> to vector<2x128xf32>
    %267 = arith.truncf %262 : vector<2x16xf32> to vector<2x16xbf16>
    %cst_55 = arith.constant dense<0.000000e+00> : vector<2x128xf32>
    %268 = tpu.matmul %267, %9, %cst_55 {dimension_numbers = #tpu.dot_dimension_numbers<[1], [0], [0], [1], [0, 0, 1, 1], [], []>} : vector<2x16xbf16>, vector<16x128xbf16>, vector<2x128xf32> -> vector<2x128xf32>
    %269 = arith.addf %266, %268 : vector<2x128xf32>
    %270 = vector.extract_strided_slice %269 {offsets = [0, 0], sizes = [2, 64], strides = [1, 1]} : vector<2x128xf32> to vector<2x64xf32>
    %271 = arith.negf %270 : vector<2x64xf32>
    %272 = math.exp %271 : vector<2x64xf32>
    %cst_56 = arith.constant 1.000000e+00 : f32
    %273 = vector.broadcast %cst_56 : f32 to vector<2x64xf32>
    %274 = arith.addf %273, %272 : vector<2x64xf32>
    %275 = arith.divf %273, %274 : vector<2x64xf32>
    %276 = vector.extract_strided_slice %275 {offsets = [0, 0], sizes = [2, 16], strides = [1, 1]} : vector<2x64xf32> to vector<2x16xf32>
    %277 = vector.extract_strided_slice %275 {offsets = [0, 16], sizes = [2, 16], strides = [1, 1]} : vector<2x64xf32> to vector<2x16xf32>
    %278 = vector.extract_strided_slice %275 {offsets = [0, 48], sizes = [2, 16], strides = [1, 1]} : vector<2x64xf32> to vector<2x16xf32>
    %279 = vector.extract_strided_slice %269 {offsets = [0, 32], sizes = [2, 16], strides = [1, 1]} : vector<2x128xf32> to vector<2x16xf32>
    %280 = math.tanh %279 : vector<2x16xf32>
    %281 = arith.mulf %277, %260 : vector<2x16xf32>
    %282 = arith.mulf %276, %280 : vector<2x16xf32>
    %283 = arith.addf %281, %282 : vector<2x16xf32>
    %284 = math.tanh %283 : vector<2x16xf32>
    %285 = arith.mulf %278, %284 : vector<2x16xf32>
    %286 = vector.shape_cast %285 : vector<2x16xf32> to vector<2x1x16xf32>
    %c0_57 = arith.constant 0 : index
    %c11 = arith.constant 11 : index
    %c0_58 = arith.constant 0 : index
    %287 = vector.load %arg11[%c0_57, %c11, %c0_58] : memref<2x16x16xf32, #tpu.memory_space<vmem>>, vector<2x1x16xf32>
    tpu.vector_store %arg11[%c0_57, %c11, %c0_58], %286 {strides = array<i32>} : memref<2x16x16xf32, #tpu.memory_space<vmem>>, vector<2x1x16xf32>,
    %288 = vector.extract_strided_slice %8 {offsets = [0, 12, 0], sizes = [2, 1, 128], strides = [1, 1, 1]} : vector<2x16x128xf32> to vector<2x1x128xf32>
    %289 = vector.shape_cast %288 : vector<2x1x128xf32> to vector<2x128xf32>
    %290 = arith.truncf %285 : vector<2x16xf32> to vector<2x16xbf16>
    %cst_59 = arith.constant dense<0.000000e+00> : vector<2x128xf32>
    %291 = tpu.matmul %290, %9, %cst_59 {dimension_numbers = #tpu.dot_dimension_numbers<[1], [0], [0], [1], [0, 0, 1, 1], [], []>} : vector<2x16xbf16>, vector<16x128xbf16>, vector<2x128xf32> -> vector<2x128xf32>
    %292 = arith.addf %289, %291 : vector<2x128xf32>
    %293 = vector.extract_strided_slice %292 {offsets = [0, 0], sizes = [2, 64], strides = [1, 1]} : vector<2x128xf32> to vector<2x64xf32>
    %294 = arith.negf %293 : vector<2x64xf32>
    %295 = math.exp %294 : vector<2x64xf32>
    %cst_60 = arith.constant 1.000000e+00 : f32
    %296 = vector.broadcast %cst_60 : f32 to vector<2x64xf32>
    %297 = arith.addf %296, %295 : vector<2x64xf32>
    %298 = arith.divf %296, %297 : vector<2x64xf32>
    %299 = vector.extract_strided_slice %298 {offsets = [0, 0], sizes = [2, 16], strides = [1, 1]} : vector<2x64xf32> to vector<2x16xf32>
    %300 = vector.extract_strided_slice %298 {offsets = [0, 16], sizes = [2, 16], strides = [1, 1]} : vector<2x64xf32> to vector<2x16xf32>
    %301 = vector.extract_strided_slice %298 {offsets = [0, 48], sizes = [2, 16], strides = [1, 1]} : vector<2x64xf32> to vector<2x16xf32>
    %302 = vector.extract_strided_slice %292 {offsets = [0, 32], sizes = [2, 16], strides = [1, 1]} : vector<2x128xf32> to vector<2x16xf32>
    %303 = math.tanh %302 : vector<2x16xf32>
    %304 = arith.mulf %300, %283 : vector<2x16xf32>
    %305 = arith.mulf %299, %303 : vector<2x16xf32>
    %306 = arith.addf %304, %305 : vector<2x16xf32>
    %307 = math.tanh %306 : vector<2x16xf32>
    %308 = arith.mulf %301, %307 : vector<2x16xf32>
    %309 = vector.shape_cast %308 : vector<2x16xf32> to vector<2x1x16xf32>
    %c0_61 = arith.constant 0 : index
    %c12 = arith.constant 12 : index
    %c0_62 = arith.constant 0 : index
    %310 = vector.load %arg11[%c0_61, %c12, %c0_62] : memref<2x16x16xf32, #tpu.memory_space<vmem>>, vector<2x1x16xf32>
    tpu.vector_store %arg11[%c0_61, %c12, %c0_62], %309 {strides = array<i32>} : memref<2x16x16xf32, #tpu.memory_space<vmem>>, vector<2x1x16xf32>,
    %311 = vector.extract_strided_slice %8 {offsets = [0, 13, 0], sizes = [2, 1, 128], strides = [1, 1, 1]} : vector<2x16x128xf32> to vector<2x1x128xf32>
    %312 = vector.shape_cast %311 : vector<2x1x128xf32> to vector<2x128xf32>
    %313 = arith.truncf %308 : vector<2x16xf32> to vector<2x16xbf16>
    %cst_63 = arith.constant dense<0.000000e+00> : vector<2x128xf32>
    %314 = tpu.matmul %313, %9, %cst_63 {dimension_numbers = #tpu.dot_dimension_numbers<[1], [0], [0], [1], [0, 0, 1, 1], [], []>} : vector<2x16xbf16>, vector<16x128xbf16>, vector<2x128xf32> -> vector<2x128xf32>
    %315 = arith.addf %312, %314 : vector<2x128xf32>
    %316 = vector.extract_strided_slice %315 {offsets = [0, 0], sizes = [2, 64], strides = [1, 1]} : vector<2x128xf32> to vector<2x64xf32>
    %317 = arith.negf %316 : vector<2x64xf32>
    %318 = math.exp %317 : vector<2x64xf32>
    %cst_64 = arith.constant 1.000000e+00 : f32
    %319 = vector.broadcast %cst_64 : f32 to vector<2x64xf32>
    %320 = arith.addf %319, %318 : vector<2x64xf32>
    %321 = arith.divf %319, %320 : vector<2x64xf32>
    %322 = vector.extract_strided_slice %321 {offsets = [0, 0], sizes = [2, 16], strides = [1, 1]} : vector<2x64xf32> to vector<2x16xf32>
    %323 = vector.extract_strided_slice %321 {offsets = [0, 16], sizes = [2, 16], strides = [1, 1]} : vector<2x64xf32> to vector<2x16xf32>
    %324 = vector.extract_strided_slice %321 {offsets = [0, 48], sizes = [2, 16], strides = [1, 1]} : vector<2x64xf32> to vector<2x16xf32>
    %325 = vector.extract_strided_slice %315 {offsets = [0, 32], sizes = [2, 16], strides = [1, 1]} : vector<2x128xf32> to vector<2x16xf32>
    %326 = math.tanh %325 : vector<2x16xf32>
    %327 = arith.mulf %323, %306 : vector<2x16xf32>
    %328 = arith.mulf %322, %326 : vector<2x16xf32>
    %329 = arith.addf %327, %328 : vector<2x16xf32>
    %330 = math.tanh %329 : vector<2x16xf32>
    %331 = arith.mulf %324, %330 : vector<2x16xf32>
    %332 = vector.shape_cast %331 : vector<2x16xf32> to vector<2x1x16xf32>
    %c0_65 = arith.constant 0 : index
    %c13 = arith.constant 13 : index
    %c0_66 = arith.constant 0 : index
    %333 = vector.load %arg11[%c0_65, %c13, %c0_66] : memref<2x16x16xf32, #tpu.memory_space<vmem>>, vector<2x1x16xf32>
    tpu.vector_store %arg11[%c0_65, %c13, %c0_66], %332 {strides = array<i32>} : memref<2x16x16xf32, #tpu.memory_space<vmem>>, vector<2x1x16xf32>,
    %334 = vector.extract_strided_slice %8 {offsets = [0, 14, 0], sizes = [2, 1, 128], strides = [1, 1, 1]} : vector<2x16x128xf32> to vector<2x1x128xf32>
    %335 = vector.shape_cast %334 : vector<2x1x128xf32> to vector<2x128xf32>
    %336 = arith.truncf %331 : vector<2x16xf32> to vector<2x16xbf16>
    %cst_67 = arith.constant dense<0.000000e+00> : vector<2x128xf32>
    %337 = tpu.matmul %336, %9, %cst_67 {dimension_numbers = #tpu.dot_dimension_numbers<[1], [0], [0], [1], [0, 0, 1, 1], [], []>} : vector<2x16xbf16>, vector<16x128xbf16>, vector<2x128xf32> -> vector<2x128xf32>
    %338 = arith.addf %335, %337 : vector<2x128xf32>
    %339 = vector.extract_strided_slice %338 {offsets = [0, 0], sizes = [2, 64], strides = [1, 1]} : vector<2x128xf32> to vector<2x64xf32>
    %340 = arith.negf %339 : vector<2x64xf32>
    %341 = math.exp %340 : vector<2x64xf32>
    %cst_68 = arith.constant 1.000000e+00 : f32
    %342 = vector.broadcast %cst_68 : f32 to vector<2x64xf32>
    %343 = arith.addf %342, %341 : vector<2x64xf32>
    %344 = arith.divf %342, %343 : vector<2x64xf32>
    %345 = vector.extract_strided_slice %344 {offsets = [0, 0], sizes = [2, 16], strides = [1, 1]} : vector<2x64xf32> to vector<2x16xf32>
    %346 = vector.extract_strided_slice %344 {offsets = [0, 16], sizes = [2, 16], strides = [1, 1]} : vector<2x64xf32> to vector<2x16xf32>
    %347 = vector.extract_strided_slice %344 {offsets = [0, 48], sizes = [2, 16], strides = [1, 1]} : vector<2x64xf32> to vector<2x16xf32>
    %348 = vector.extract_strided_slice %338 {offsets = [0, 32], sizes = [2, 16], strides = [1, 1]} : vector<2x128xf32> to vector<2x16xf32>
    %349 = math.tanh %348 : vector<2x16xf32>
    %350 = arith.mulf %346, %329 : vector<2x16xf32>
    %351 = arith.mulf %345, %349 : vector<2x16xf32>
    %352 = arith.addf %350, %351 : vector<2x16xf32>
    %353 = math.tanh %352 : vector<2x16xf32>
    %354 = arith.mulf %347, %353 : vector<2x16xf32>
    %355 = vector.shape_cast %354 : vector<2x16xf32> to vector<2x1x16xf32>
    %c0_69 = arith.constant 0 : index
    %c14 = arith.constant 14 : index
    %c0_70 = arith.constant 0 : index
    %356 = vector.load %arg11[%c0_69, %c14, %c0_70] : memref<2x16x16xf32, #tpu.memory_space<vmem>>, vector<2x1x16xf32>
    tpu.vector_store %arg11[%c0_69, %c14, %c0_70], %355 {strides = array<i32>} : memref<2x16x16xf32, #tpu.memory_space<vmem>>, vector<2x1x16xf32>,
    %357 = vector.extract_strided_slice %8 {offsets = [0, 15, 0], sizes = [2, 1, 128], strides = [1, 1, 1]} : vector<2x16x128xf32> to vector<2x1x128xf32>
    %358 = vector.shape_cast %357 : vector<2x1x128xf32> to vector<2x128xf32>
    %359 = arith.truncf %354 : vector<2x16xf32> to vector<2x16xbf16>
    %cst_71 = arith.constant dense<0.000000e+00> : vector<2x128xf32>
    %360 = tpu.matmul %359, %9, %cst_71 {dimension_numbers = #tpu.dot_dimension_numbers<[1], [0], [0], [1], [0, 0, 1, 1], [], []>} : vector<2x16xbf16>, vector<16x128xbf16>, vector<2x128xf32> -> vector<2x128xf32>
    %361 = arith.addf %358, %360 : vector<2x128xf32>
    %362 = vector.extract_strided_slice %361 {offsets = [0, 0], sizes = [2, 64], strides = [1, 1]} : vector<2x128xf32> to vector<2x64xf32>
    %363 = arith.negf %362 : vector<2x64xf32>
    %364 = math.exp %363 : vector<2x64xf32>
    %cst_72 = arith.constant 1.000000e+00 : f32
    %365 = vector.broadcast %cst_72 : f32 to vector<2x64xf32>
    %366 = arith.addf %365, %364 : vector<2x64xf32>
    %367 = arith.divf %365, %366 : vector<2x64xf32>
    %368 = vector.extract_strided_slice %367 {offsets = [0, 0], sizes = [2, 16], strides = [1, 1]} : vector<2x64xf32> to vector<2x16xf32>
    %369 = vector.extract_strided_slice %367 {offsets = [0, 16], sizes = [2, 16], strides = [1, 1]} : vector<2x64xf32> to vector<2x16xf32>
    %370 = vector.extract_strided_slice %367 {offsets = [0, 48], sizes = [2, 16], strides = [1, 1]} : vector<2x64xf32> to vector<2x16xf32>
    %371 = vector.extract_strided_slice %361 {offsets = [0, 32], sizes = [2, 16], strides = [1, 1]} : vector<2x128xf32> to vector<2x16xf32>
    %372 = math.tanh %371 : vector<2x16xf32>
    %373 = arith.mulf %369, %352 : vector<2x16xf32>
    %374 = arith.mulf %368, %372 : vector<2x16xf32>
    %375 = arith.addf %373, %374 : vector<2x16xf32>
    %376 = math.tanh %375 : vector<2x16xf32>
    %377 = arith.mulf %370, %376 : vector<2x16xf32>
    %378 = vector.shape_cast %377 : vector<2x16xf32> to vector<2x1x16xf32>
    %c0_73 = arith.constant 0 : index
    %c15 = arith.constant 15 : index
    %c0_74 = arith.constant 0 : index
    %379 = vector.load %arg11[%c0_73, %c15, %c0_74] : memref<2x16x16xf32, #tpu.memory_space<vmem>>, vector<2x1x16xf32>
    tpu.vector_store %arg11[%c0_73, %c15, %c0_74], %378 {strides = array<i32>} : memref<2x16x16xf32, #tpu.memory_space<vmem>>, vector<2x1x16xf32>,
    %c0_75 = arith.constant 0 : index
    %c0_76 = arith.constant 0 : index
    %c0_77 = arith.constant 0 : index
    %380 = vector.load %arg11[%c0_75, %c0_76, %c0_77] : memref<2x16x16xf32, #tpu.memory_space<vmem>>, vector<2x16x16xf32>
    %381 = vector.shape_cast %380 : vector<2x16x16xf32> to vector<32x16xf32>
    %382 = arith.truncf %381 : vector<32x16xf32> to vector<32x16xbf16>
    %c0_78 = arith.constant 0 : index
    %c0_79 = arith.constant 0 : index
    %383 = vector.load %arg5[%c0_78, %c0_79] : memref<16x128xbf16, #tpu.memory_space<vmem>>, vector<16x128xbf16>
    %cst_80 = arith.constant dense<0.000000e+00> : vector<32x128xf32>
    %384 = tpu.matmul %382, %383, %cst_80 {dimension_numbers = #tpu.dot_dimension_numbers<[1], [0], [0], [1], [0, 0, 1, 1], [], []>} : vector<32x16xbf16>, vector<16x128xbf16>, vector<32x128xf32> -> vector<32x128xf32>
    %c0_81 = arith.constant 0 : index
    %c0_82 = arith.constant 0 : index
    %385 = vector.load %arg7[%c0_81, %c0_82] : memref<1x128xf32, #tpu.memory_space<vmem>>, vector<1x128xf32>
    %386 = vector.broadcast %385 : vector<1x128xf32> to vector<32x128xf32>
    %387 = arith.addf %384, %386 : vector<32x128xf32>
    %388 = vector.shape_cast %387 : vector<32x128xf32> to vector<2x16x128xf32>
    %c0_83 = arith.constant 0 : index
    %c0_84 = arith.constant 0 : index
    %389 = vector.load %arg6[%c0_83, %c0_84] : memref<16x128xbf16, #tpu.memory_space<vmem>>, vector<16x128xbf16>
    %cst_85 = arith.constant 0.000000e+00 : f32
    %390 = vector.broadcast %cst_85 : f32 to vector<2x16xf32>
    %cst_86 = arith.constant 0.000000e+00 : f32
    %391 = vector.broadcast %cst_86 : f32 to vector<2x16xf32>
    %392 = vector.extract_strided_slice %388 {offsets = [0, 0, 0], sizes = [2, 1, 128], strides = [1, 1, 1]} : vector<2x16x128xf32> to vector<2x1x128xf32>
    %393 = vector.shape_cast %392 : vector<2x1x128xf32> to vector<2x128xf32>
    %394 = arith.truncf %390 : vector<2x16xf32> to vector<2x16xbf16>
    %cst_87 = arith.constant dense<0.000000e+00> : vector<2x128xf32>
    %395 = tpu.matmul %394, %389, %cst_87 {dimension_numbers = #tpu.dot_dimension_numbers<[1], [0], [0], [1], [0, 0, 1, 1], [], []>} : vector<2x16xbf16>, vector<16x128xbf16>, vector<2x128xf32> -> vector<2x128xf32>
    %396 = arith.addf %393, %395 : vector<2x128xf32>
    %397 = vector.extract_strided_slice %396 {offsets = [0, 0], sizes = [2, 64], strides = [1, 1]} : vector<2x128xf32> to vector<2x64xf32>
    %398 = arith.negf %397 : vector<2x64xf32>
    %399 = math.exp %398 : vector<2x64xf32>
    %cst_88 = arith.constant 1.000000e+00 : f32
    %400 = vector.broadcast %cst_88 : f32 to vector<2x64xf32>
    %401 = arith.addf %400, %399 : vector<2x64xf32>
    %402 = arith.divf %400, %401 : vector<2x64xf32>
    %403 = vector.extract_strided_slice %402 {offsets = [0, 0], sizes = [2, 16], strides = [1, 1]} : vector<2x64xf32> to vector<2x16xf32>
    %404 = vector.extract_strided_slice %402 {offsets = [0, 16], sizes = [2, 16], strides = [1, 1]} : vector<2x64xf32> to vector<2x16xf32>
    %405 = vector.extract_strided_slice %402 {offsets = [0, 48], sizes = [2, 16], strides = [1, 1]} : vector<2x64xf32> to vector<2x16xf32>
    %406 = vector.extract_strided_slice %396 {offsets = [0, 32], sizes = [2, 16], strides = [1, 1]} : vector<2x128xf32> to vector<2x16xf32>
    %407 = math.tanh %406 : vector<2x16xf32>
    %408 = arith.mulf %404, %391 : vector<2x16xf32>
    %409 = arith.mulf %403, %407 : vector<2x16xf32>
    %410 = arith.addf %408, %409 : vector<2x16xf32>
    %411 = math.tanh %410 : vector<2x16xf32>
    %412 = arith.mulf %405, %411 : vector<2x16xf32>
    %413 = vector.shape_cast %412 : vector<2x16xf32> to vector<2x1x16xf32>
    %c0_89 = arith.constant 0 : index
    %c0_90 = arith.constant 0 : index
    %c0_91 = arith.constant 0 : index
    %414 = vector.load %arg11[%c0_89, %c0_90, %c0_91] : memref<2x16x16xf32, #tpu.memory_space<vmem>>, vector<2x1x16xf32>
    tpu.vector_store %arg11[%c0_89, %c0_90, %c0_91], %413 {strides = array<i32>} : memref<2x16x16xf32, #tpu.memory_space<vmem>>, vector<2x1x16xf32>,
    %415 = vector.extract_strided_slice %388 {offsets = [0, 1, 0], sizes = [2, 1, 128], strides = [1, 1, 1]} : vector<2x16x128xf32> to vector<2x1x128xf32>
    %416 = vector.shape_cast %415 : vector<2x1x128xf32> to vector<2x128xf32>
    %417 = arith.truncf %412 : vector<2x16xf32> to vector<2x16xbf16>
    %cst_92 = arith.constant dense<0.000000e+00> : vector<2x128xf32>
    %418 = tpu.matmul %417, %389, %cst_92 {dimension_numbers = #tpu.dot_dimension_numbers<[1], [0], [0], [1], [0, 0, 1, 1], [], []>} : vector<2x16xbf16>, vector<16x128xbf16>, vector<2x128xf32> -> vector<2x128xf32>
    %419 = arith.addf %416, %418 : vector<2x128xf32>
    %420 = vector.extract_strided_slice %419 {offsets = [0, 0], sizes = [2, 64], strides = [1, 1]} : vector<2x128xf32> to vector<2x64xf32>
    %421 = arith.negf %420 : vector<2x64xf32>
    %422 = math.exp %421 : vector<2x64xf32>
    %cst_93 = arith.constant 1.000000e+00 : f32
    %423 = vector.broadcast %cst_93 : f32 to vector<2x64xf32>
    %424 = arith.addf %423, %422 : vector<2x64xf32>
    %425 = arith.divf %423, %424 : vector<2x64xf32>
    %426 = vector.extract_strided_slice %425 {offsets = [0, 0], sizes = [2, 16], strides = [1, 1]} : vector<2x64xf32> to vector<2x16xf32>
    %427 = vector.extract_strided_slice %425 {offsets = [0, 16], sizes = [2, 16], strides = [1, 1]} : vector<2x64xf32> to vector<2x16xf32>
    %428 = vector.extract_strided_slice %425 {offsets = [0, 48], sizes = [2, 16], strides = [1, 1]} : vector<2x64xf32> to vector<2x16xf32>
    %429 = vector.extract_strided_slice %419 {offsets = [0, 32], sizes = [2, 16], strides = [1, 1]} : vector<2x128xf32> to vector<2x16xf32>
    %430 = math.tanh %429 : vector<2x16xf32>
    %431 = arith.mulf %427, %410 : vector<2x16xf32>
    %432 = arith.mulf %426, %430 : vector<2x16xf32>
    %433 = arith.addf %431, %432 : vector<2x16xf32>
    %434 = math.tanh %433 : vector<2x16xf32>
    %435 = arith.mulf %428, %434 : vector<2x16xf32>
    %436 = vector.shape_cast %435 : vector<2x16xf32> to vector<2x1x16xf32>
    %c0_94 = arith.constant 0 : index
    %c1_95 = arith.constant 1 : index
    %c0_96 = arith.constant 0 : index
    %437 = vector.load %arg11[%c0_94, %c1_95, %c0_96] : memref<2x16x16xf32, #tpu.memory_space<vmem>>, vector<2x1x16xf32>
    tpu.vector_store %arg11[%c0_94, %c1_95, %c0_96], %436 {strides = array<i32>} : memref<2x16x16xf32, #tpu.memory_space<vmem>>, vector<2x1x16xf32>,
    %438 = vector.extract_strided_slice %388 {offsets = [0, 2, 0], sizes = [2, 1, 128], strides = [1, 1, 1]} : vector<2x16x128xf32> to vector<2x1x128xf32>
    %439 = vector.shape_cast %438 : vector<2x1x128xf32> to vector<2x128xf32>
    %440 = arith.truncf %435 : vector<2x16xf32> to vector<2x16xbf16>
    %cst_97 = arith.constant dense<0.000000e+00> : vector<2x128xf32>
    %441 = tpu.matmul %440, %389, %cst_97 {dimension_numbers = #tpu.dot_dimension_numbers<[1], [0], [0], [1], [0, 0, 1, 1], [], []>} : vector<2x16xbf16>, vector<16x128xbf16>, vector<2x128xf32> -> vector<2x128xf32>
    %442 = arith.addf %439, %441 : vector<2x128xf32>
    %443 = vector.extract_strided_slice %442 {offsets = [0, 0], sizes = [2, 64], strides = [1, 1]} : vector<2x128xf32> to vector<2x64xf32>
    %444 = arith.negf %443 : vector<2x64xf32>
    %445 = math.exp %444 : vector<2x64xf32>
    %cst_98 = arith.constant 1.000000e+00 : f32
    %446 = vector.broadcast %cst_98 : f32 to vector<2x64xf32>
    %447 = arith.addf %446, %445 : vector<2x64xf32>
    %448 = arith.divf %446, %447 : vector<2x64xf32>
    %449 = vector.extract_strided_slice %448 {offsets = [0, 0], sizes = [2, 16], strides = [1, 1]} : vector<2x64xf32> to vector<2x16xf32>
    %450 = vector.extract_strided_slice %448 {offsets = [0, 16], sizes = [2, 16], strides = [1, 1]} : vector<2x64xf32> to vector<2x16xf32>
    %451 = vector.extract_strided_slice %448 {offsets = [0, 48], sizes = [2, 16], strides = [1, 1]} : vector<2x64xf32> to vector<2x16xf32>
    %452 = vector.extract_strided_slice %442 {offsets = [0, 32], sizes = [2, 16], strides = [1, 1]} : vector<2x128xf32> to vector<2x16xf32>
    %453 = math.tanh %452 : vector<2x16xf32>
    %454 = arith.mulf %450, %433 : vector<2x16xf32>
    %455 = arith.mulf %449, %453 : vector<2x16xf32>
    %456 = arith.addf %454, %455 : vector<2x16xf32>
    %457 = math.tanh %456 : vector<2x16xf32>
    %458 = arith.mulf %451, %457 : vector<2x16xf32>
    %459 = vector.shape_cast %458 : vector<2x16xf32> to vector<2x1x16xf32>
    %c0_99 = arith.constant 0 : index
    %c2_100 = arith.constant 2 : index
    %c0_101 = arith.constant 0 : index
    %460 = vector.load %arg11[%c0_99, %c2_100, %c0_101] : memref<2x16x16xf32, #tpu.memory_space<vmem>>, vector<2x1x16xf32>
    tpu.vector_store %arg11[%c0_99, %c2_100, %c0_101], %459 {strides = array<i32>} : memref<2x16x16xf32, #tpu.memory_space<vmem>>, vector<2x1x16xf32>,
    %461 = vector.extract_strided_slice %388 {offsets = [0, 3, 0], sizes = [2, 1, 128], strides = [1, 1, 1]} : vector<2x16x128xf32> to vector<2x1x128xf32>
    %462 = vector.shape_cast %461 : vector<2x1x128xf32> to vector<2x128xf32>
    %463 = arith.truncf %458 : vector<2x16xf32> to vector<2x16xbf16>
    %cst_102 = arith.constant dense<0.000000e+00> : vector<2x128xf32>
    %464 = tpu.matmul %463, %389, %cst_102 {dimension_numbers = #tpu.dot_dimension_numbers<[1], [0], [0], [1], [0, 0, 1, 1], [], []>} : vector<2x16xbf16>, vector<16x128xbf16>, vector<2x128xf32> -> vector<2x128xf32>
    %465 = arith.addf %462, %464 : vector<2x128xf32>
    %466 = vector.extract_strided_slice %465 {offsets = [0, 0], sizes = [2, 64], strides = [1, 1]} : vector<2x128xf32> to vector<2x64xf32>
    %467 = arith.negf %466 : vector<2x64xf32>
    %468 = math.exp %467 : vector<2x64xf32>
    %cst_103 = arith.constant 1.000000e+00 : f32
    %469 = vector.broadcast %cst_103 : f32 to vector<2x64xf32>
    %470 = arith.addf %469, %468 : vector<2x64xf32>
    %471 = arith.divf %469, %470 : vector<2x64xf32>
    %472 = vector.extract_strided_slice %471 {offsets = [0, 0], sizes = [2, 16], strides = [1, 1]} : vector<2x64xf32> to vector<2x16xf32>
    %473 = vector.extract_strided_slice %471 {offsets = [0, 16], sizes = [2, 16], strides = [1, 1]} : vector<2x64xf32> to vector<2x16xf32>
    %474 = vector.extract_strided_slice %471 {offsets = [0, 48], sizes = [2, 16], strides = [1, 1]} : vector<2x64xf32> to vector<2x16xf32>
    %475 = vector.extract_strided_slice %465 {offsets = [0, 32], sizes = [2, 16], strides = [1, 1]} : vector<2x128xf32> to vector<2x16xf32>
    %476 = math.tanh %475 : vector<2x16xf32>
    %477 = arith.mulf %473, %456 : vector<2x16xf32>
    %478 = arith.mulf %472, %476 : vector<2x16xf32>
    %479 = arith.addf %477, %478 : vector<2x16xf32>
    %480 = math.tanh %479 : vector<2x16xf32>
    %481 = arith.mulf %474, %480 : vector<2x16xf32>
    %482 = vector.shape_cast %481 : vector<2x16xf32> to vector<2x1x16xf32>
    %c0_104 = arith.constant 0 : index
    %c3_105 = arith.constant 3 : index
    %c0_106 = arith.constant 0 : index
    %483 = vector.load %arg11[%c0_104, %c3_105, %c0_106] : memref<2x16x16xf32, #tpu.memory_space<vmem>>, vector<2x1x16xf32>
    tpu.vector_store %arg11[%c0_104, %c3_105, %c0_106], %482 {strides = array<i32>} : memref<2x16x16xf32, #tpu.memory_space<vmem>>, vector<2x1x16xf32>,
    %484 = vector.extract_strided_slice %388 {offsets = [0, 4, 0], sizes = [2, 1, 128], strides = [1, 1, 1]} : vector<2x16x128xf32> to vector<2x1x128xf32>
    %485 = vector.shape_cast %484 : vector<2x1x128xf32> to vector<2x128xf32>
    %486 = arith.truncf %481 : vector<2x16xf32> to vector<2x16xbf16>
    %cst_107 = arith.constant dense<0.000000e+00> : vector<2x128xf32>
    %487 = tpu.matmul %486, %389, %cst_107 {dimension_numbers = #tpu.dot_dimension_numbers<[1], [0], [0], [1], [0, 0, 1, 1], [], []>} : vector<2x16xbf16>, vector<16x128xbf16>, vector<2x128xf32> -> vector<2x128xf32>
    %488 = arith.addf %485, %487 : vector<2x128xf32>
    %489 = vector.extract_strided_slice %488 {offsets = [0, 0], sizes = [2, 64], strides = [1, 1]} : vector<2x128xf32> to vector<2x64xf32>
    %490 = arith.negf %489 : vector<2x64xf32>
    %491 = math.exp %490 : vector<2x64xf32>
    %cst_108 = arith.constant 1.000000e+00 : f32
    %492 = vector.broadcast %cst_108 : f32 to vector<2x64xf32>
    %493 = arith.addf %492, %491 : vector<2x64xf32>
    %494 = arith.divf %492, %493 : vector<2x64xf32>
    %495 = vector.extract_strided_slice %494 {offsets = [0, 0], sizes = [2, 16], strides = [1, 1]} : vector<2x64xf32> to vector<2x16xf32>
    %496 = vector.extract_strided_slice %494 {offsets = [0, 16], sizes = [2, 16], strides = [1, 1]} : vector<2x64xf32> to vector<2x16xf32>
    %497 = vector.extract_strided_slice %494 {offsets = [0, 48], sizes = [2, 16], strides = [1, 1]} : vector<2x64xf32> to vector<2x16xf32>
    %498 = vector.extract_strided_slice %488 {offsets = [0, 32], sizes = [2, 16], strides = [1, 1]} : vector<2x128xf32> to vector<2x16xf32>
    %499 = math.tanh %498 : vector<2x16xf32>
    %500 = arith.mulf %496, %479 : vector<2x16xf32>
    %501 = arith.mulf %495, %499 : vector<2x16xf32>
    %502 = arith.addf %500, %501 : vector<2x16xf32>
    %503 = math.tanh %502 : vector<2x16xf32>
    %504 = arith.mulf %497, %503 : vector<2x16xf32>
    %505 = vector.shape_cast %504 : vector<2x16xf32> to vector<2x1x16xf32>
    %c0_109 = arith.constant 0 : index
    %c4_110 = arith.constant 4 : index
    %c0_111 = arith.constant 0 : index
    %506 = vector.load %arg11[%c0_109, %c4_110, %c0_111] : memref<2x16x16xf32, #tpu.memory_space<vmem>>, vector<2x1x16xf32>
    tpu.vector_store %arg11[%c0_109, %c4_110, %c0_111], %505 {strides = array<i32>} : memref<2x16x16xf32, #tpu.memory_space<vmem>>, vector<2x1x16xf32>,
    %507 = vector.extract_strided_slice %388 {offsets = [0, 5, 0], sizes = [2, 1, 128], strides = [1, 1, 1]} : vector<2x16x128xf32> to vector<2x1x128xf32>
    %508 = vector.shape_cast %507 : vector<2x1x128xf32> to vector<2x128xf32>
    %509 = arith.truncf %504 : vector<2x16xf32> to vector<2x16xbf16>
    %cst_112 = arith.constant dense<0.000000e+00> : vector<2x128xf32>
    %510 = tpu.matmul %509, %389, %cst_112 {dimension_numbers = #tpu.dot_dimension_numbers<[1], [0], [0], [1], [0, 0, 1, 1], [], []>} : vector<2x16xbf16>, vector<16x128xbf16>, vector<2x128xf32> -> vector<2x128xf32>
    %511 = arith.addf %508, %510 : vector<2x128xf32>
    %512 = vector.extract_strided_slice %511 {offsets = [0, 0], sizes = [2, 64], strides = [1, 1]} : vector<2x128xf32> to vector<2x64xf32>
    %513 = arith.negf %512 : vector<2x64xf32>
    %514 = math.exp %513 : vector<2x64xf32>
    %cst_113 = arith.constant 1.000000e+00 : f32
    %515 = vector.broadcast %cst_113 : f32 to vector<2x64xf32>
    %516 = arith.addf %515, %514 : vector<2x64xf32>
    %517 = arith.divf %515, %516 : vector<2x64xf32>
    %518 = vector.extract_strided_slice %517 {offsets = [0, 0], sizes = [2, 16], strides = [1, 1]} : vector<2x64xf32> to vector<2x16xf32>
    %519 = vector.extract_strided_slice %517 {offsets = [0, 16], sizes = [2, 16], strides = [1, 1]} : vector<2x64xf32> to vector<2x16xf32>
    %520 = vector.extract_strided_slice %517 {offsets = [0, 48], sizes = [2, 16], strides = [1, 1]} : vector<2x64xf32> to vector<2x16xf32>
    %521 = vector.extract_strided_slice %511 {offsets = [0, 32], sizes = [2, 16], strides = [1, 1]} : vector<2x128xf32> to vector<2x16xf32>
    %522 = math.tanh %521 : vector<2x16xf32>
    %523 = arith.mulf %519, %502 : vector<2x16xf32>
    %524 = arith.mulf %518, %522 : vector<2x16xf32>
    %525 = arith.addf %523, %524 : vector<2x16xf32>
    %526 = math.tanh %525 : vector<2x16xf32>
    %527 = arith.mulf %520, %526 : vector<2x16xf32>
    %528 = vector.shape_cast %527 : vector<2x16xf32> to vector<2x1x16xf32>
    %c0_114 = arith.constant 0 : index
    %c5_115 = arith.constant 5 : index
    %c0_116 = arith.constant 0 : index
    %529 = vector.load %arg11[%c0_114, %c5_115, %c0_116] : memref<2x16x16xf32, #tpu.memory_space<vmem>>, vector<2x1x16xf32>
    tpu.vector_store %arg11[%c0_114, %c5_115, %c0_116], %528 {strides = array<i32>} : memref<2x16x16xf32, #tpu.memory_space<vmem>>, vector<2x1x16xf32>,
    %530 = vector.extract_strided_slice %388 {offsets = [0, 6, 0], sizes = [2, 1, 128], strides = [1, 1, 1]} : vector<2x16x128xf32> to vector<2x1x128xf32>
    %531 = vector.shape_cast %530 : vector<2x1x128xf32> to vector<2x128xf32>
    %532 = arith.truncf %527 : vector<2x16xf32> to vector<2x16xbf16>
    %cst_117 = arith.constant dense<0.000000e+00> : vector<2x128xf32>
    %533 = tpu.matmul %532, %389, %cst_117 {dimension_numbers = #tpu.dot_dimension_numbers<[1], [0], [0], [1], [0, 0, 1, 1], [], []>} : vector<2x16xbf16>, vector<16x128xbf16>, vector<2x128xf32> -> vector<2x128xf32>
    %534 = arith.addf %531, %533 : vector<2x128xf32>
    %535 = vector.extract_strided_slice %534 {offsets = [0, 0], sizes = [2, 64], strides = [1, 1]} : vector<2x128xf32> to vector<2x64xf32>
    %536 = arith.negf %535 : vector<2x64xf32>
    %537 = math.exp %536 : vector<2x64xf32>
    %cst_118 = arith.constant 1.000000e+00 : f32
    %538 = vector.broadcast %cst_118 : f32 to vector<2x64xf32>
    %539 = arith.addf %538, %537 : vector<2x64xf32>
    %540 = arith.divf %538, %539 : vector<2x64xf32>
    %541 = vector.extract_strided_slice %540 {offsets = [0, 0], sizes = [2, 16], strides = [1, 1]} : vector<2x64xf32> to vector<2x16xf32>
    %542 = vector.extract_strided_slice %540 {offsets = [0, 16], sizes = [2, 16], strides = [1, 1]} : vector<2x64xf32> to vector<2x16xf32>
    %543 = vector.extract_strided_slice %540 {offsets = [0, 48], sizes = [2, 16], strides = [1, 1]} : vector<2x64xf32> to vector<2x16xf32>
    %544 = vector.extract_strided_slice %534 {offsets = [0, 32], sizes = [2, 16], strides = [1, 1]} : vector<2x128xf32> to vector<2x16xf32>
    %545 = math.tanh %544 : vector<2x16xf32>
    %546 = arith.mulf %542, %525 : vector<2x16xf32>
    %547 = arith.mulf %541, %545 : vector<2x16xf32>
    %548 = arith.addf %546, %547 : vector<2x16xf32>
    %549 = math.tanh %548 : vector<2x16xf32>
    %550 = arith.mulf %543, %549 : vector<2x16xf32>
    %551 = vector.shape_cast %550 : vector<2x16xf32> to vector<2x1x16xf32>
    %c0_119 = arith.constant 0 : index
    %c6_120 = arith.constant 6 : index
    %c0_121 = arith.constant 0 : index
    %552 = vector.load %arg11[%c0_119, %c6_120, %c0_121] : memref<2x16x16xf32, #tpu.memory_space<vmem>>, vector<2x1x16xf32>
    tpu.vector_store %arg11[%c0_119, %c6_120, %c0_121], %551 {strides = array<i32>} : memref<2x16x16xf32, #tpu.memory_space<vmem>>, vector<2x1x16xf32>,
    %553 = vector.extract_strided_slice %388 {offsets = [0, 7, 0], sizes = [2, 1, 128], strides = [1, 1, 1]} : vector<2x16x128xf32> to vector<2x1x128xf32>
    %554 = vector.shape_cast %553 : vector<2x1x128xf32> to vector<2x128xf32>
    %555 = arith.truncf %550 : vector<2x16xf32> to vector<2x16xbf16>
    %cst_122 = arith.constant dense<0.000000e+00> : vector<2x128xf32>
    %556 = tpu.matmul %555, %389, %cst_122 {dimension_numbers = #tpu.dot_dimension_numbers<[1], [0], [0], [1], [0, 0, 1, 1], [], []>} : vector<2x16xbf16>, vector<16x128xbf16>, vector<2x128xf32> -> vector<2x128xf32>
    %557 = arith.addf %554, %556 : vector<2x128xf32>
    %558 = vector.extract_strided_slice %557 {offsets = [0, 0], sizes = [2, 64], strides = [1, 1]} : vector<2x128xf32> to vector<2x64xf32>
    %559 = arith.negf %558 : vector<2x64xf32>
    %560 = math.exp %559 : vector<2x64xf32>
    %cst_123 = arith.constant 1.000000e+00 : f32
    %561 = vector.broadcast %cst_123 : f32 to vector<2x64xf32>
    %562 = arith.addf %561, %560 : vector<2x64xf32>
    %563 = arith.divf %561, %562 : vector<2x64xf32>
    %564 = vector.extract_strided_slice %563 {offsets = [0, 0], sizes = [2, 16], strides = [1, 1]} : vector<2x64xf32> to vector<2x16xf32>
    %565 = vector.extract_strided_slice %563 {offsets = [0, 16], sizes = [2, 16], strides = [1, 1]} : vector<2x64xf32> to vector<2x16xf32>
    %566 = vector.extract_strided_slice %563 {offsets = [0, 48], sizes = [2, 16], strides = [1, 1]} : vector<2x64xf32> to vector<2x16xf32>
    %567 = vector.extract_strided_slice %557 {offsets = [0, 32], sizes = [2, 16], strides = [1, 1]} : vector<2x128xf32> to vector<2x16xf32>
    %568 = math.tanh %567 : vector<2x16xf32>
    %569 = arith.mulf %565, %548 : vector<2x16xf32>
    %570 = arith.mulf %564, %568 : vector<2x16xf32>
    %571 = arith.addf %569, %570 : vector<2x16xf32>
    %572 = math.tanh %571 : vector<2x16xf32>
    %573 = arith.mulf %566, %572 : vector<2x16xf32>
    %574 = vector.shape_cast %573 : vector<2x16xf32> to vector<2x1x16xf32>
    %c0_124 = arith.constant 0 : index
    %c7_125 = arith.constant 7 : index
    %c0_126 = arith.constant 0 : index
    %575 = vector.load %arg11[%c0_124, %c7_125, %c0_126] : memref<2x16x16xf32, #tpu.memory_space<vmem>>, vector<2x1x16xf32>
    tpu.vector_store %arg11[%c0_124, %c7_125, %c0_126], %574 {strides = array<i32>} : memref<2x16x16xf32, #tpu.memory_space<vmem>>, vector<2x1x16xf32>,
    %576 = vector.extract_strided_slice %388 {offsets = [0, 8, 0], sizes = [2, 1, 128], strides = [1, 1, 1]} : vector<2x16x128xf32> to vector<2x1x128xf32>
    %577 = vector.shape_cast %576 : vector<2x1x128xf32> to vector<2x128xf32>
    %578 = arith.truncf %573 : vector<2x16xf32> to vector<2x16xbf16>
    %cst_127 = arith.constant dense<0.000000e+00> : vector<2x128xf32>
    %579 = tpu.matmul %578, %389, %cst_127 {dimension_numbers = #tpu.dot_dimension_numbers<[1], [0], [0], [1], [0, 0, 1, 1], [], []>} : vector<2x16xbf16>, vector<16x128xbf16>, vector<2x128xf32> -> vector<2x128xf32>
    %580 = arith.addf %577, %579 : vector<2x128xf32>
    %581 = vector.extract_strided_slice %580 {offsets = [0, 0], sizes = [2, 64], strides = [1, 1]} : vector<2x128xf32> to vector<2x64xf32>
    %582 = arith.negf %581 : vector<2x64xf32>
    %583 = math.exp %582 : vector<2x64xf32>
    %cst_128 = arith.constant 1.000000e+00 : f32
    %584 = vector.broadcast %cst_128 : f32 to vector<2x64xf32>
    %585 = arith.addf %584, %583 : vector<2x64xf32>
    %586 = arith.divf %584, %585 : vector<2x64xf32>
    %587 = vector.extract_strided_slice %586 {offsets = [0, 0], sizes = [2, 16], strides = [1, 1]} : vector<2x64xf32> to vector<2x16xf32>
    %588 = vector.extract_strided_slice %586 {offsets = [0, 16], sizes = [2, 16], strides = [1, 1]} : vector<2x64xf32> to vector<2x16xf32>
    %589 = vector.extract_strided_slice %586 {offsets = [0, 48], sizes = [2, 16], strides = [1, 1]} : vector<2x64xf32> to vector<2x16xf32>
    %590 = vector.extract_strided_slice %580 {offsets = [0, 32], sizes = [2, 16], strides = [1, 1]} : vector<2x128xf32> to vector<2x16xf32>
    %591 = math.tanh %590 : vector<2x16xf32>
    %592 = arith.mulf %588, %571 : vector<2x16xf32>
    %593 = arith.mulf %587, %591 : vector<2x16xf32>
    %594 = arith.addf %592, %593 : vector<2x16xf32>
    %595 = math.tanh %594 : vector<2x16xf32>
    %596 = arith.mulf %589, %595 : vector<2x16xf32>
    %597 = vector.shape_cast %596 : vector<2x16xf32> to vector<2x1x16xf32>
    %c0_129 = arith.constant 0 : index
    %c8_130 = arith.constant 8 : index
    %c0_131 = arith.constant 0 : index
    %598 = vector.load %arg11[%c0_129, %c8_130, %c0_131] : memref<2x16x16xf32, #tpu.memory_space<vmem>>, vector<2x1x16xf32>
    tpu.vector_store %arg11[%c0_129, %c8_130, %c0_131], %597 {strides = array<i32>} : memref<2x16x16xf32, #tpu.memory_space<vmem>>, vector<2x1x16xf32>,
    %599 = vector.extract_strided_slice %388 {offsets = [0, 9, 0], sizes = [2, 1, 128], strides = [1, 1, 1]} : vector<2x16x128xf32> to vector<2x1x128xf32>
    %600 = vector.shape_cast %599 : vector<2x1x128xf32> to vector<2x128xf32>
    %601 = arith.truncf %596 : vector<2x16xf32> to vector<2x16xbf16>
    %cst_132 = arith.constant dense<0.000000e+00> : vector<2x128xf32>
    %602 = tpu.matmul %601, %389, %cst_132 {dimension_numbers = #tpu.dot_dimension_numbers<[1], [0], [0], [1], [0, 0, 1, 1], [], []>} : vector<2x16xbf16>, vector<16x128xbf16>, vector<2x128xf32> -> vector<2x128xf32>
    %603 = arith.addf %600, %602 : vector<2x128xf32>
    %604 = vector.extract_strided_slice %603 {offsets = [0, 0], sizes = [2, 64], strides = [1, 1]} : vector<2x128xf32> to vector<2x64xf32>
    %605 = arith.negf %604 : vector<2x64xf32>
    %606 = math.exp %605 : vector<2x64xf32>
    %cst_133 = arith.constant 1.000000e+00 : f32
    %607 = vector.broadcast %cst_133 : f32 to vector<2x64xf32>
    %608 = arith.addf %607, %606 : vector<2x64xf32>
    %609 = arith.divf %607, %608 : vector<2x64xf32>
    %610 = vector.extract_strided_slice %609 {offsets = [0, 0], sizes = [2, 16], strides = [1, 1]} : vector<2x64xf32> to vector<2x16xf32>
    %611 = vector.extract_strided_slice %609 {offsets = [0, 16], sizes = [2, 16], strides = [1, 1]} : vector<2x64xf32> to vector<2x16xf32>
    %612 = vector.extract_strided_slice %609 {offsets = [0, 48], sizes = [2, 16], strides = [1, 1]} : vector<2x64xf32> to vector<2x16xf32>
    %613 = vector.extract_strided_slice %603 {offsets = [0, 32], sizes = [2, 16], strides = [1, 1]} : vector<2x128xf32> to vector<2x16xf32>
    %614 = math.tanh %613 : vector<2x16xf32>
    %615 = arith.mulf %611, %594 : vector<2x16xf32>
    %616 = arith.mulf %610, %614 : vector<2x16xf32>
    %617 = arith.addf %615, %616 : vector<2x16xf32>
    %618 = math.tanh %617 : vector<2x16xf32>
    %619 = arith.mulf %612, %618 : vector<2x16xf32>
    %620 = vector.shape_cast %619 : vector<2x16xf32> to vector<2x1x16xf32>
    %c0_134 = arith.constant 0 : index
    %c9_135 = arith.constant 9 : index
    %c0_136 = arith.constant 0 : index
    %621 = vector.load %arg11[%c0_134, %c9_135, %c0_136] : memref<2x16x16xf32, #tpu.memory_space<vmem>>, vector<2x1x16xf32>
    tpu.vector_store %arg11[%c0_134, %c9_135, %c0_136], %620 {strides = array<i32>} : memref<2x16x16xf32, #tpu.memory_space<vmem>>, vector<2x1x16xf32>,
    %622 = vector.extract_strided_slice %388 {offsets = [0, 10, 0], sizes = [2, 1, 128], strides = [1, 1, 1]} : vector<2x16x128xf32> to vector<2x1x128xf32>
    %623 = vector.shape_cast %622 : vector<2x1x128xf32> to vector<2x128xf32>
    %624 = arith.truncf %619 : vector<2x16xf32> to vector<2x16xbf16>
    %cst_137 = arith.constant dense<0.000000e+00> : vector<2x128xf32>
    %625 = tpu.matmul %624, %389, %cst_137 {dimension_numbers = #tpu.dot_dimension_numbers<[1], [0], [0], [1], [0, 0, 1, 1], [], []>} : vector<2x16xbf16>, vector<16x128xbf16>, vector<2x128xf32> -> vector<2x128xf32>
    %626 = arith.addf %623, %625 : vector<2x128xf32>
    %627 = vector.extract_strided_slice %626 {offsets = [0, 0], sizes = [2, 64], strides = [1, 1]} : vector<2x128xf32> to vector<2x64xf32>
    %628 = arith.negf %627 : vector<2x64xf32>
    %629 = math.exp %628 : vector<2x64xf32>
    %cst_138 = arith.constant 1.000000e+00 : f32
    %630 = vector.broadcast %cst_138 : f32 to vector<2x64xf32>
    %631 = arith.addf %630, %629 : vector<2x64xf32>
    %632 = arith.divf %630, %631 : vector<2x64xf32>
    %633 = vector.extract_strided_slice %632 {offsets = [0, 0], sizes = [2, 16], strides = [1, 1]} : vector<2x64xf32> to vector<2x16xf32>
    %634 = vector.extract_strided_slice %632 {offsets = [0, 16], sizes = [2, 16], strides = [1, 1]} : vector<2x64xf32> to vector<2x16xf32>
    %635 = vector.extract_strided_slice %632 {offsets = [0, 48], sizes = [2, 16], strides = [1, 1]} : vector<2x64xf32> to vector<2x16xf32>
    %636 = vector.extract_strided_slice %626 {offsets = [0, 32], sizes = [2, 16], strides = [1, 1]} : vector<2x128xf32> to vector<2x16xf32>
    %637 = math.tanh %636 : vector<2x16xf32>
    %638 = arith.mulf %634, %617 : vector<2x16xf32>
    %639 = arith.mulf %633, %637 : vector<2x16xf32>
    %640 = arith.addf %638, %639 : vector<2x16xf32>
    %641 = math.tanh %640 : vector<2x16xf32>
    %642 = arith.mulf %635, %641 : vector<2x16xf32>
    %643 = vector.shape_cast %642 : vector<2x16xf32> to vector<2x1x16xf32>
    %c0_139 = arith.constant 0 : index
    %c10_140 = arith.constant 10 : index
    %c0_141 = arith.constant 0 : index
    %644 = vector.load %arg11[%c0_139, %c10_140, %c0_141] : memref<2x16x16xf32, #tpu.memory_space<vmem>>, vector<2x1x16xf32>
    tpu.vector_store %arg11[%c0_139, %c10_140, %c0_141], %643 {strides = array<i32>} : memref<2x16x16xf32, #tpu.memory_space<vmem>>, vector<2x1x16xf32>,
    %645 = vector.extract_strided_slice %388 {offsets = [0, 11, 0], sizes = [2, 1, 128], strides = [1, 1, 1]} : vector<2x16x128xf32> to vector<2x1x128xf32>
    %646 = vector.shape_cast %645 : vector<2x1x128xf32> to vector<2x128xf32>
    %647 = arith.truncf %642 : vector<2x16xf32> to vector<2x16xbf16>
    %cst_142 = arith.constant dense<0.000000e+00> : vector<2x128xf32>
    %648 = tpu.matmul %647, %389, %cst_142 {dimension_numbers = #tpu.dot_dimension_numbers<[1], [0], [0], [1], [0, 0, 1, 1], [], []>} : vector<2x16xbf16>, vector<16x128xbf16>, vector<2x128xf32> -> vector<2x128xf32>
    %649 = arith.addf %646, %648 : vector<2x128xf32>
    %650 = vector.extract_strided_slice %649 {offsets = [0, 0], sizes = [2, 64], strides = [1, 1]} : vector<2x128xf32> to vector<2x64xf32>
    %651 = arith.negf %650 : vector<2x64xf32>
    %652 = math.exp %651 : vector<2x64xf32>
    %cst_143 = arith.constant 1.000000e+00 : f32
    %653 = vector.broadcast %cst_143 : f32 to vector<2x64xf32>
    %654 = arith.addf %653, %652 : vector<2x64xf32>
    %655 = arith.divf %653, %654 : vector<2x64xf32>
    %656 = vector.extract_strided_slice %655 {offsets = [0, 0], sizes = [2, 16], strides = [1, 1]} : vector<2x64xf32> to vector<2x16xf32>
    %657 = vector.extract_strided_slice %655 {offsets = [0, 16], sizes = [2, 16], strides = [1, 1]} : vector<2x64xf32> to vector<2x16xf32>
    %658 = vector.extract_strided_slice %655 {offsets = [0, 48], sizes = [2, 16], strides = [1, 1]} : vector<2x64xf32> to vector<2x16xf32>
    %659 = vector.extract_strided_slice %649 {offsets = [0, 32], sizes = [2, 16], strides = [1, 1]} : vector<2x128xf32> to vector<2x16xf32>
    %660 = math.tanh %659 : vector<2x16xf32>
    %661 = arith.mulf %657, %640 : vector<2x16xf32>
    %662 = arith.mulf %656, %660 : vector<2x16xf32>
    %663 = arith.addf %661, %662 : vector<2x16xf32>
    %664 = math.tanh %663 : vector<2x16xf32>
    %665 = arith.mulf %658, %664 : vector<2x16xf32>
    %666 = vector.shape_cast %665 : vector<2x16xf32> to vector<2x1x16xf32>
    %c0_144 = arith.constant 0 : index
    %c11_145 = arith.constant 11 : index
    %c0_146 = arith.constant 0 : index
    %667 = vector.load %arg11[%c0_144, %c11_145, %c0_146] : memref<2x16x16xf32, #tpu.memory_space<vmem>>, vector<2x1x16xf32>
    tpu.vector_store %arg11[%c0_144, %c11_145, %c0_146], %666 {strides = array<i32>} : memref<2x16x16xf32, #tpu.memory_space<vmem>>, vector<2x1x16xf32>,
    %668 = vector.extract_strided_slice %388 {offsets = [0, 12, 0], sizes = [2, 1, 128], strides = [1, 1, 1]} : vector<2x16x128xf32> to vector<2x1x128xf32>
    %669 = vector.shape_cast %668 : vector<2x1x128xf32> to vector<2x128xf32>
    %670 = arith.truncf %665 : vector<2x16xf32> to vector<2x16xbf16>
    %cst_147 = arith.constant dense<0.000000e+00> : vector<2x128xf32>
    %671 = tpu.matmul %670, %389, %cst_147 {dimension_numbers = #tpu.dot_dimension_numbers<[1], [0], [0], [1], [0, 0, 1, 1], [], []>} : vector<2x16xbf16>, vector<16x128xbf16>, vector<2x128xf32> -> vector<2x128xf32>
    %672 = arith.addf %669, %671 : vector<2x128xf32>
    %673 = vector.extract_strided_slice %672 {offsets = [0, 0], sizes = [2, 64], strides = [1, 1]} : vector<2x128xf32> to vector<2x64xf32>
    %674 = arith.negf %673 : vector<2x64xf32>
    %675 = math.exp %674 : vector<2x64xf32>
    %cst_148 = arith.constant 1.000000e+00 : f32
    %676 = vector.broadcast %cst_148 : f32 to vector<2x64xf32>
    %677 = arith.addf %676, %675 : vector<2x64xf32>
    %678 = arith.divf %676, %677 : vector<2x64xf32>
    %679 = vector.extract_strided_slice %678 {offsets = [0, 0], sizes = [2, 16], strides = [1, 1]} : vector<2x64xf32> to vector<2x16xf32>
    %680 = vector.extract_strided_slice %678 {offsets = [0, 16], sizes = [2, 16], strides = [1, 1]} : vector<2x64xf32> to vector<2x16xf32>
    %681 = vector.extract_strided_slice %678 {offsets = [0, 48], sizes = [2, 16], strides = [1, 1]} : vector<2x64xf32> to vector<2x16xf32>
    %682 = vector.extract_strided_slice %672 {offsets = [0, 32], sizes = [2, 16], strides = [1, 1]} : vector<2x128xf32> to vector<2x16xf32>
    %683 = math.tanh %682 : vector<2x16xf32>
    %684 = arith.mulf %680, %663 : vector<2x16xf32>
    %685 = arith.mulf %679, %683 : vector<2x16xf32>
    %686 = arith.addf %684, %685 : vector<2x16xf32>
    %687 = math.tanh %686 : vector<2x16xf32>
    %688 = arith.mulf %681, %687 : vector<2x16xf32>
    %689 = vector.shape_cast %688 : vector<2x16xf32> to vector<2x1x16xf32>
    %c0_149 = arith.constant 0 : index
    %c12_150 = arith.constant 12 : index
    %c0_151 = arith.constant 0 : index
    %690 = vector.load %arg11[%c0_149, %c12_150, %c0_151] : memref<2x16x16xf32, #tpu.memory_space<vmem>>, vector<2x1x16xf32>
    tpu.vector_store %arg11[%c0_149, %c12_150, %c0_151], %689 {strides = array<i32>} : memref<2x16x16xf32, #tpu.memory_space<vmem>>, vector<2x1x16xf32>,
    %691 = vector.extract_strided_slice %388 {offsets = [0, 13, 0], sizes = [2, 1, 128], strides = [1, 1, 1]} : vector<2x16x128xf32> to vector<2x1x128xf32>
    %692 = vector.shape_cast %691 : vector<2x1x128xf32> to vector<2x128xf32>
    %693 = arith.truncf %688 : vector<2x16xf32> to vector<2x16xbf16>
    %cst_152 = arith.constant dense<0.000000e+00> : vector<2x128xf32>
    %694 = tpu.matmul %693, %389, %cst_152 {dimension_numbers = #tpu.dot_dimension_numbers<[1], [0], [0], [1], [0, 0, 1, 1], [], []>} : vector<2x16xbf16>, vector<16x128xbf16>, vector<2x128xf32> -> vector<2x128xf32>
    %695 = arith.addf %692, %694 : vector<2x128xf32>
    %696 = vector.extract_strided_slice %695 {offsets = [0, 0], sizes = [2, 64], strides = [1, 1]} : vector<2x128xf32> to vector<2x64xf32>
    %697 = arith.negf %696 : vector<2x64xf32>
    %698 = math.exp %697 : vector<2x64xf32>
    %cst_153 = arith.constant 1.000000e+00 : f32
    %699 = vector.broadcast %cst_153 : f32 to vector<2x64xf32>
    %700 = arith.addf %699, %698 : vector<2x64xf32>
    %701 = arith.divf %699, %700 : vector<2x64xf32>
    %702 = vector.extract_strided_slice %701 {offsets = [0, 0], sizes = [2, 16], strides = [1, 1]} : vector<2x64xf32> to vector<2x16xf32>
    %703 = vector.extract_strided_slice %701 {offsets = [0, 16], sizes = [2, 16], strides = [1, 1]} : vector<2x64xf32> to vector<2x16xf32>
    %704 = vector.extract_strided_slice %701 {offsets = [0, 48], sizes = [2, 16], strides = [1, 1]} : vector<2x64xf32> to vector<2x16xf32>
    %705 = vector.extract_strided_slice %695 {offsets = [0, 32], sizes = [2, 16], strides = [1, 1]} : vector<2x128xf32> to vector<2x16xf32>
    %706 = math.tanh %705 : vector<2x16xf32>
    %707 = arith.mulf %703, %686 : vector<2x16xf32>
    %708 = arith.mulf %702, %706 : vector<2x16xf32>
    %709 = arith.addf %707, %708 : vector<2x16xf32>
    %710 = math.tanh %709 : vector<2x16xf32>
    %711 = arith.mulf %704, %710 : vector<2x16xf32>
    %712 = vector.shape_cast %711 : vector<2x16xf32> to vector<2x1x16xf32>
    %c0_154 = arith.constant 0 : index
    %c13_155 = arith.constant 13 : index
    %c0_156 = arith.constant 0 : index
    %713 = vector.load %arg11[%c0_154, %c13_155, %c0_156] : memref<2x16x16xf32, #tpu.memory_space<vmem>>, vector<2x1x16xf32>
    tpu.vector_store %arg11[%c0_154, %c13_155, %c0_156], %712 {strides = array<i32>} : memref<2x16x16xf32, #tpu.memory_space<vmem>>, vector<2x1x16xf32>,
    %714 = vector.extract_strided_slice %388 {offsets = [0, 14, 0], sizes = [2, 1, 128], strides = [1, 1, 1]} : vector<2x16x128xf32> to vector<2x1x128xf32>
    %715 = vector.shape_cast %714 : vector<2x1x128xf32> to vector<2x128xf32>
    %716 = arith.truncf %711 : vector<2x16xf32> to vector<2x16xbf16>
    %cst_157 = arith.constant dense<0.000000e+00> : vector<2x128xf32>
    %717 = tpu.matmul %716, %389, %cst_157 {dimension_numbers = #tpu.dot_dimension_numbers<[1], [0], [0], [1], [0, 0, 1, 1], [], []>} : vector<2x16xbf16>, vector<16x128xbf16>, vector<2x128xf32> -> vector<2x128xf32>
    %718 = arith.addf %715, %717 : vector<2x128xf32>
    %719 = vector.extract_strided_slice %718 {offsets = [0, 0], sizes = [2, 64], strides = [1, 1]} : vector<2x128xf32> to vector<2x64xf32>
    %720 = arith.negf %719 : vector<2x64xf32>
    %721 = math.exp %720 : vector<2x64xf32>
    %cst_158 = arith.constant 1.000000e+00 : f32
    %722 = vector.broadcast %cst_158 : f32 to vector<2x64xf32>
    %723 = arith.addf %722, %721 : vector<2x64xf32>
    %724 = arith.divf %722, %723 : vector<2x64xf32>
    %725 = vector.extract_strided_slice %724 {offsets = [0, 0], sizes = [2, 16], strides = [1, 1]} : vector<2x64xf32> to vector<2x16xf32>
    %726 = vector.extract_strided_slice %724 {offsets = [0, 16], sizes = [2, 16], strides = [1, 1]} : vector<2x64xf32> to vector<2x16xf32>
    %727 = vector.extract_strided_slice %724 {offsets = [0, 48], sizes = [2, 16], strides = [1, 1]} : vector<2x64xf32> to vector<2x16xf32>
    %728 = vector.extract_strided_slice %718 {offsets = [0, 32], sizes = [2, 16], strides = [1, 1]} : vector<2x128xf32> to vector<2x16xf32>
    %729 = math.tanh %728 : vector<2x16xf32>
    %730 = arith.mulf %726, %709 : vector<2x16xf32>
    %731 = arith.mulf %725, %729 : vector<2x16xf32>
    %732 = arith.addf %730, %731 : vector<2x16xf32>
    %733 = math.tanh %732 : vector<2x16xf32>
    %734 = arith.mulf %727, %733 : vector<2x16xf32>
    %735 = vector.shape_cast %734 : vector<2x16xf32> to vector<2x1x16xf32>
    %c0_159 = arith.constant 0 : index
    %c14_160 = arith.constant 14 : index
    %c0_161 = arith.constant 0 : index
    %736 = vector.load %arg11[%c0_159, %c14_160, %c0_161] : memref<2x16x16xf32, #tpu.memory_space<vmem>>, vector<2x1x16xf32>
    tpu.vector_store %arg11[%c0_159, %c14_160, %c0_161], %735 {strides = array<i32>} : memref<2x16x16xf32, #tpu.memory_space<vmem>>, vector<2x1x16xf32>,
    %737 = vector.extract_strided_slice %388 {offsets = [0, 15, 0], sizes = [2, 1, 128], strides = [1, 1, 1]} : vector<2x16x128xf32> to vector<2x1x128xf32>
    %738 = vector.shape_cast %737 : vector<2x1x128xf32> to vector<2x128xf32>
    %739 = arith.truncf %734 : vector<2x16xf32> to vector<2x16xbf16>
    %cst_162 = arith.constant dense<0.000000e+00> : vector<2x128xf32>
    %740 = tpu.matmul %739, %389, %cst_162 {dimension_numbers = #tpu.dot_dimension_numbers<[1], [0], [0], [1], [0, 0, 1, 1], [], []>} : vector<2x16xbf16>, vector<16x128xbf16>, vector<2x128xf32> -> vector<2x128xf32>
    %741 = arith.addf %738, %740 : vector<2x128xf32>
    %742 = vector.extract_strided_slice %741 {offsets = [0, 0], sizes = [2, 64], strides = [1, 1]} : vector<2x128xf32> to vector<2x64xf32>
    %743 = arith.negf %742 : vector<2x64xf32>
    %744 = math.exp %743 : vector<2x64xf32>
    %cst_163 = arith.constant 1.000000e+00 : f32
    %745 = vector.broadcast %cst_163 : f32 to vector<2x64xf32>
    %746 = arith.addf %745, %744 : vector<2x64xf32>
    %747 = arith.divf %745, %746 : vector<2x64xf32>
    %748 = vector.extract_strided_slice %747 {offsets = [0, 0], sizes = [2, 16], strides = [1, 1]} : vector<2x64xf32> to vector<2x16xf32>
    %749 = vector.extract_strided_slice %747 {offsets = [0, 16], sizes = [2, 16], strides = [1, 1]} : vector<2x64xf32> to vector<2x16xf32>
    %750 = vector.extract_strided_slice %747 {offsets = [0, 48], sizes = [2, 16], strides = [1, 1]} : vector<2x64xf32> to vector<2x16xf32>
    %751 = vector.extract_strided_slice %741 {offsets = [0, 32], sizes = [2, 16], strides = [1, 1]} : vector<2x128xf32> to vector<2x16xf32>
    %752 = math.tanh %751 : vector<2x16xf32>
    %753 = arith.mulf %749, %732 : vector<2x16xf32>
    %754 = arith.mulf %748, %752 : vector<2x16xf32>
    %755 = arith.addf %753, %754 : vector<2x16xf32>
    %756 = math.tanh %755 : vector<2x16xf32>
    %757 = arith.mulf %750, %756 : vector<2x16xf32>
    %758 = vector.shape_cast %757 : vector<2x16xf32> to vector<2x1x16xf32>
    %c0_164 = arith.constant 0 : index
    %c15_165 = arith.constant 15 : index
    %c0_166 = arith.constant 0 : index
    %759 = vector.load %arg11[%c0_164, %c15_165, %c0_166] : memref<2x16x16xf32, #tpu.memory_space<vmem>>, vector<2x1x16xf32>
    tpu.vector_store %arg11[%c0_164, %c15_165, %c0_166], %758 {strides = array<i32>} : memref<2x16x16xf32, #tpu.memory_space<vmem>>, vector<2x1x16xf32>,
    %c0_167 = arith.constant 0 : index
    %c0_168 = arith.constant 0 : index
    %c0_169 = arith.constant 0 : index
    %760 = vector.load %arg11[%c0_167, %c0_168, %c0_169] : memref<2x16x16xf32, #tpu.memory_space<vmem>>, vector<2x16x16xf32>
    %761 = vector.shape_cast %760 : vector<2x16x16xf32> to vector<32x16xf32>
    %762 = arith.truncf %761 : vector<32x16xf32> to vector<32x16xbf16>
    %c0_170 = arith.constant 0 : index
    %c0_171 = arith.constant 0 : index
    %763 = vector.load %arg8[%c0_170, %c0_171] : memref<16x128xbf16, #tpu.memory_space<vmem>>, vector<16x128xbf16>
    %cst_172 = arith.constant dense<0.000000e+00> : vector<32x128xf32>
    %764 = tpu.matmul %762, %763, %cst_172 {dimension_numbers = #tpu.dot_dimension_numbers<[1], [0], [0], [1], [0, 0, 1, 1], [], []>} : vector<32x16xbf16>, vector<16x128xbf16>, vector<32x128xf32> -> vector<32x128xf32>
    %c0_173 = arith.constant 0 : index
    %c0_174 = arith.constant 0 : index
    %765 = vector.load %arg9[%c0_173, %c0_174] : memref<1x128xf32, #tpu.memory_space<vmem>>, vector<1x128xf32>
    %766 = vector.broadcast %765 : vector<1x128xf32> to vector<32x128xf32>
    %767 = arith.addf %764, %766 : vector<32x128xf32>
    %768 = vector.shape_cast %767 : vector<32x128xf32> to vector<2x16x128xf32>
    %c0_175 = arith.constant 0 : index
    %c0_176 = arith.constant 0 : index
    %c0_177 = arith.constant 0 : index
    %769 = vector.load %arg10[%c0_175, %c0_176, %c0_177] : memref<2x16x128xf32, #tpu.memory_space<vmem>>, vector<2x16x128xf32>
    tpu.vector_store %arg10[%c0_175, %c0_176, %c0_177], %768 {strides = array<i32>} : memref<2x16x128xf32, #tpu.memory_space<vmem>>, vector<2x16x128xf32>,
    return
  }
  func.func @transform_0(%arg0: i32) -> (i32, i32, i32) {
    %c0_i32 = arith.constant 0 : i32
    %c0_i32_0 = arith.constant 0 : i32
    %c0_i32_1 = arith.constant 0 : i32
    return %arg0, %c0_i32, %c0_i32_0 : i32, i32, i32
  }
  func.func @transform_1(%arg0: i32) -> (i32, i32) {
    %c0_i32 = arith.constant 0 : i32
    %c0_i32_0 = arith.constant 0 : i32
    %c0_i32_1 = arith.constant 0 : i32
    return %c0_i32, %c0_i32_0 : i32, i32
  }
  func.func @transform_2(%arg0: i32) -> (i32, i32) {
    %c0_i32 = arith.constant 0 : i32
    %c0_i32_0 = arith.constant 0 : i32
    %c0_i32_1 = arith.constant 0 : i32
    return %c0_i32, %c0_i32_0 : i32, i32
  }
  func.func @transform_3(%arg0: i32) -> (i32, i32) {
    %c0_i32 = arith.constant 0 : i32
    %c0_i32_0 = arith.constant 0 : i32
    %c0_i32_1 = arith.constant 0 : i32
    return %c0_i32, %c0_i32_0 : i32, i32
  }
  func.func @transform_4(%arg0: i32) -> (i32, i32) {
    %c0_i32 = arith.constant 0 : i32
    %c0_i32_0 = arith.constant 0 : i32
    %c0_i32_1 = arith.constant 0 : i32
    return %c0_i32, %c0_i32_0 : i32, i32
  }
  func.func @transform_5(%arg0: i32) -> (i32, i32) {
    %c0_i32 = arith.constant 0 : i32
    %c0_i32_0 = arith.constant 0 : i32
    %c0_i32_1 = arith.constant 0 : i32
    return %c0_i32, %c0_i32_0 : i32, i32
  }
  func.func @transform_6(%arg0: i32) -> (i32, i32) {
    %c0_i32 = arith.constant 0 : i32
    %c0_i32_0 = arith.constant 0 : i32
    %c0_i32_1 = arith.constant 0 : i32
    return %c0_i32, %c0_i32_0 : i32, i32
  }
  func.func @transform_7(%arg0: i32) -> (i32, i32) {
    %c0_i32 = arith.constant 0 : i32
    %c0_i32_0 = arith.constant 0 : i32
    %c0_i32_1 = arith.constant 0 : i32
    return %c0_i32, %c0_i32_0 : i32, i32
  }
  func.func @transform_8(%arg0: i32) -> (i32, i32) {
    %c0_i32 = arith.constant 0 : i32
    %c0_i32_0 = arith.constant 0 : i32
    %c0_i32_1 = arith.constant 0 : i32
    return %c0_i32, %c0_i32_0 : i32, i32
  }
  func.func @transform_9(%arg0: i32) -> (i32, i32, i32) {
    %c0_i32 = arith.constant 0 : i32
    %c0_i32_0 = arith.constant 0 : i32
    %c0_i32_1 = arith.constant 0 : i32
    return %arg0, %c0_i32, %c0_i32_0 : i32, i32, i32
  }
}

</mosaic_0001>

<bundles_post_ra>
// kernel: tpu_custom_call.1
= control target key start
LH: loop header
LB: loop body
LE: loop exit
PB: predicated region body
PF: predicated region fallthrough
CT: control target
= control target key end

     0   :  { %14 = vsyncpa [#allocation4], 0  ;;  %s6541_s0 = inlined_call_operand.hbm [shape: f32[2,16,32], index: 0, kind: input, shape index: {}]   ;;  %s6542_s1 = inlined_call_operand.hbm [shape: bf16[32,128], index: 1, kind: input, shape index: {}]   ;;  %s6543_s2 = inlined_call_operand.hbm [shape: bf16[16,128], index: 2, kind: input, shape index: {}]   ;;  %s6544_s3 = inlined_call_operand.vmem [shape: f32[1,128], index: 3, kind: input, shape index: {}]   ;;  %s6545_s4 = inlined_call_operand.hbm [shape: bf16[16,128], index: 4, kind: input, shape index: {}]   ;;  %s6546_s5 = inlined_call_operand.vmem [shape: bf16[16,128], index: 5, kind: input, shape index: {}]   ;;  %s6547_s6 = inlined_call_operand.vmem [shape: f32[1,128], index: 6, kind: input, shape index: {}]   ;;  %s6548_s7 = inlined_call_operand.hbm [shape: bf16[16,128], index: 7, kind: input, shape index: {}]   ;;  %s6549_s8 = inlined_call_operand.vmem [shape: f32[1,128], index: 8, kind: input, shape index: {}]   ;;  %s6550_s9 = inlined_call_operand.hbm [shape: f32[2,16,128], index: 9, kind: output, shape index: {}]  }
   0x1   :  { %15 = vsyncpa [#allocation7], 0 }
   0x2   :  { %16 = vsyncpa [#allocation10], 0 }
   0x3   :  { %17 = vsyncpa [#allocation5], 0  ;;  %s5426_s30 = smov [#allocation6]  }
   0x4   :  { %s35_s10 = sshll.u32 %s5426_s30, 4  ;;  %s36_s10 = int_to_ptr.vmem [resolvable:$true] %s35_s10 }
   0x5   :  { %s5306_s11 = scalar_lea.vmem %s36_s10, 256  ;;  %p5311_p1 = scmp.lt.s32.totalorder %s36_s10, %s36_s10 }
   0x6   :  { %p5307_p0 = scmp.ne.s32.totalorder %s36_s10, %s5306_s11  ;;  %p5312_p2 = scmp.lt.s32.totalorder %s5306_s11, %s5306_s11 }
   0x8   :  { %p5313_p3 = por %p5312_p2, %p5311_p1 }
   0xa   :  { %p5314_p4 = pnand %p5313_p3, %p5307_p0 }
   0xc   :  { %5317 = shalt.err (!%p5314_p4)
}
   0xd   :  { %s5427_s12 = smov 64   ;;  %s5428_s13 = smov 4  }
   0xe   :  { %41 = dma.hbm_to_vmem [thread:$0]  %s6542_s1, 256, %s36_s10, [#allocation7], %s5427_s12, %s5427_s12, %s5428_s13  }
   0xf   :  { %s5429_s16 = smov [#allocation9]   ;;  %s5430_s18 = smov [#allocation3]  }
  0x10   :  { %s61_s17 = sshll.u32 %s5429_s16, 4  ;;  %s23_s19 = sshll.u32 %s5430_s18, 4  ;;  %s62_s17 = int_to_ptr.vmem [resolvable:$true] %s61_s17  ;;  %s24_s19 = int_to_ptr.vmem [resolvable:$true] %s23_s19 }
  0x11   :  { %s5326_s20 = scalar_lea.vmem %s62_s17, 128  ;;  %p5331_p6 = scmp.lt.s32.totalorder %s62_s17, %s62_s17 }
  0x12   :  { %p5327_p5 = scmp.ne.s32.totalorder %s62_s17, %s5326_s20  ;;  %p5332_p7 = scmp.lt.s32.totalorder %s5326_s20, %s5326_s20 }
  0x14   :  { %p5333_p8 = por %p5332_p7, %p5331_p6 }
  0x16   :  { %p5334_p9 = pnand %p5333_p8, %p5327_p5 }
  0x18   :  { %5337 = shalt.err (!%p5334_p9)
}
  0x19   :  { %67 = dma.hbm_to_vmem [thread:$0]  %s6545_s4, 128, %s62_s17, [#allocation10], %s5427_s12, %s5427_s12, %s5428_s13  }
  0x1a   :  { %s5346_s1 = scalar_lea.vmem %s24_s19, 512  ;;  %p5351_p11 = scmp.lt.s32.totalorder %s24_s19, %s24_s19 }
  0x1b   :  { %p5347_p10 = scmp.ne.s32.totalorder %s24_s19, %s5346_s1  ;;  %p5352_p12 = scmp.lt.s32.totalorder %s5346_s1, %s5346_s1 }
  0x1d   :  { %p5353_p13 = por %p5352_p12, %p5351_p11 }
  0x1f   :  { %p5354_p0 = pnand %p5353_p13, %p5347_p10 }
  0x21   :  { %5357 = shalt.err (!%p5354_p0)
}
  0x22   :  { %s5431_s23 = smov 128   ;;  %s5432_s24 = smov 8  }
  0x23   :  { %29 = dma.hbm_to_vmem [thread:$0]  %s6541_s0, 512, %s24_s19, [#allocation4], %s5431_s23, %s5431_s23, %s5432_s24  }
  0x24   :  { %s5433_s27 = smov [#allocation8]   ;;  %s5434_s4 = smov [#allocation11]  }
  0x25   :  { %s47_s28 = sshll.u32 %s5433_s27, 4  ;;  %s77_s29 = sshll.u32 %s5434_s4, 4  ;;  %s48_s28 = int_to_ptr.vmem [resolvable:$true] %s47_s28  ;;  %s78_s29 = int_to_ptr.vmem [resolvable:$true] %s77_s29 }
  0x26   :  { %s5366_s30 = scalar_lea.vmem %s48_s28, 128  ;;  %p5371_p2 = scmp.lt.s32.totalorder %s48_s28, %s48_s28 }
  0x27   :  { %p5367_p1 = scmp.ne.s32.totalorder %s48_s28, %s5366_s30  ;;  %p5372_p3 = scmp.lt.s32.totalorder %s5366_s30, %s5366_s30 }
  0x29   :  { %p5373_p4 = por %p5372_p3, %p5371_p2 }
  0x2b   :  { %p5374_p5 = pnand %p5373_p4, %p5367_p1 }
  0x2d   :  { %5377 = shalt.err (!%p5374_p5)
}
  0x2e   :  { %53 = dma.hbm_to_vmem [thread:$0]  %s6543_s2, 128, %s48_s28, [#allocation7], %s5427_s12, %s5427_s12, %s5428_s13  }
  0x2f   :  { %s5386_s0 = scalar_lea.vmem %s78_s29, 128  ;;  %p5391_p7 = scmp.lt.s32.totalorder %s78_s29, %s78_s29 }
  0x30   :  { %p5387_p6 = scmp.ne.s32.totalorder %s78_s29, %s5386_s0  ;;  %p5392_p8 = scmp.lt.s32.totalorder %s5386_s0, %s5386_s0 }
  0x32   :  { %p5393_p9 = por %p5392_p8, %p5391_p7 }
  0x34   :  { %p5394_p10 = pnand %p5393_p9, %p5387_p6 }
  0x36   :  { %5397 = shalt.err (!%p5394_p10)
}
  0x37   :  { %83 = dma.hbm_to_vmem [thread:$0]  %s6548_s7, 128, %s78_s29, [#allocation10], %s5427_s12, %s5427_s12, %s5428_s13  }
  0x38   :  { %5418 = dma.done.wait [#allocation4], 512  }
  0x39   :  { %5419 = vsyncadd [#allocation4], 4294966784 }
  0x3a   :  { %5420 = dma.done.wait [#allocation7], 384  }
  0x3b   :  { %5421 = vsyncadd [#allocation7], 4294966912 }
  0x3c   :  { %5422 = dma.done.wait [#allocation10], 256  }
  0x3d   :  { %5423 = vsyncadd [#allocation10], 4294967040  ;;  %v5435_v0 = vmov 0.0   ;;  %vm5436_vm0 = vmmov 0   ;;  %v4777_v1 = vld [vmem:[#allocation6 + $0x8] sm:$0xff]   ;;  %v5526_v2 = vld [vmem:[#allocation8] sm:$0xff]  }
  0x3e   :  { %4556 = vmatprep.subr.bf16.mxu1 %v5435_v0  ;;  %4558 = vmatprep.mubr.msk.bf16.mxu1 %vm5436_vm0, %v5435_v0  ;;  %v4779_v3 = vld [vmem:[#allocation6] sm:$0xff]   ;;  %v103_v5 = vld [vmem:[#allocation3 + $0x8] sm:$0xff]  ;;  %vm131_vm1 = vcmask 261120   ;;  %v104_v6 = vld [vmem:[#allocation3 + $0x10] sm:$0xff]  ;;  %v5437_v9 = vmov 0   ;;  %s5438_s12 = smov 96  }
  0x3f   :  { %4548 = vmatprep.subr.bf16.mxu0 %v4777_v1  ;;  %4557 = vmatpush3.bf16.msra.mxu1 %v5526_v2  ;;  %v102_v4 = vld [vmem:[#allocation3] sm:$0xff]  ;;  %v105_v8 = vld [vmem:[#allocation3 + $0x18] sm:$0xff]  ;;  %s5439_s13 = smov 16   ;;  %s5440_s16 = smov 32   ;;  %vm311_vm2 = vcmask 1041409   ;;  %vm195_vm3 = vcmask 130048  }
  0x40   :  { %4549 = vmatpush3.bf16.msra.mxu0 %v4777_v1  ;;  %v106_v7 = vpack.c.bf16 %v103_v5, %v102_v4  ;;  %4562 = vmatprep.subr.bf16.mxu1 %v5435_v0  ;;  %v107_v10 = vpack.c.bf16 %v105_v8, %v104_v6  ;;  %v4365_v13 = vld [vmem:[%s6544_s3] ss:$0 sm:$0xff]  ;;  %s5441_s17 = smov 80   ;;  %vm427_vm4 = vcmask 123905   ;;  %vm301_vm5 = vcmask 122880   ;;  %s5442_s26 = smov [#allocation12]  }
  0x41   :  { %4550 = vmatprep.subr.bf16.mxu0 %v4779_v3  ;;  %vm680_vm6 = vcmask 125955   ;;  %vm553_vm7 = vcmask 124930   ;;  %vm934_vm8 = vcmask 128005   ;;  %vm807_vm9 = vcmask 126980   ;;  %s4351_s27 = sshll.u32 %s5442_s26, 4  ;;  %s4352_s27 = int_to_ptr.vmem [resolvable:$true] %s4351_s27 }
  0x42   :  { %4559 = vmatmul.mubr.bf16.vlgmr.msra.gmra.mxu1 %v5437_v9  ;;  %4552 = vmatprep.mubr.msk.bf16.mxu0 %vm131_vm1, %v106_v7  ;;  %vm1188_vm10 = vcmask 130055   ;;  %vm1061_vm11 = vcmask 129030   ;;  %s5398_s28 = scalar_lea.vmem %s4352_s27, 512  ;;  %p5403_p12 = scmp.lt.s32.totalorder %s4352_s27, %s4352_s27 }
  0x43   :  { %4563 = vmatpush3.bf16.msra.mxu1 %v5526_v2  ;;  %4564 = vmatprep.mubr.msk.bf16.mxu1 %vm5436_vm0, %v5435_v0  ;;  %p5399_p11 = scmp.ne.s32.totalorder %s4352_s27, %s5398_s28  ;;  %p5404_p13 = scmp.lt.s32.totalorder %s5398_s28, %s5398_s28 }
  0x44   :  { %4551 = vmatpush3.bf16.msra.mxu0 %v4779_v3  ;;  %4574 = vmatprep.subr.bf16.mxu1 %v5435_v0 }
  0x45   :  { %4568 = vmatprep.subr.bf16.mxu0 %v5435_v0  ;;  %p5405_p0 = por %p5404_p13, %p5403_p12 }
  0x47   :  { %4553 = vmatmul.mubr.msk.bf16.vlgmr.msra.gmra.mxu0 %vm131_vm1, %v107_v10  ;;  %p5406_p1 = pnand %p5405_p0, %p5399_p11 }
  0x48   :  { %4569 = vmatpush3.bf16.msra.mxu0 %v5526_v2  ;;  %4570 = vmatprep.mubr.msk.bf16.mxu0 %vm5436_vm0, %v5435_v0 }
  0x49   :  { %4580 = vmatprep.subr.bf16.mxu0 %v5435_v0 }
 0x102   :  { %v233_v11 = vpop.f32.mrf.mxu1 }
 0x103   :  { %v240_v14 = vrot.slane %v233_v11, 1 }
 0x104   :  { %v4560_v12 = vpop.f32.mrf.mxu1 }
 0x106   :  { %v236_v15 = vpop.f32.mrf.mxu1 }
 0x107   :  { %v4554_v16 = vpop.f32.mrf.mxu0 }
 0x108   :  { %v5543_v17 = vadd.f32 %v4554_v16, %v4365_v13  ;;  %v4561_v18 = vpop.f32.mrf.mxu1 }
 0x109   :  { %v172_v19 = vpop.f32.mrf.mxu0 }
 0x10a   :  { %v5545_v20 = vadd.f32 %v4365_v13, %v172_v19  ;;  %v244_v21 = vadd.f32 %v240_v14, %v5543_v17 }
 0x10b   :  { %v4555_v22 = vpop.f32.mrf.mxu0 }
 0x10c   :  { %v243_v23 = vadd.f32 %v233_v11, %v5545_v20  ;;  %v5549_v24 = vadd.f32 %v4555_v22, %v4365_v13  ;;  %4783 = vtanh.f32 %v244_v21  ;;  %v4372_v27 = vmul.f32 -1.442695, %v244_v21 }
 0x10e   :  { %4785 = vtanh.f32 %v243_v23  ;;  %v4371_v28 = vmul.f32 -1.442695, %v243_v23 }
 0x10f   :  { %4787 = vpow2.f32 %v4372_v27 }
 0x110   :  { %4789 = vpow2.f32 %v4371_v28 }
 0x119   :  { %v4784_v25 = vpop.eup %4783 }
 0x11a   :  { %265 = vrot.lane.b32.xlu0 %v4784_v25, %s5438_s12 }
 0x11b   :  { %v4786_v26 = vpop.eup %4785 }
 0x11c   :  { %v4788_v29 = vpop.eup %4787 }
 0x11d   :  { %v252_v30 = vadd.f32 1.0, %v4788_v29  ;;  %v4790_v31 = vpop.eup %4789 }
 0x11e   :  { %263 = vrot.lane.b32.xlu0 %v4786_v26, %s5438_s12  ;;  %v251_v32 = vadd.f32 1.0, %v4790_v31 }
 0x11f   :  { %4791 = vrcp.f32 %v252_v30 }
 0x120   :  { %4793 = vrcp.f32 %v251_v32 }
 0x12c   :  { %v4792_v33 = vpop.eup %4791 }
 0x12d   :  { %v4794_v36 = vpop.eup %4793  ;;  %v260_v39 = vmul.f32 0.0, %v4792_v33 }
 0x12e   :  { %v259_v42 = vmul.f32 0.0, %v4794_v36 }
 0x18c   :  { %v266_v34 = vpop.permute.xlu0 %265 }
 0x18d   :  { %v270_v35 = vmul.f32 %v4792_v33, %v266_v34 }
 0x18f   :  { %275 = vrot.lane.b32.xlu1 %v270_v35, %s5439_s13 }
 0x190   :  { %v264_v37 = vpop.permute.xlu0 %263 }
 0x191   :  { %v269_v38 = vmul.f32 %v4794_v36, %v264_v37 }
 0x193   :  { %273 = vrot.lane.b32.xlu1 %v269_v38, %s5439_s13 }
 0x201   :  { %v276_v40 = vpop.permute.xlu1 %275 }
 0x202   :  { %v5555_v41 = vadd.f32 %v276_v40, %v260_v39 }
 0x204   :  { %4795 = vtanh.f32 %v5555_v41  ;;  %v382_v21 = vrot.slane %v5555_v41, 7 }
 0x205   :  { %v274_v43 = vpop.permute.xlu1 %273 }
 0x206   :  { %v5558_v44 = vadd.f32 %v274_v43, %v259_v42 }
 0x208   :  { %4797 = vtanh.f32 %v5558_v44  ;;  %v381_v23 = vrot.slane %v5558_v44, 7  ;;  %v5606_v44 = vpop.f32.mrf.mxu0 }
 0x211   :  { %v4796_v45 = vpop.eup %4795 }
 0x212   :  { %287 = vrot.lane.b32.xlu0 %v4796_v45, %s5440_s16 }
 0x215   :  { %v4798_v46 = vpop.eup %4797 }
 0x216   :  { %285 = vrot.lane.b32.xlu1 %v4798_v46, %s5440_s16 }
 0x284   :  { %v288_v47 = vpop.permute.xlu0 %287 }
 0x285   :  { %v5563_v48 = vmul.f32 %v4792_v33, %v288_v47 }
 0x287   :  { %v305_v49 = vpack.c.bf16 %v5563_v48, %v5563_v48 }
 0x288   :  { %v286_v50 = vpop.permute.xlu1 %285 }
 0x289   :  { %v309_v51 = vunpack.c.l.b16 %v305_v49  ;;  %v5567_v52 = vmul.f32 %v4794_v36, %v286_v50 }
 0x28b   :  { %v304_v53 = vpack.c.bf16 %v5567_v52, %v5567_v52  ;;  %v310_v54 = vrot.slane %v309_v51, 7 }
 0x28d   :  { %v308_v55 = vunpack.c.l.b16 %v304_v53 }
 0x28f   :  { %v312_v56 = vsel %vm311_vm2, %v310_v54, %v308_v55 }
 0x290   :  { %v313_v57 = vpack.c.b16 %v312_v56, %v312_v56 }
 0x292   :  { %314 = vrot.lane.b32.xlu0 %v313_v57, %s5441_s17 }
 0x304   :  { %v315_v58 = vpop.permute.xlu0 %314 }
 0x305   :  { %4565 = vmatmul.mubr.msk.bf16.vlgmr.msra.gmra.mxu1 %vm195_vm3, %v315_v58 }
 0x306   :  { %4575 = vmatpush3.bf16.msra.mxu1 %v5526_v2  ;;  %4576 = vmatprep.mubr.msk.bf16.mxu1 %vm5436_vm0, %v5435_v0 }
 0x307   :  { %4586 = vmatprep.subr.bf16.mxu1 %v5435_v0 }
 0x3c5   :  { %v353_v59 = vpop.f32.mrf.mxu1 }
 0x3c6   :  { %v360_v60 = vrot.slane %v353_v59, 7  ;;  %v364_v61 = vadd.f32 %v353_v59, %v5543_v17 }
 0x3c7   :  { %v4566_v62 = vpop.f32.mrf.mxu1 }
 0x3c8   :  { %v363_v63 = vadd.f32 %v360_v60, %v5545_v20  ;;  %4799 = vtanh.f32 %v364_v61  ;;  %v4375_v6 = vmul.f32 -1.442695, %v364_v61 }
 0x3c9   :  { %v356_v1 = vpop.f32.mrf.mxu1 }
 0x3ca   :  { %4801 = vtanh.f32 %v363_v63  ;;  %v4374_v7 = vmul.f32 -1.442695, %v363_v63 }
 0x3cb   :  { %v4567_v3 = vpop.f32.mrf.mxu1  ;;  %4803 = vpow2.f32 %v4375_v6 }
 0x3cc   :  { %4805 = vpow2.f32 %v4374_v7 }
 0x3d5   :  { %v4800_v4 = vpop.eup %4799 }
 0x3d6   :  { %391 = vrot.lane.b32.xlu0 %v4800_v4, %s5438_s12 }
 0x3d7   :  { %v4802_v5 = vpop.eup %4801 }
 0x3d8   :  { %389 = vrot.lane.b32.xlu1 %v4802_v5, %s5438_s12  ;;  %v4804_v8 = vpop.eup %4803 }
 0x3d9   :  { %v4806_v10 = vpop.eup %4805  ;;  %v372_v11 = vadd.f32 1.0, %v4804_v8 }
 0x3da   :  { %v371_v12 = vadd.f32 1.0, %v4806_v10 }
 0x3db   :  { %4807 = vrcp.f32 %v372_v11 }
 0x3dc   :  { %4809 = vrcp.f32 %v371_v12 }
 0x3e8   :  { %v4808_v13 = vpop.eup %4807 }
 0x3e9   :  { %v4810_v16 = vpop.eup %4809  ;;  %v386_v22 = vmul.f32 %v4808_v13, %v382_v21 }
 0x3ea   :  { %v385_v27 = vmul.f32 %v4810_v16, %v381_v23 }
 0x448   :  { %v392_v14 = vpop.permute.xlu0 %391 }
 0x449   :  { %v396_v15 = vmul.f32 %v4808_v13, %v392_v14 }
 0x44a   :  { %v390_v18 = vpop.permute.xlu1 %389 }
 0x44b   :  { %401 = vrot.lane.b32.xlu0 %v396_v15, %s5439_s13  ;;  %v395_v19 = vmul.f32 %v4810_v16, %v390_v18 }
 0x44d   :  { %399 = vrot.lane.b32.xlu1 %v395_v19, %s5439_s13 }
 0x4bd   :  { %v402_v25 = vpop.permute.xlu0 %401 }
 0x4be   :  { %v5586_v26 = vadd.f32 %v402_v25, %v386_v22 }
 0x4bf   :  { %v400_v28 = vpop.permute.xlu1 %399 }
 0x4c0   :  { %4811 = vtanh.f32 %v5586_v26  ;;  %v405_v29 = vadd.f32 %v400_v28, %v385_v27  ;;  %v508_v8 = vrot.slane %v5586_v26, 7 }
 0x4c2   :  { %4813 = vtanh.f32 %v405_v29  ;;  %v507_v7 = vrot.slane %v405_v29, 7 }
 0x4cd   :  { %v4812_v30 = vpop.eup %4811 }
 0x4ce   :  { %413 = vrot.lane.b32.xlu0 %v4812_v30, %s5440_s16 }
 0x4cf   :  { %v4814_v31 = vpop.eup %4813 }
 0x4d0   :  { %411 = vrot.lane.b32.xlu1 %v4814_v31, %s5440_s16 }
 0x540   :  { %v414_v32 = vpop.permute.xlu0 %413 }
 0x541   :  { %v5591_v33 = vmul.f32 %v4808_v13, %v414_v32 }
 0x542   :  { %v412_v34 = vpop.permute.xlu1 %411 }
 0x543   :  { %v5593_v35 = vmul.f32 %v4810_v16, %v412_v34  ;;  %v431_v36 = vpack.c.bf16 %v5591_v33, %v5591_v33 }
 0x545   :  { %v430_v37 = vpack.c.bf16 %v5593_v35, %v5593_v35  ;;  %v435_v39 = vunpack.c.l.b16 %v431_v36 }
 0x547   :  { %v434_v38 = vunpack.c.l.b16 %v430_v37 }
 0x549   :  { %v436_v40 = vrot.slane %v434_v38, 1 }
 0x54b   :  { %v437_v41 = vsel %vm311_vm2, %v435_v39, %v436_v40 }
 0x54c   :  { %v438_v42 = vpack.c.b16 %v437_v41, %v437_v41 }
 0x54e   :  { %439 = vrot.lane.b32.xlu1 %v438_v42, %s5441_s17 }
 0x5c0   :  { %v440_v43 = vpop.permute.xlu1 %439 }
 0x5c1   :  { %4571 = vmatmul.mubr.msk.bf16.vlgmr.msra.gmra.mxu0 %vm195_vm3, %v440_v43 }
 0x5c2   :  { %4581 = vmatpush3.bf16.msra.mxu0 %v5526_v2  ;;  %4582 = vmatprep.mubr.msk.bf16.mxu0 %vm5436_vm0, %v5435_v0 }
 0x5c3   :  { %4592 = vmatprep.subr.bf16.mxu0 %v5435_v0 }
 0x681   :  { %v478_v45 = vpop.f32.mrf.mxu0 }
 0x682   :  { %v485_v46 = vrot.slane %v478_v45, 6  ;;  %v486_v47 = vrot.slane %v478_v45, 7 }
 0x683   :  { %v4572_v49 = vpop.f32.mrf.mxu0 }
 0x684   :  { %v489_v50 = vadd.f32 %v485_v46, %v5545_v20  ;;  %v490_v51 = vadd.f32 %v486_v47, %v5543_v17 }
 0x685   :  { %v481_v53 = vpop.f32.mrf.mxu0 }
 0x686   :  { %4815 = vtanh.f32 %v489_v50  ;;  %v4377_v57 = vmul.f32 -1.442695, %v489_v50  ;;  %v4378_v58 = vmul.f32 -1.442695, %v490_v51 }
 0x687   :  { %4817 = vtanh.f32 %v490_v51  ;;  %v4573_v54 = vpop.f32.mrf.mxu0 }
 0x688   :  { %4819 = vpow2.f32 %v4377_v57 }
 0x689   :  { %4821 = vpow2.f32 %v4378_v58 }
 0x693   :  { %v4816_v55 = vpop.eup %4815 }
 0x694   :  { %v4818_v56 = vpop.eup %4817  ;;  %515 = vrot.lane.b32.xlu0 %v4816_v55, %s5438_s12 }
 0x695   :  { %517 = vrot.lane.b32.xlu1 %v4818_v56, %s5438_s12  ;;  %v4820_v59 = vpop.eup %4819 }
 0x696   :  { %v4822_v60 = vpop.eup %4821  ;;  %v497_v61 = vadd.f32 1.0, %v4820_v59 }
 0x697   :  { %v498_v62 = vadd.f32 1.0, %v4822_v60 }
 0x698   :  { %4823 = vrcp.f32 %v497_v61 }
 0x699   :  { %4825 = vrcp.f32 %v498_v62 }
 0x6a5   :  { %v4824_v63 = vpop.eup %4823 }
 0x6a6   :  { %v4826_v3 = vpop.eup %4825  ;;  %v511_v10 = vmul.f32 %v4824_v63, %v507_v7 }
 0x6a7   :  { %v512_v11 = vmul.f32 %v4826_v3, %v508_v8 }
 0x706   :  { %v516_v1 = vpop.permute.xlu0 %515 }
 0x707   :  { %v518_v4 = vpop.permute.xlu1 %517  ;;  %v521_v5 = vmul.f32 %v4824_v63, %v516_v1 }
 0x708   :  { %v522_v6 = vmul.f32 %v4826_v3, %v518_v4 }
 0x709   :  { %525 = vrot.lane.b32.xlu0 %v521_v5, %s5439_s13 }
 0x70a   :  { %527 = vrot.lane.b32.xlu1 %v522_v6, %s5439_s13 }
 0x77b   :  { %v526_v12 = vpop.permute.xlu0 %525 }
 0x77c   :  { %v528_v13 = vpop.permute.xlu1 %527  ;;  %v531_v14 = vadd.f32 %v526_v12, %v511_v10 }
 0x77d   :  { %v532_v15 = vadd.f32 %v528_v13, %v512_v11 }
 0x77e   :  { %4827 = vtanh.f32 %v531_v14  ;;  %v634_v61 = vrot.slane %v531_v14, 7 }
 0x77f   :  { %4829 = vtanh.f32 %v532_v15  ;;  %v635_v62 = vrot.slane %v532_v15, 7 }
 0x78b   :  { %v4828_v16 = vpop.eup %4827 }
 0x78c   :  { %v4830_v18 = vpop.eup %4829  ;;  %537 = vrot.lane.b32.xlu0 %v4828_v16, %s5440_s16 }
 0x78d   :  { %539 = vrot.lane.b32.xlu1 %v4830_v18, %s5440_s16 }
 0x7fe   :  { %v538_v19 = vpop.permute.xlu0 %537 }
 0x7ff   :  { %v540_v21 = vpop.permute.xlu1 %539  ;;  %v5617_v22 = vmul.f32 %v4824_v63, %v538_v19 }
 0x800   :  { %v5619_v23 = vmul.f32 %v4826_v3, %v540_v21 }
 0x801   :  { %v556_v25 = vpack.c.bf16 %v5617_v22, %v5617_v22 }
 0x802   :  { %v557_v26 = vpack.c.bf16 %v5619_v23, %v5619_v23 }
 0x803   :  { %v560_v27 = vunpack.c.l.b16 %v556_v25 }
 0x804   :  { %v561_v28 = vunpack.c.l.b16 %v557_v26 }
 0x805   :  { %v562_v29 = vrot.slane %v560_v27, 2 }
 0x806   :  { %v563_v30 = vrot.slane %v561_v28, 1 }
 0x808   :  { %v564_v31 = vsel %vm311_vm2, %v563_v30, %v562_v29 }
 0x809   :  { %v565_v32 = vpack.c.b16 %v564_v31, %v564_v31 }
 0x80b   :  { %566 = vrot.lane.b32.xlu0 %v565_v32, %s5441_s17 }
 0x87d   :  { %v567_v34 = vpop.permute.xlu0 %566 }
 0x87e   :  { %4577 = vmatmul.mubr.msk.bf16.vlgmr.msra.gmra.mxu1 %vm195_vm3, %v567_v34 }
 0x87f   :  { %4587 = vmatpush3.bf16.msra.mxu1 %v5526_v2  ;;  %4588 = vmatprep.mubr.msk.bf16.mxu1 %vm5436_vm0, %v5435_v0 }
 0x880   :  { %4598 = vmatprep.subr.bf16.mxu1 %v5435_v0 }
 0x93e   :  { %v605_v36 = vpop.f32.mrf.mxu1 }
 0x93f   :  { %v612_v37 = vrot.slane %v605_v36, 5  ;;  %v613_v38 = vrot.slane %v605_v36, 6 }
 0x940   :  { %v4578_v39 = vpop.f32.mrf.mxu1 }
 0x941   :  { %v616_v40 = vadd.f32 %v612_v37, %v5545_v20  ;;  %v617_v41 = vadd.f32 %v613_v38, %v5543_v17 }
 0x942   :  { %v608_v42 = vpop.f32.mrf.mxu1 }
 0x943   :  { %4831 = vtanh.f32 %v616_v40  ;;  %v4380_v47 = vmul.f32 -1.442695, %v616_v40  ;;  %v4381_v49 = vmul.f32 -1.442695, %v617_v41 }
 0x944   :  { %4833 = vtanh.f32 %v617_v41  ;;  %v4579_v43 = vpop.f32.mrf.mxu1 }
 0x945   :  { %4835 = vpow2.f32 %v4380_v47 }
 0x946   :  { %4837 = vpow2.f32 %v4381_v49 }
 0x950   :  { %v4832_v45 = vpop.eup %4831 }
 0x951   :  { %v4834_v46 = vpop.eup %4833  ;;  %642 = vrot.lane.b32.xlu1 %v4832_v45, %s5438_s12 }
 0x952   :  { %644 = vrot.lane.b32.xlu0 %v4834_v46, %s5438_s12  ;;  %v4836_v50 = vpop.eup %4835 }
 0x953   :  { %v4838_v51 = vpop.eup %4837  ;;  %v624_v53 = vadd.f32 1.0, %v4836_v50 }
 0x954   :  { %v625_v54 = vadd.f32 1.0, %v4838_v51 }
 0x955   :  { %4839 = vrcp.f32 %v624_v53 }
 0x956   :  { %4841 = vrcp.f32 %v625_v54 }
 0x962   :  { %v4840_v55 = vpop.eup %4839 }
 0x963   :  { %v4842_v57 = vpop.eup %4841  ;;  %v638_v63 = vmul.f32 %v4840_v55, %v634_v61 }
 0x964   :  { %v639_v1 = vmul.f32 %v4842_v57, %v635_v62 }
 0x9c3   :  { %v643_v56 = vpop.permute.xlu1 %642 }
 0x9c4   :  { %v645_v58 = vpop.permute.xlu0 %644  ;;  %v648_v59 = vmul.f32 %v4840_v55, %v643_v56 }
 0x9c5   :  { %v649_v60 = vmul.f32 %v4842_v57, %v645_v58 }
 0x9c6   :  { %652 = vrot.lane.b32.xlu1 %v648_v59, %s5439_s13 }
 0x9c7   :  { %654 = vrot.lane.b32.xlu0 %v649_v60, %s5439_s13 }
 0xa38   :  { %v653_v3 = vpop.permute.xlu1 %652 }
 0xa39   :  { %v655_v4 = vpop.permute.xlu0 %654  ;;  %v658_v5 = vadd.f32 %v653_v3, %v638_v63 }
 0xa3a   :  { %v659_v6 = vadd.f32 %v655_v4, %v639_v1 }
 0xa3b   :  { %4843 = vtanh.f32 %v658_v5 }
 0xa3c   :  { %4845 = vtanh.f32 %v659_v6  ;;  %v762_v56 = vrot.slane %v659_v6, 7 }
 0xa48   :  { %v4844_v7 = vpop.eup %4843 }
 0xa49   :  { %v4846_v8 = vpop.eup %4845  ;;  %664 = vrot.lane.b32.xlu1 %v4844_v7, %s5440_s16 }
 0xa4a   :  { %666 = vrot.lane.b32.xlu0 %v4846_v8, %s5440_s16 }
 0xabb   :  { %v665_v10 = vpop.permute.xlu1 %664 }
 0xabc   :  { %v667_v11 = vpop.permute.xlu0 %666  ;;  %v5640_v12 = vmul.f32 %v4840_v55, %v665_v10  ;;  %v761_v55 = vrot.slane %v658_v5, 7 }
 0xabd   :  { %v5642_v13 = vmul.f32 %v4842_v57, %v667_v11 }
 0xabe   :  { %v683_v14 = vpack.c.bf16 %v5640_v12, %v5640_v12 }
 0xabf   :  { %v684_v15 = vpack.c.bf16 %v5642_v13, %v5642_v13 }
 0xac0   :  { %v687_v16 = vunpack.c.l.b16 %v683_v14 }
 0xac1   :  { %v688_v18 = vunpack.c.l.b16 %v684_v15 }
 0xac2   :  { %v689_v19 = vrot.slane %v687_v16, 3 }
 0xac3   :  { %v690_v21 = vrot.slane %v688_v18, 2 }
 0xac5   :  { %v691_v25 = vsel %vm311_vm2, %v690_v21, %v689_v19 }
 0xac6   :  { %v692_v26 = vpack.c.b16 %v691_v25, %v691_v25 }
 0xac8   :  { %693 = vrot.lane.b32.xlu1 %v692_v26, %s5441_s17 }
 0xb3a   :  { %v694_v27 = vpop.permute.xlu1 %693 }
 0xb3b   :  { %4583 = vmatmul.mubr.msk.bf16.vlgmr.msra.gmra.mxu0 %vm195_vm3, %v694_v27 }
 0xb3c   :  { %4593 = vmatpush3.bf16.msra.mxu0 %v5526_v2  ;;  %4594 = vmatprep.mubr.msk.bf16.mxu0 %vm5436_vm0, %v5435_v0 }
 0xb3d   :  { %4604 = vmatprep.subr.bf16.mxu0 %v5435_v0 }
 0xbfb   :  { %v732_v28 = vpop.f32.mrf.mxu0 }
 0xbfc   :  { %v739_v29 = vrot.slane %v732_v28, 4  ;;  %v740_v30 = vrot.slane %v732_v28, 5 }
 0xbfd   :  { %v4584_v31 = vpop.f32.mrf.mxu0 }
 0xbfe   :  { %v743_v32 = vadd.f32 %v739_v29, %v5545_v20  ;;  %v744_v34 = vadd.f32 %v740_v30, %v5543_v17 }
 0xbff   :  { %v735_v36 = vpop.f32.mrf.mxu0 }
 0xc00   :  { %4847 = vtanh.f32 %v743_v32  ;;  %v4383_v40 = vmul.f32 -1.442695, %v743_v32  ;;  %v4384_v41 = vmul.f32 -1.442695, %v744_v34 }
 0xc01   :  { %4849 = vtanh.f32 %v744_v34  ;;  %v4585_v37 = vpop.f32.mrf.mxu0 }
 0xc02   :  { %4851 = vpow2.f32 %v4383_v40 }
 0xc03   :  { %4853 = vpow2.f32 %v4384_v41 }
 0xc0d   :  { %v4848_v38 = vpop.eup %4847 }
 0xc0e   :  { %v4850_v39 = vpop.eup %4849  ;;  %769 = vrot.lane.b32.xlu0 %v4848_v38, %s5438_s12 }
 0xc0f   :  { %771 = vrot.lane.b32.xlu1 %v4850_v39, %s5438_s12  ;;  %v4852_v42 = vpop.eup %4851 }
 0xc10   :  { %v4854_v43 = vpop.eup %4853  ;;  %v751_v45 = vadd.f32 1.0, %v4852_v42 }
 0xc11   :  { %v752_v46 = vadd.f32 1.0, %v4854_v43 }
 0xc12   :  { %4855 = vrcp.f32 %v751_v45 }
 0xc13   :  { %4857 = vrcp.f32 %v752_v46 }
 0xc1f   :  { %v4856_v47 = vpop.eup %4855 }
 0xc20   :  { %v4858_v50 = vpop.eup %4857  ;;  %v765_v57 = vmul.f32 %v4856_v47, %v761_v55 }
 0xc21   :  { %v766_v58 = vmul.f32 %v4858_v50, %v762_v56 }
 0xc80   :  { %v770_v49 = vpop.permute.xlu0 %769 }
 0xc81   :  { %v772_v51 = vpop.permute.xlu1 %771  ;;  %v775_v53 = vmul.f32 %v4856_v47, %v770_v49 }
 0xc82   :  { %v776_v54 = vmul.f32 %v4858_v50, %v772_v51 }
 0xc83   :  { %779 = vrot.lane.b32.xlu0 %v775_v53, %s5439_s13 }
 0xc84   :  { %781 = vrot.lane.b32.xlu1 %v776_v54, %s5439_s13 }
 0xcf5   :  { %v780_v59 = vpop.permute.xlu0 %779 }
 0xcf6   :  { %v782_v60 = vpop.permute.xlu1 %781  ;;  %v785_v61 = vadd.f32 %v780_v59, %v765_v57 }
 0xcf7   :  { %v786_v62 = vadd.f32 %v782_v60, %v766_v58 }
 0xcf8   :  { %4859 = vtanh.f32 %v785_v61 }
 0xcf9   :  { %4861 = vtanh.f32 %v786_v62  ;;  %v889_v51 = vrot.slane %v786_v62, 7 }
 0xd05   :  { %v4860_v63 = vpop.eup %4859 }
 0xd06   :  { %v4862_v1 = vpop.eup %4861  ;;  %791 = vrot.lane.b32.xlu0 %v4860_v63, %s5440_s16 }
 0xd07   :  { %793 = vrot.lane.b32.xlu1 %v4862_v1, %s5440_s16 }
 0xd78   :  { %v792_v3 = vpop.permute.xlu0 %791 }
 0xd79   :  { %v794_v4 = vpop.permute.xlu1 %793  ;;  %v5663_v7 = vmul.f32 %v4856_v47, %v792_v3 }
 0xd7a   :  { %v5665_v5 = vmul.f32 %v4858_v50, %v794_v4  ;;  %v888_v50 = vrot.slane %v785_v61, 7 }
 0xd7b   :  { %v810_v6 = vpack.c.bf16 %v5663_v7, %v5663_v7 }
 0xd7c   :  { %v811_v8 = vpack.c.bf16 %v5665_v5, %v5665_v5 }
 0xd7d   :  { %v814_v10 = vunpack.c.l.b16 %v810_v6 }
 0xd7e   :  { %v815_v11 = vunpack.c.l.b16 %v811_v8 }
 0xd7f   :  { %v816_v14 = vrot.slane %v814_v10, 4 }
 0xd80   :  { %v817_v15 = vrot.slane %v815_v11, 3 }
 0xd82   :  { %v818_v16 = vsel %vm311_vm2, %v817_v15, %v816_v14 }
 0xd83   :  { %v819_v18 = vpack.c.b16 %v818_v16, %v818_v16 }
 0xd85   :  { %820 = vrot.lane.b32.xlu0 %v819_v18, %s5441_s17 }
 0xdf7   :  { %v821_v19 = vpop.permute.xlu0 %820 }
 0xdf8   :  { %4589 = vmatmul.mubr.msk.bf16.vlgmr.msra.gmra.mxu1 %vm195_vm3, %v821_v19 }
 0xdf9   :  { %4599 = vmatpush3.bf16.msra.mxu1 %v5526_v2  ;;  %4600 = vmatprep.mubr.msk.bf16.mxu1 %vm5436_vm0, %v5435_v0 }
 0xdfa   :  { %4610 = vmatprep.subr.bf16.mxu1 %v5435_v0 }
 0xeb8   :  { %v859_v21 = vpop.f32.mrf.mxu1 }
 0xeb9   :  { %v866_v25 = vrot.slane %v859_v21, 3  ;;  %v867_v26 = vrot.slane %v859_v21, 4 }
 0xeba   :  { %v4590_v27 = vpop.f32.mrf.mxu1 }
 0xebb   :  { %v870_v28 = vadd.f32 %v866_v25, %v5545_v20  ;;  %v871_v29 = vadd.f32 %v867_v26, %v5543_v17 }
 0xebc   :  { %v862_v30 = vpop.f32.mrf.mxu1 }
 0xebd   :  { %4863 = vtanh.f32 %v870_v28  ;;  %v4386_v36 = vmul.f32 -1.442695, %v870_v28  ;;  %v4387_v37 = vmul.f32 -1.442695, %v871_v29 }
 0xebe   :  { %4865 = vtanh.f32 %v871_v29  ;;  %v4591_v31 = vpop.f32.mrf.mxu1 }
 0xebf   :  { %4867 = vpow2.f32 %v4386_v36 }
 0xec0   :  { %4869 = vpow2.f32 %v4387_v37 }
 0xeca   :  { %v4864_v32 = vpop.eup %4863 }
 0xecb   :  { %v4866_v34 = vpop.eup %4865  ;;  %896 = vrot.lane.b32.xlu1 %v4864_v32, %s5438_s12 }
 0xecc   :  { %898 = vrot.lane.b32.xlu0 %v4866_v34, %s5438_s12  ;;  %v4868_v38 = vpop.eup %4867 }
 0xecd   :  { %v4870_v39 = vpop.eup %4869  ;;  %v878_v40 = vadd.f32 1.0, %v4868_v38 }
 0xece   :  { %v879_v41 = vadd.f32 1.0, %v4870_v39 }
 0xecf   :  { %4871 = vrcp.f32 %v878_v40 }
 0xed0   :  { %4873 = vrcp.f32 %v879_v41 }
 0xedc   :  { %v4872_v42 = vpop.eup %4871 }
 0xedd   :  { %v4874_v45 = vpop.eup %4873  ;;  %v892_v53 = vmul.f32 %v4872_v42, %v888_v50 }
 0xede   :  { %v893_v54 = vmul.f32 %v4874_v45, %v889_v51 }
 0xf3d   :  { %v897_v43 = vpop.permute.xlu1 %896 }
 0xf3e   :  { %v899_v46 = vpop.permute.xlu0 %898  ;;  %v902_v47 = vmul.f32 %v4872_v42, %v897_v43 }
 0xf3f   :  { %v903_v49 = vmul.f32 %v4874_v45, %v899_v46 }
 0xf40   :  { %906 = vrot.lane.b32.xlu1 %v902_v47, %s5439_s13 }
 0xf41   :  { %908 = vrot.lane.b32.xlu0 %v903_v49, %s5439_s13 }
 0xfb2   :  { %v907_v55 = vpop.permute.xlu1 %906 }
 0xfb3   :  { %v909_v56 = vpop.permute.xlu0 %908  ;;  %v912_v57 = vadd.f32 %v907_v55, %v892_v53 }
 0xfb4   :  { %v913_v58 = vadd.f32 %v909_v56, %v893_v54 }
 0xfb5   :  { %4875 = vtanh.f32 %v912_v57  ;;  %v1015_v47 = vrot.slane %v912_v57, 7 }
 0xfb6   :  { %4877 = vtanh.f32 %v913_v58  ;;  %v1016_v49 = vrot.slane %v913_v58, 7 }
 0xfc2   :  { %v4876_v59 = vpop.eup %4875 }
 0xfc3   :  { %v4878_v60 = vpop.eup %4877  ;;  %918 = vrot.lane.b32.xlu1 %v4876_v59, %s5440_s16 }
 0xfc4   :  { %920 = vrot.lane.b32.xlu0 %v4878_v60, %s5440_s16 }
0x1035   :  { %v919_v63 = vpop.permute.xlu1 %918 }
0x1036   :  { %v921_v1 = vpop.permute.xlu0 %920  ;;  %v5686_v3 = vmul.f32 %v4872_v42, %v919_v63 }
0x1037   :  { %v5688_v61 = vmul.f32 %v4874_v45, %v921_v1 }
0x1038   :  { %v937_v62 = vpack.c.bf16 %v5686_v3, %v5686_v3 }
0x1039   :  { %v938_v4 = vpack.c.bf16 %v5688_v61, %v5688_v61 }
0x103a   :  { %v941_v6 = vunpack.c.l.b16 %v937_v62 }
0x103b   :  { %v942_v8 = vunpack.c.l.b16 %v938_v4 }
0x103c   :  { %v943_v10 = vrot.slane %v941_v6, 5 }
0x103d   :  { %v944_v11 = vrot.slane %v942_v8, 4 }
0x103f   :  { %v945_v14 = vsel %vm311_vm2, %v944_v11, %v943_v10 }
0x1040   :  { %v946_v15 = vpack.c.b16 %v945_v14, %v945_v14 }
0x1042   :  { %947 = vrot.lane.b32.xlu1 %v946_v15, %s5441_s17 }
0x10b4   :  { %v948_v16 = vpop.permute.xlu1 %947 }
0x10b5   :  { %4595 = vmatmul.mubr.msk.bf16.vlgmr.msra.gmra.mxu0 %vm195_vm3, %v948_v16 }
0x10b6   :  { %4605 = vmatpush3.bf16.msra.mxu0 %v5526_v2  ;;  %4606 = vmatprep.mubr.msk.bf16.mxu0 %vm5436_vm0, %v5435_v0 }
0x10b7   :  { %4616 = vmatprep.subr.bf16.mxu0 %v5435_v0 }
0x1175   :  { %v986_v18 = vpop.f32.mrf.mxu0 }
0x1176   :  { %v993_v19 = vrot.slane %v986_v18, 2  ;;  %v994_v21 = vrot.slane %v986_v18, 3 }
0x1177   :  { %v4596_v25 = vpop.f32.mrf.mxu0 }
0x1178   :  { %v997_v26 = vadd.f32 %v993_v19, %v5545_v20  ;;  %v998_v27 = vadd.f32 %v994_v21, %v5543_v17 }
0x1179   :  { %v989_v28 = vpop.f32.mrf.mxu0 }
0x117a   :  { %4879 = vtanh.f32 %v997_v26  ;;  %v4389_v32 = vmul.f32 -1.442695, %v997_v26  ;;  %v4390_v34 = vmul.f32 -1.442695, %v998_v27 }
0x117b   :  { %4881 = vtanh.f32 %v998_v27  ;;  %v4597_v29 = vpop.f32.mrf.mxu0 }
0x117c   :  { %4883 = vpow2.f32 %v4389_v32 }
0x117d   :  { %4885 = vpow2.f32 %v4390_v34 }
0x1187   :  { %v4880_v30 = vpop.eup %4879 }
0x1188   :  { %v4882_v31 = vpop.eup %4881  ;;  %1023 = vrot.lane.b32.xlu0 %v4880_v30, %s5438_s12 }
0x1189   :  { %1025 = vrot.lane.b32.xlu1 %v4882_v31, %s5438_s12  ;;  %v4884_v36 = vpop.eup %4883 }
0x118a   :  { %v4886_v37 = vpop.eup %4885  ;;  %v1005_v38 = vadd.f32 1.0, %v4884_v36 }
0x118b   :  { %v1006_v39 = vadd.f32 1.0, %v4886_v37 }
0x118c   :  { %4887 = vrcp.f32 %v1005_v38 }
0x118d   :  { %4889 = vrcp.f32 %v1006_v39 }
0x1199   :  { %v4888_v40 = vpop.eup %4887 }
0x119a   :  { %v4890_v42 = vpop.eup %4889  ;;  %v1019_v50 = vmul.f32 %v4888_v40, %v1015_v47 }
0x119b   :  { %v1020_v51 = vmul.f32 %v4890_v42, %v1016_v49 }
0x11fa   :  { %v1024_v41 = vpop.permute.xlu0 %1023 }
0x11fb   :  { %v1026_v43 = vpop.permute.xlu1 %1025  ;;  %v1029_v45 = vmul.f32 %v4888_v40, %v1024_v41 }
0x11fc   :  { %v1030_v46 = vmul.f32 %v4890_v42, %v1026_v43 }
0x11fd   :  { %1033 = vrot.lane.b32.xlu0 %v1029_v45, %s5439_s13 }
0x11fe   :  { %1035 = vrot.lane.b32.xlu1 %v1030_v46, %s5439_s13 }
0x126f   :  { %v1034_v53 = vpop.permute.xlu0 %1033 }
0x1270   :  { %v1036_v54 = vpop.permute.xlu1 %1035  ;;  %v1039_v55 = vadd.f32 %v1034_v53, %v1019_v50 }
0x1271   :  { %v1040_v56 = vadd.f32 %v1036_v54, %v1020_v51 }
0x1272   :  { %4891 = vtanh.f32 %v1039_v55  ;;  %v1142_v43 = vrot.slane %v1039_v55, 7 }
0x1273   :  { %4893 = vtanh.f32 %v1040_v56  ;;  %v1143_v45 = vrot.slane %v1040_v56, 7 }
0x127f   :  { %v4892_v59 = vpop.eup %4891 }
0x1280   :  { %v4894_v60 = vpop.eup %4893  ;;  %1045 = vrot.lane.b32.xlu0 %v4892_v59, %s5440_s16 }
0x1281   :  { %1047 = vrot.lane.b32.xlu1 %v4894_v60, %s5440_s16 }
0x12f2   :  { %v1046_v63 = vpop.permute.xlu0 %1045 }
0x12f3   :  { %v1048_v1 = vpop.permute.xlu1 %1047  ;;  %v5709_v62 = vmul.f32 %v4888_v40, %v1046_v63 }
0x12f4   :  { %v5711_v57 = vmul.f32 %v4890_v42, %v1048_v1 }
0x12f5   :  { %v1064_v58 = vpack.c.bf16 %v5709_v62, %v5709_v62 }
0x12f6   :  { %v1065_v4 = vpack.c.bf16 %v5711_v57, %v5711_v57 }
0x12f7   :  { %v1068_v6 = vunpack.c.l.b16 %v1064_v58 }
0x12f8   :  { %v1069_v8 = vunpack.c.l.b16 %v1065_v4 }
0x12f9   :  { %v1070_v10 = vrot.slane %v1068_v6, 6 }
0x12fa   :  { %v1071_v11 = vrot.slane %v1069_v8, 5 }
0x12fc   :  { %v1072_v14 = vsel %vm311_vm2, %v1071_v11, %v1070_v10 }
0x12fd   :  { %v1073_v15 = vpack.c.b16 %v1072_v14, %v1072_v14 }
0x12ff   :  { %1074 = vrot.lane.b32.xlu0 %v1073_v15, %s5441_s17 }
0x1371   :  { %v1075_v16 = vpop.permute.xlu0 %1074 }
0x1372   :  { %4601 = vmatmul.mubr.msk.bf16.vlgmr.msra.gmra.mxu1 %vm195_vm3, %v1075_v16  ;;  %v5746_v16 = vld [vmem:[#allocation8] sm:$0xff]  }
0x1373   :  { %4611 = vmatpush3.bf16.msra.mxu1 %v5526_v2  ;;  %4612 = vmatprep.mubr.msk.bf16.mxu1 %vm5436_vm0, %v5435_v0 }
0x1374   :  { %4622 = vmatprep.subr.bf16.mxu1 %v5435_v0 }
0x1432   :  { %v1113_v18 = vpop.f32.mrf.mxu1 }
0x1433   :  { %v1120_v19 = vrot.slane %v1113_v18, 1  ;;  %v1121_v21 = vrot.slane %v1113_v18, 2  ;;  %v5296_v18 = vld [vmem:[%s6544_s3] ss:$0 sm:$0xff] }
0x1434   :  { %v4602_v25 = vpop.f32.mrf.mxu1 }
0x1435   :  { %v1124_v26 = vadd.f32 %v1120_v19, %v5545_v20  ;;  %v1125_v27 = vadd.f32 %v1121_v21, %v5543_v17  ;;  %v5756_v19 = vadd.f32 %v5296_v18, %v5606_v44 }
0x1436   :  { %v1116_v28 = vpop.f32.mrf.mxu1 }
0x1437   :  { %4895 = vtanh.f32 %v1124_v26  ;;  %v4392_v2 = vmul.f32 -1.442695, %v1124_v26  ;;  %v4393_v32 = vmul.f32 -1.442695, %v1125_v27 }
0x1438   :  { %4897 = vtanh.f32 %v1125_v27  ;;  %v4603_v29 = vpop.f32.mrf.mxu1 }
0x1439   :  { %4899 = vpow2.f32 %v4392_v2 }
0x143a   :  { %4901 = vpow2.f32 %v4393_v32 }
0x1444   :  { %v4896_v30 = vpop.eup %4895 }
0x1445   :  { %v4898_v31 = vpop.eup %4897  ;;  %1150 = vrot.lane.b32.xlu1 %v4896_v30, %s5438_s12 }
0x1446   :  { %1152 = vrot.lane.b32.xlu0 %v4898_v31, %s5438_s12  ;;  %v4900_v34 = vpop.eup %4899 }
0x1447   :  { %v4902_v36 = vpop.eup %4901  ;;  %v1132_v37 = vadd.f32 1.0, %v4900_v34 }
0x1448   :  { %v1133_v20 = vadd.f32 1.0, %v4902_v36 }
0x1449   :  { %4903 = vrcp.f32 %v1132_v37 }
0x144a   :  { %4905 = vrcp.f32 %v1133_v20 }
0x1456   :  { %v4904_v17 = vpop.eup %4903 }
0x1457   :  { %v4906_v39 = vpop.eup %4905  ;;  %v1146_v46 = vmul.f32 %v4904_v17, %v1142_v43 }
0x1458   :  { %v1147_v47 = vmul.f32 %v4906_v39, %v1143_v45 }
0x14b7   :  { %v1151_v38 = vpop.permute.xlu1 %1150 }
0x14b8   :  { %v1153_v40 = vpop.permute.xlu0 %1152  ;;  %v1156_v41 = vmul.f32 %v4904_v17, %v1151_v38 }
0x14b9   :  { %v1157_v42 = vmul.f32 %v4906_v39, %v1153_v40 }
0x14ba   :  { %1160 = vrot.lane.b32.xlu1 %v1156_v41, %s5439_s13 }
0x14bb   :  { %1162 = vrot.lane.b32.xlu0 %v1157_v42, %s5439_s13 }
0x152c   :  { %v1161_v49 = vpop.permute.xlu1 %1160 }
0x152d   :  { %v1163_v50 = vpop.permute.xlu0 %1162  ;;  %v1166_v51 = vadd.f32 %v1161_v49, %v1146_v46 }
0x152e   :  { %v5730_v53 = vadd.f32 %v1163_v50, %v1147_v47 }
0x152f   :  { %4907 = vtanh.f32 %v1166_v51  ;;  %v1268_v43 = vrot.slane %v1166_v51, 7 }
0x1530   :  { %4909 = vtanh.f32 %v5730_v53  ;;  %v1269_v46 = vrot.slane %v5730_v53, 7 }
0x153c   :  { %v4908_v54 = vpop.eup %4907 }
0x153d   :  { %v4910_v59 = vpop.eup %4909  ;;  %1172 = vrot.lane.b32.xlu1 %v4908_v54, %s5440_s16 }
0x153e   :  { %1174 = vrot.lane.b32.xlu0 %v4910_v59, %s5440_s16 }
0x15af   :  { %v1173_v60 = vpop.permute.xlu1 %1172 }
0x15b0   :  { %v1175_v63 = vpop.permute.xlu0 %1174  ;;  %v5735_v55 = vmul.f32 %v4904_v17, %v1173_v60 }
0x15b1   :  { %v5737_v56 = vmul.f32 %v4906_v39, %v1175_v63 }
0x15b2   :  { %v1191_v1 = vpack.c.bf16 %v5735_v55, %v5735_v55 }
0x15b3   :  { %v1192_v58 = vpack.c.bf16 %v5737_v56, %v5737_v56 }
0x15b4   :  { %v1195_v4 = vunpack.c.l.b16 %v1191_v1 }
0x15b5   :  { %v1196_v6 = vunpack.c.l.b16 %v1192_v58 }
0x15b6   :  { %v1197_v8 = vrot.slane %v1195_v4, 7 }
0x15b7   :  { %v1198_v10 = vrot.slane %v1196_v6, 6 }
0x15b9   :  { %v1199_v11 = vsel %vm311_vm2, %v1198_v10, %v1197_v8 }
0x15ba   :  { %v1200_v14 = vpack.c.b16 %v1199_v11, %v1199_v11 }
0x15bc   :  { %1201 = vrot.lane.b32.xlu1 %v1200_v14, %s5441_s17 }
0x162e   :  { %v1202_v15 = vpop.permute.xlu1 %1201 }
0x162f   :  { %4607 = vmatmul.mubr.msk.bf16.vlgmr.msra.gmra.mxu0 %vm195_vm3, %v1202_v15 }
0x1630   :  { %4617 = vmatpush3.bf16.msra.mxu0 %v5746_v16  ;;  %4618 = vmatprep.mubr.msk.bf16.mxu0 %vm5436_vm0, %v5435_v0 }
0x1631   :  { %4628 = vmatprep.subr.bf16.mxu0 %v5435_v0 }
0x16ef   :  { %v1240_v21 = vpop.f32.mrf.mxu0 }
0x16f0   :  { %v1247_v25 = vrot.slane %v1240_v21, 1  ;;  %v1250_v26 = vadd.f32 %v1240_v21, %v5756_v19 }
0x16f1   :  { %v4608_v27 = vpop.f32.mrf.mxu0 }
0x16f2   :  { %v1251_v28 = vadd.f32 %v1247_v25, %v5549_v24  ;;  %4911 = vtanh.f32 %v1250_v26  ;;  %v4395_v32 = vmul.f32 -1.442695, %v1250_v26 }
0x16f3   :  { %v1243_v29 = vpop.f32.mrf.mxu0 }
0x16f4   :  { %4913 = vtanh.f32 %v1251_v28  ;;  %v4396_v44 = vmul.f32 -1.442695, %v1251_v28 }
0x16f5   :  { %v4609_v30 = vpop.f32.mrf.mxu0  ;;  %4915 = vpow2.f32 %v4395_v32 }
0x16f6   :  { %4917 = vpow2.f32 %v4396_v44 }
0x16ff   :  { %v4912_v31 = vpop.eup %4911 }
0x1700   :  { %1276 = vrot.lane.b32.xlu1 %v4912_v31, %s5438_s12 }
0x1701   :  { %v4914_v2 = vpop.eup %4913 }
0x1702   :  { %1278 = vrot.lane.b32.xlu0 %v4914_v2, %s5438_s12  ;;  %v4916_v34 = vpop.eup %4915 }
0x1703   :  { %v4918_v36 = vpop.eup %4917  ;;  %v1258_v37 = vadd.f32 1.0, %v4916_v34 }
0x1704   :  { %v1259_v20 = vadd.f32 1.0, %v4918_v36 }
0x1705   :  { %4919 = vrcp.f32 %v1258_v37 }
0x1706   :  { %4921 = vrcp.f32 %v1259_v20 }
0x1712   :  { %v4920_v17 = vpop.eup %4919 }
0x1713   :  { %v4922_v40 = vpop.eup %4921  ;;  %v1272_v45 = vmul.f32 %v4920_v17, %v1268_v43 }
0x1714   :  { %v1273_v50 = vmul.f32 %v4922_v40, %v1269_v46 }
0x1772   :  { %v1277_v38 = vpop.permute.xlu1 %1276 }
0x1773   :  { %v1282_v39 = vmul.f32 %v4920_v17, %v1277_v38 }
0x1774   :  { %v1279_v41 = vpop.permute.xlu0 %1278 }
0x1775   :  { %1286 = vrot.lane.b32.xlu1 %v1282_v39, %s5439_s13  ;;  %v1283_v42 = vmul.f32 %v4922_v40, %v1279_v41 }
0x1777   :  { %1288 = vrot.lane.b32.xlu0 %v1283_v42, %s5439_s13 }
0x17e7   :  { %v1287_v47 = vpop.permute.xlu1 %1286 }
0x17e8   :  { %v5765_v49 = vadd.f32 %v1287_v47, %v1272_v45 }
0x17e9   :  { %v1289_v54 = vpop.permute.xlu0 %1288 }
0x17ea   :  { %4923 = vtanh.f32 %v5765_v49  ;;  %v1293_v59 = vadd.f32 %v1289_v54, %v1273_v50  ;;  %v1392_v46 = vrot.slane %v5765_v49, 7 }
0x17ec   :  { %4925 = vtanh.f32 %v1293_v59  ;;  %v1393_v43 = vrot.slane %v1293_v59, 7 }
0x17f7   :  { %v4924_v60 = vpop.eup %4923 }
0x17f8   :  { %1298 = vrot.lane.b32.xlu1 %v4924_v60, %s5440_s16 }
0x17f9   :  { %v4926_v63 = vpop.eup %4925 }
0x17fa   :  { %1300 = vrot.lane.b32.xlu0 %v4926_v63, %s5440_s16 }
0x186a   :  { %v1299_v1 = vpop.permute.xlu1 %1298 }
0x186b   :  { %v5770_v51 = vmul.f32 %v4920_v17, %v1299_v1 }
0x186c   :  { %v1301_v58 = vpop.permute.xlu0 %1300 }
0x186d   :  { %v5772_v53 = vmul.f32 %v4922_v40, %v1301_v58  ;;  %v1316_v4 = vpack.c.bf16 %v5770_v51, %v5770_v51 }
0x186f   :  { %v1317_v6 = vpack.c.bf16 %v5772_v53, %v5772_v53  ;;  %v1320_v10 = vunpack.c.l.b16 %v1316_v4 }
0x1871   :  { %v1321_v8 = vunpack.c.l.b16 %v1317_v6 }
0x1873   :  { %v1322_v11 = vrot.slane %v1321_v8, 7 }
0x1875   :  { %v1323_v14 = vsel %vm311_vm2, %v1322_v11, %v1320_v10 }
0x1876   :  { %v1324_v15 = vpack.c.b16 %v1323_v14, %v1323_v14 }
0x1878   :  { %1325 = vrot.lane.b32.xlu0 %v1324_v15, %s5441_s17 }
0x18ea   :  { %v1326_v18 = vpop.permute.xlu0 %1325 }
0x18eb   :  { %4613 = vmatmul.mubr.msk.bf16.vlgmr.msra.gmra.mxu1 %vm195_vm3, %v1326_v18 }
0x18ec   :  { %4623 = vmatpush3.bf16.msra.mxu1 %v5746_v16  ;;  %4624 = vmatprep.mubr.msk.bf16.mxu1 %vm5436_vm0, %v5435_v0 }
0x18ed   :  { %4634 = vmatprep.subr.bf16.mxu1 %v5435_v0 }
0x19ab   :  { %v1364_v21 = vpop.f32.mrf.mxu1 }
0x19ac   :  { %v1371_v25 = vrot.slane %v1364_v21, 7  ;;  %v1375_v26 = vadd.f32 %v1364_v21, %v5549_v24 }
0x19ad   :  { %v4614_v27 = vpop.f32.mrf.mxu1 }
0x19ae   :  { %v1374_v28 = vadd.f32 %v1371_v25, %v5756_v19  ;;  %4927 = vtanh.f32 %v1375_v26  ;;  %v4399_v32 = vmul.f32 -1.442695, %v1375_v26 }
0x19af   :  { %v1367_v29 = vpop.f32.mrf.mxu1 }
0x19b0   :  { %4929 = vtanh.f32 %v1374_v28  ;;  %v4398_v44 = vmul.f32 -1.442695, %v1374_v28 }
0x19b1   :  { %v4615_v30 = vpop.f32.mrf.mxu1  ;;  %4931 = vpow2.f32 %v4399_v32 }
0x19b2   :  { %4933 = vpow2.f32 %v4398_v44 }
0x19bb   :  { %v4928_v31 = vpop.eup %4927 }
0x19bc   :  { %1402 = vrot.lane.b32.xlu0 %v4928_v31, %s5438_s12 }
0x19bd   :  { %v4930_v2 = vpop.eup %4929 }
0x19be   :  { %1400 = vrot.lane.b32.xlu1 %v4930_v2, %s5438_s12  ;;  %v4932_v34 = vpop.eup %4931 }
0x19bf   :  { %v4934_v36 = vpop.eup %4933  ;;  %v1383_v37 = vadd.f32 1.0, %v4932_v34 }
0x19c0   :  { %v1382_v20 = vadd.f32 1.0, %v4934_v36 }
0x19c1   :  { %4935 = vrcp.f32 %v1383_v37 }
0x19c2   :  { %4937 = vrcp.f32 %v1382_v20 }
0x19ce   :  { %v4936_v17 = vpop.eup %4935 }
0x19cf   :  { %v4938_v40 = vpop.eup %4937  ;;  %v1397_v45 = vmul.f32 %v4936_v17, %v1393_v43 }
0x19d0   :  { %v1396_v54 = vmul.f32 %v4938_v40, %v1392_v46 }
0x1a2e   :  { %v1403_v38 = vpop.permute.xlu0 %1402 }
0x1a2f   :  { %v1407_v39 = vmul.f32 %v4936_v17, %v1403_v38 }
0x1a30   :  { %v1401_v41 = vpop.permute.xlu1 %1400 }
0x1a31   :  { %1412 = vrot.lane.b32.xlu0 %v1407_v39, %s5439_s13  ;;  %v1406_v42 = vmul.f32 %v4938_v40, %v1401_v41 }
0x1a33   :  { %1410 = vrot.lane.b32.xlu1 %v1406_v42, %s5439_s13 }
0x1aa3   :  { %v1413_v47 = vpop.permute.xlu0 %1412 }
0x1aa4   :  { %v5792_v50 = vadd.f32 %v1413_v47, %v1397_v45 }
0x1aa5   :  { %v1411_v60 = vpop.permute.xlu1 %1410 }
0x1aa6   :  { %4939 = vtanh.f32 %v5792_v50  ;;  %v1416_v63 = vadd.f32 %v1411_v60, %v1396_v54  ;;  %v1518_v54 = vrot.slane %v5792_v50, 7 }
0x1aa8   :  { %4941 = vtanh.f32 %v1416_v63  ;;  %v1517_v47 = vrot.slane %v1416_v63, 7 }
0x1ab3   :  { %v4940_v1 = vpop.eup %4939 }
0x1ab4   :  { %1424 = vrot.lane.b32.xlu0 %v4940_v1, %s5440_s16 }
0x1ab5   :  { %v4942_v58 = vpop.eup %4941 }
0x1ab6   :  { %1422 = vrot.lane.b32.xlu1 %v4942_v58, %s5440_s16 }
0x1b26   :  { %v1425_v4 = vpop.permute.xlu0 %1424 }
0x1b27   :  { %v5797_v59 = vmul.f32 %v4936_v17, %v1425_v4 }
0x1b28   :  { %v1423_v6 = vpop.permute.xlu1 %1422 }
0x1b29   :  { %v5799_v49 = vmul.f32 %v4938_v40, %v1423_v6  ;;  %v1441_v8 = vpack.c.bf16 %v5797_v59, %v5797_v59 }
0x1b2b   :  { %v1440_v10 = vpack.c.bf16 %v5799_v49, %v5799_v49  ;;  %v1445_v14 = vunpack.c.l.b16 %v1441_v8 }
0x1b2d   :  { %v1444_v11 = vunpack.c.l.b16 %v1440_v10 }
0x1b2f   :  { %v1446_v15 = vrot.slane %v1444_v11, 1 }
0x1b31   :  { %v1447_v18 = vsel %vm311_vm2, %v1445_v14, %v1446_v15 }
0x1b32   :  { %v1448_v21 = vpack.c.b16 %v1447_v18, %v1447_v18 }
0x1b34   :  { %1449 = vrot.lane.b32.xlu1 %v1448_v21, %s5441_s17 }
0x1ba6   :  { %v1450_v25 = vpop.permute.xlu1 %1449 }
0x1ba7   :  { %4619 = vmatmul.mubr.msk.bf16.vlgmr.msra.gmra.mxu0 %vm195_vm3, %v1450_v25 }
0x1ba8   :  { %4629 = vmatpush3.bf16.msra.mxu0 %v5746_v16  ;;  %4630 = vmatprep.mubr.msk.bf16.mxu0 %vm5436_vm0, %v5435_v0 }
0x1ba9   :  { %4640 = vmatprep.subr.bf16.mxu0 %v5435_v0 }
0x1c67   :  { %v1488_v26 = vpop.f32.mrf.mxu0 }
0x1c68   :  { %v1495_v27 = vrot.slane %v1488_v26, 6  ;;  %v1496_v28 = vrot.slane %v1488_v26, 7 }
0x1c69   :  { %v4620_v29 = vpop.f32.mrf.mxu0 }
0x1c6a   :  { %v1499_v30 = vadd.f32 %v1495_v27, %v5756_v19  ;;  %v1500_v31 = vadd.f32 %v1496_v28, %v5549_v24 }
0x1c6b   :  { %v1491_v2 = vpop.f32.mrf.mxu0 }
0x1c6c   :  { %4943 = vtanh.f32 %v1499_v30  ;;  %v4401_v36 = vmul.f32 -1.442695, %v1499_v30  ;;  %v4402_v37 = vmul.f32 -1.442695, %v1500_v31 }
0x1c6d   :  { %4945 = vtanh.f32 %v1500_v31  ;;  %v4621_v32 = vpop.f32.mrf.mxu0 }
0x1c6e   :  { %4947 = vpow2.f32 %v4401_v36 }
0x1c6f   :  { %4949 = vpow2.f32 %v4402_v37 }
0x1c79   :  { %v4944_v44 = vpop.eup %4943 }
0x1c7a   :  { %v4946_v34 = vpop.eup %4945  ;;  %1525 = vrot.lane.b32.xlu0 %v4944_v44, %s5438_s12 }
0x1c7b   :  { %1527 = vrot.lane.b32.xlu1 %v4946_v34, %s5438_s12  ;;  %v4948_v20 = vpop.eup %4947 }
0x1c7c   :  { %v4950_v17 = vpop.eup %4949  ;;  %v1507_v38 = vadd.f32 1.0, %v4948_v20 }
0x1c7d   :  { %v1508_v39 = vadd.f32 1.0, %v4950_v17 }
0x1c7e   :  { %4951 = vrcp.f32 %v1507_v38 }
0x1c7f   :  { %4953 = vrcp.f32 %v1508_v39 }
0x1c8b   :  { %v4952_v40 = vpop.eup %4951 }
0x1c8c   :  { %v4954_v42 = vpop.eup %4953  ;;  %v1521_v60 = vmul.f32 %v4952_v40, %v1517_v47 }
0x1c8d   :  { %v1522_v1 = vmul.f32 %v4954_v42, %v1518_v54 }
0x1cec   :  { %v1526_v41 = vpop.permute.xlu0 %1525 }
0x1ced   :  { %v1528_v43 = vpop.permute.xlu1 %1527  ;;  %v1531_v45 = vmul.f32 %v4952_v40, %v1526_v41 }
0x1cee   :  { %v1532_v46 = vmul.f32 %v4954_v42, %v1528_v43 }
0x1cef   :  { %1535 = vrot.lane.b32.xlu0 %v1531_v45, %s5439_s13 }
0x1cf0   :  { %1537 = vrot.lane.b32.xlu1 %v1532_v46, %s5439_s13 }
0x1d61   :  { %v1536_v58 = vpop.permute.xlu0 %1535 }
0x1d62   :  { %v1538_v4 = vpop.permute.xlu1 %1537  ;;  %v1541_v6 = vadd.f32 %v1536_v58, %v1521_v60 }
0x1d63   :  { %v1542_v8 = vadd.f32 %v1538_v4, %v1522_v1 }
0x1d64   :  { %4955 = vtanh.f32 %v1541_v6 }
0x1d65   :  { %4957 = vtanh.f32 %v1542_v8 }
0x1d71   :  { %v4956_v10 = vpop.eup %4955 }
0x1d72   :  { %v4958_v11 = vpop.eup %4957  ;;  %1547 = vrot.lane.b32.xlu0 %v4956_v10, %s5440_s16  ;;  %v1643_v10 = vrot.slane %v1541_v6, 7 }
0x1d73   :  { %1549 = vrot.lane.b32.xlu1 %v4958_v11, %s5440_s16  ;;  %v1644_v11 = vrot.slane %v1542_v8, 7 }
0x1de4   :  { %v1548_v14 = vpop.permute.xlu0 %1547 }
0x1de5   :  { %v1550_v15 = vpop.permute.xlu1 %1549  ;;  %v5821_v18 = vmul.f32 %v4952_v40, %v1548_v14 }
0x1de6   :  { %v5823_v63 = vmul.f32 %v4954_v42, %v1550_v15 }
0x1de7   :  { %v1565_v50 = vpack.c.bf16 %v5821_v18, %v5821_v18 }
0x1de8   :  { %v1566_v21 = vpack.c.bf16 %v5823_v63, %v5823_v63 }
0x1de9   :  { %v1569_v25 = vunpack.c.l.b16 %v1565_v50 }
0x1dea   :  { %v1570_v26 = vunpack.c.l.b16 %v1566_v21 }
0x1deb   :  { %v1571_v27 = vrot.slane %v1569_v25, 2 }
0x1dec   :  { %v1572_v28 = vrot.slane %v1570_v26, 1 }
0x1dee   :  { %v1573_v29 = vsel %vm311_vm2, %v1572_v28, %v1571_v27 }
0x1def   :  { %v1574_v30 = vpack.c.b16 %v1573_v29, %v1573_v29 }
0x1df1   :  { %1575 = vrot.lane.b32.xlu0 %v1574_v30, %s5441_s17 }
0x1e63   :  { %v1576_v31 = vpop.permute.xlu0 %1575 }
0x1e64   :  { %4625 = vmatmul.mubr.msk.bf16.vlgmr.msra.gmra.mxu1 %vm195_vm3, %v1576_v31 }
0x1e65   :  { %4635 = vmatpush3.bf16.msra.mxu1 %v5746_v16  ;;  %4636 = vmatprep.mubr.msk.bf16.mxu1 %vm5436_vm0, %v5435_v0 }
0x1e66   :  { %4646 = vmatprep.subr.bf16.mxu1 %v5435_v0 }
0x1f24   :  { %v1614_v2 = vpop.f32.mrf.mxu1 }
0x1f25   :  { %v1621_v32 = vrot.slane %v1614_v2, 5  ;;  %v1622_v44 = vrot.slane %v1614_v2, 6 }
0x1f26   :  { %v4626_v34 = vpop.f32.mrf.mxu1 }
0x1f27   :  { %v1625_v36 = vadd.f32 %v1621_v32, %v5756_v19  ;;  %v1626_v37 = vadd.f32 %v1622_v44, %v5549_v24 }
0x1f28   :  { %v1617_v20 = vpop.f32.mrf.mxu1 }
0x1f29   :  { %4959 = vtanh.f32 %v1625_v36  ;;  %v4404_v40 = vmul.f32 -1.442695, %v1625_v36  ;;  %v4405_v41 = vmul.f32 -1.442695, %v1626_v37 }
0x1f2a   :  { %4961 = vtanh.f32 %v1626_v37  ;;  %v4627_v17 = vpop.f32.mrf.mxu1 }
0x1f2b   :  { %4963 = vpow2.f32 %v4404_v40 }
0x1f2c   :  { %4965 = vpow2.f32 %v4405_v41 }
0x1f36   :  { %v4960_v38 = vpop.eup %4959 }
0x1f37   :  { %v4962_v39 = vpop.eup %4961  ;;  %1651 = vrot.lane.b32.xlu1 %v4960_v38, %s5438_s12 }
0x1f38   :  { %1653 = vrot.lane.b32.xlu0 %v4962_v39, %s5438_s12  ;;  %v4964_v42 = vpop.eup %4963 }
0x1f39   :  { %v4966_v43 = vpop.eup %4965  ;;  %v1633_v45 = vadd.f32 1.0, %v4964_v42 }
0x1f3a   :  { %v1634_v46 = vadd.f32 1.0, %v4966_v43 }
0x1f3b   :  { %4967 = vrcp.f32 %v1633_v45 }
0x1f3c   :  { %4969 = vrcp.f32 %v1634_v46 }
0x1f48   :  { %v4968_v47 = vpop.eup %4967 }
0x1f49   :  { %v4970_v60 = vpop.eup %4969  ;;  %v1647_v14 = vmul.f32 %v4968_v47, %v1643_v10 }
0x1f4a   :  { %v1648_v15 = vmul.f32 %v4970_v60, %v1644_v11 }
0x1fa9   :  { %v1652_v54 = vpop.permute.xlu1 %1651 }
0x1faa   :  { %v1654_v1 = vpop.permute.xlu0 %1653  ;;  %v1657_v58 = vmul.f32 %v4968_v47, %v1652_v54 }
0x1fab   :  { %v1658_v4 = vmul.f32 %v4970_v60, %v1654_v1 }
0x1fac   :  { %1661 = vrot.lane.b32.xlu1 %v1657_v58, %s5439_s13 }
0x1fad   :  { %1663 = vrot.lane.b32.xlu0 %v1658_v4, %s5439_s13 }
0x201e   :  { %v1662_v50 = vpop.permute.xlu1 %1661 }
0x201f   :  { %v1664_v21 = vpop.permute.xlu0 %1663  ;;  %v1667_v25 = vadd.f32 %v1662_v50, %v1647_v14 }
0x2020   :  { %v1668_v26 = vadd.f32 %v1664_v21, %v1648_v15 }
0x2021   :  { %4971 = vtanh.f32 %v1667_v25 }
0x2022   :  { %4973 = vtanh.f32 %v1668_v26 }
0x202e   :  { %v4972_v27 = vpop.eup %4971 }
0x202f   :  { %v4974_v28 = vpop.eup %4973  ;;  %1673 = vrot.lane.b32.xlu1 %v4972_v27, %s5440_s16 }
0x2030   :  { %1675 = vrot.lane.b32.xlu0 %v4974_v28, %s5440_s16 }
0x20a1   :  { %v1674_v29 = vpop.permute.xlu1 %1673 }
0x20a2   :  { %v1676_v30 = vpop.permute.xlu0 %1675  ;;  %v5844_v31 = vmul.f32 %v4968_v47, %v1674_v29  ;;  %v1769_v29 = vrot.slane %v1667_v25, 7 }
0x20a3   :  { %v5846_v6 = vmul.f32 %v4970_v60, %v1676_v30  ;;  %v1770_v30 = vrot.slane %v1668_v26, 7 }
0x20a4   :  { %v1691_v8 = vpack.c.bf16 %v5844_v31, %v5844_v31 }
0x20a5   :  { %v1692_v2 = vpack.c.bf16 %v5846_v6, %v5846_v6 }
0x20a6   :  { %v1695_v32 = vunpack.c.l.b16 %v1691_v8 }
0x20a7   :  { %v1696_v44 = vunpack.c.l.b16 %v1692_v2 }
0x20a8   :  { %v1697_v34 = vrot.slane %v1695_v32, 3 }
0x20a9   :  { %v1698_v36 = vrot.slane %v1696_v44, 2 }
0x20ab   :  { %v1699_v37 = vsel %vm311_vm2, %v1698_v36, %v1697_v34 }
0x20ac   :  { %v1700_v20 = vpack.c.b16 %v1699_v37, %v1699_v37 }
0x20ae   :  { %1701 = vrot.lane.b32.xlu1 %v1700_v20, %s5441_s17 }
0x2120   :  { %v1702_v17 = vpop.permute.xlu1 %1701 }
0x2121   :  { %4631 = vmatmul.mubr.msk.bf16.vlgmr.msra.gmra.mxu0 %vm195_vm3, %v1702_v17 }
0x2122   :  { %4641 = vmatpush3.bf16.msra.mxu0 %v5746_v16  ;;  %4642 = vmatprep.mubr.msk.bf16.mxu0 %vm5436_vm0, %v5435_v0 }
0x21e1   :  { %v1740_v38 = vpop.f32.mrf.mxu0 }
0x21e2   :  { %v1747_v39 = vrot.slane %v1740_v38, 4  ;;  %v1748_v40 = vrot.slane %v1740_v38, 5 }
0x21e3   :  { %v4632_v41 = vpop.f32.mrf.mxu0 }
0x21e4   :  { %v1751_v42 = vadd.f32 %v1747_v39, %v5756_v19  ;;  %v1752_v43 = vadd.f32 %v1748_v40, %v5549_v24 }
0x21e5   :  { %v1743_v45 = vpop.f32.mrf.mxu0 }
0x21e6   :  { %4975 = vtanh.f32 %v1751_v42  ;;  %v4407_v60 = vmul.f32 -1.442695, %v1751_v42  ;;  %v4408_v1 = vmul.f32 -1.442695, %v1752_v43 }
0x21e7   :  { %4977 = vtanh.f32 %v1752_v43  ;;  %v4633_v46 = vpop.f32.mrf.mxu0 }
0x21e8   :  { %4979 = vpow2.f32 %v4407_v60 }
0x21e9   :  { %4981 = vpow2.f32 %v4408_v1 }
0x21f3   :  { %v4976_v47 = vpop.eup %4975 }
0x21f4   :  { %v4978_v54 = vpop.eup %4977  ;;  %1777 = vrot.lane.b32.xlu0 %v4976_v47, %s5438_s12 }
0x21f5   :  { %1779 = vrot.lane.b32.xlu1 %v4978_v54, %s5438_s12  ;;  %v4980_v58 = vpop.eup %4979 }
0x21f6   :  { %v4982_v4 = vpop.eup %4981  ;;  %v1759_v10 = vadd.f32 1.0, %v4980_v58 }
0x21f7   :  { %v1760_v11 = vadd.f32 1.0, %v4982_v4 }
0x21f8   :  { %4983 = vrcp.f32 %v1759_v10 }
0x21f9   :  { %4985 = vrcp.f32 %v1760_v11 }
0x2205   :  { %v4984_v14 = vpop.eup %4983 }
0x2206   :  { %v4986_v50 = vpop.eup %4985  ;;  %v1773_v8 = vmul.f32 %v4984_v14, %v1769_v29 }
0x2207   :  { %v1774_v2 = vmul.f32 %v4986_v50, %v1770_v30 }
0x2266   :  { %v1778_v15 = vpop.permute.xlu0 %1777 }
0x2267   :  { %v1780_v21 = vpop.permute.xlu1 %1779  ;;  %v1783_v27 = vmul.f32 %v4984_v14, %v1778_v15 }
0x2268   :  { %v1784_v28 = vmul.f32 %v4986_v50, %v1780_v21 }
0x2269   :  { %1787 = vrot.lane.b32.xlu0 %v1783_v27, %s5439_s13 }
0x226a   :  { %1789 = vrot.lane.b32.xlu1 %v1784_v28, %s5439_s13 }
0x22db   :  { %v1788_v32 = vpop.permute.xlu0 %1787 }
0x22dc   :  { %v1790_v44 = vpop.permute.xlu1 %1789  ;;  %v1793_v34 = vadd.f32 %v1788_v32, %v1773_v8 }
0x22dd   :  { %v1794_v36 = vadd.f32 %v1790_v44, %v1774_v2 }
0x22de   :  { %4987 = vtanh.f32 %v1793_v34 }
0x22df   :  { %4989 = vtanh.f32 %v1794_v36 }
0x22eb   :  { %v4988_v37 = vpop.eup %4987 }
0x22ec   :  { %v4990_v20 = vpop.eup %4989  ;;  %1799 = vrot.lane.b32.xlu0 %v4988_v37, %s5440_s16 }
0x22ed   :  { %1801 = vrot.lane.b32.xlu1 %v4990_v20, %s5440_s16 }
0x235e   :  { %v1800_v17 = vpop.permute.xlu0 %1799 }
0x235f   :  { %v1802_v38 = vpop.permute.xlu1 %1801  ;;  %v5866_v39 = vmul.f32 %v4984_v14, %v1800_v17 }
0x2360   :  { %v5868_v25 = vmul.f32 %v4986_v50, %v1802_v38  ;;  %v1895_v38 = vrot.slane %v1793_v34, 7 }
0x2361   :  { %v1817_v26 = vpack.c.bf16 %v5866_v39, %v5866_v39 }
0x2362   :  { %v1818_v40 = vpack.c.bf16 %v5868_v25, %v5868_v25 }
0x2363   :  { %v1821_v41 = vunpack.c.l.b16 %v1817_v26  ;;  %v1896_v26 = vrot.slane %v1794_v36, 7 }
0x2364   :  { %v1822_v42 = vunpack.c.l.b16 %v1818_v40 }
0x2365   :  { %v1823_v43 = vrot.slane %v1821_v41, 4 }
0x2366   :  { %v1824_v45 = vrot.slane %v1822_v42, 3 }
0x2368   :  { %v1825_v46 = vsel %vm311_vm2, %v1824_v45, %v1823_v43 }
0x2369   :  { %v1826_v47 = vpack.c.b16 %v1825_v46, %v1825_v46 }
0x236b   :  { %1827 = vrot.lane.b32.xlu0 %v1826_v47, %s5441_s17 }
0x23dd   :  { %v1828_v54 = vpop.permute.xlu0 %1827 }
0x23de   :  { %4637 = vmatmul.mubr.msk.bf16.vlgmr.msra.gmra.mxu1 %vm195_vm3, %v1828_v54 }
0x23df   :  { %4647 = vmatpush3.bf16.msra.mxu1 %v5746_v16  ;;  %4648 = vmatprep.mubr.msk.bf16.mxu1 %vm5436_vm0, %v5435_v0 }
0x23e0   :  { %4658 = vmatprep.subr.bf16.mxu1 %v5435_v0 }
0x249e   :  { %v1866_v60 = vpop.f32.mrf.mxu1 }
0x249f   :  { %v1873_v1 = vrot.slane %v1866_v60, 3  ;;  %v1874_v58 = vrot.slane %v1866_v60, 4 }
0x24a0   :  { %v4638_v4 = vpop.f32.mrf.mxu1 }
0x24a1   :  { %v1877_v10 = vadd.f32 %v1873_v1, %v5756_v19  ;;  %v1878_v11 = vadd.f32 %v1874_v58, %v5549_v24 }
0x24a2   :  { %v1869_v14 = vpop.f32.mrf.mxu1 }
0x24a3   :  { %4991 = vtanh.f32 %v1877_v10  ;;  %v4410_v16 = vmul.f32 -1.442695, %v1877_v10  ;;  %v4411_v27 = vmul.f32 -1.442695, %v1878_v11 }
0x24a4   :  { %4993 = vtanh.f32 %v1878_v11  ;;  %v4639_v15 = vpop.f32.mrf.mxu1 }
0x24a5   :  { %4995 = vpow2.f32 %v4410_v16 }
0x24a6   :  { %4997 = vpow2.f32 %v4411_v27 }
0x24b0   :  { %v4992_v50 = vpop.eup %4991 }
0x24b1   :  { %v4994_v21 = vpop.eup %4993  ;;  %1903 = vrot.lane.b32.xlu1 %v4992_v50, %s5438_s12 }
0x24b2   :  { %1905 = vrot.lane.b32.xlu0 %v4994_v21, %s5438_s12  ;;  %v4996_v28 = vpop.eup %4995 }
0x24b3   :  { %v4998_v29 = vpop.eup %4997  ;;  %v1885_v30 = vadd.f32 1.0, %v4996_v28 }
0x24b4   :  { %v1886_v8 = vadd.f32 1.0, %v4998_v29 }
0x24b5   :  { %4999 = vrcp.f32 %v1885_v30 }
0x24b6   :  { %5001 = vrcp.f32 %v1886_v8 }
0x24c2   :  { %v5000_v2 = vpop.eup %4999 }
0x24c3   :  { %v5002_v44 = vpop.eup %5001  ;;  %v1899_v40 = vmul.f32 %v5000_v2, %v1895_v38 }
0x24c4   :  { %v1900_v41 = vmul.f32 %v5002_v44, %v1896_v26 }
0x2523   :  { %v1904_v32 = vpop.permute.xlu1 %1903 }
0x2524   :  { %v1906_v37 = vpop.permute.xlu0 %1905  ;;  %v1909_v20 = vmul.f32 %v5000_v2, %v1904_v32 }
0x2525   :  { %v1910_v17 = vmul.f32 %v5002_v44, %v1906_v37 }
0x2526   :  { %1913 = vrot.lane.b32.xlu1 %v1909_v20, %s5439_s13 }
0x2527   :  { %1915 = vrot.lane.b32.xlu0 %v1910_v17, %s5439_s13 }
0x2598   :  { %v1914_v42 = vpop.permute.xlu1 %1913 }
0x2599   :  { %v1916_v43 = vpop.permute.xlu0 %1915  ;;  %v1919_v45 = vadd.f32 %v1914_v42, %v1899_v40 }
0x259a   :  { %v1920_v46 = vadd.f32 %v1916_v43, %v1900_v41 }
0x259b   :  { %5003 = vtanh.f32 %v1919_v45 }
0x259c   :  { %5005 = vtanh.f32 %v1920_v46 }
0x25a8   :  { %v5004_v47 = vpop.eup %5003 }
0x25a9   :  { %v5006_v54 = vpop.eup %5005  ;;  %1925 = vrot.lane.b32.xlu1 %v5004_v47, %s5440_s16 }
0x25aa   :  { %1927 = vrot.lane.b32.xlu0 %v5006_v54, %s5440_s16 }
0x261b   :  { %v1926_v60 = vpop.permute.xlu1 %1925 }
0x261c   :  { %v1928_v1 = vpop.permute.xlu0 %1927  ;;  %v5889_v58 = vmul.f32 %v5000_v2, %v1926_v60 }
0x261d   :  { %v5891_v34 = vmul.f32 %v5002_v44, %v1928_v1 }
0x261e   :  { %v1943_v36 = vpack.c.bf16 %v5889_v58, %v5889_v58 }
0x261f   :  { %v1944_v4 = vpack.c.bf16 %v5891_v34, %v5891_v34 }
0x2620   :  { %v1947_v10 = vunpack.c.l.b16 %v1943_v36 }
0x2621   :  { %v1948_v11 = vunpack.c.l.b16 %v1944_v4  ;;  %v2021_v4 = vrot.slane %v1919_v45, 7 }
0x2622   :  { %v1949_v14 = vrot.slane %v1947_v10, 5  ;;  %v2022_v10 = vrot.slane %v1920_v46, 7 }
0x2623   :  { %v1950_v15 = vrot.slane %v1948_v11, 4 }
0x2625   :  { %v1951_v50 = vsel %vm311_vm2, %v1950_v15, %v1949_v14 }
0x2626   :  { %v1952_v21 = vpack.c.b16 %v1951_v50, %v1951_v50 }
0x2628   :  { %1953 = vrot.lane.b32.xlu1 %v1952_v21, %s5441_s17 }
0x269a   :  { %v1954_v16 = vpop.permute.xlu1 %1953 }
0x269b   :  { %4643 = vmatmul.mubr.msk.bf16.vlgmr.msra.gmra.mxu0 %vm195_vm3, %v1954_v16 }
0x275b   :  { %v1992_v27 = vpop.f32.mrf.mxu0 }
0x275c   :  { %v1999_v28 = vrot.slane %v1992_v27, 2  ;;  %v2000_v29 = vrot.slane %v1992_v27, 3 }
0x275d   :  { %v4644_v30 = vpop.f32.mrf.mxu0 }
0x275e   :  { %v2003_v8 = vadd.f32 %v1999_v28, %v5756_v19  ;;  %v2004_v2 = vadd.f32 %v2000_v29, %v5549_v24 }
0x275f   :  { %v1995_v32 = vpop.f32.mrf.mxu0 }
0x2760   :  { %5007 = vtanh.f32 %v2003_v8  ;;  %v4413_v17 = vmul.f32 -1.442695, %v2003_v8  ;;  %v4414_v38 = vmul.f32 -1.442695, %v2004_v2 }
0x2761   :  { %5009 = vtanh.f32 %v2004_v2  ;;  %v4645_v44 = vpop.f32.mrf.mxu0 }
0x2762   :  { %5011 = vpow2.f32 %v4413_v17 }
0x2763   :  { %5013 = vpow2.f32 %v4414_v38 }
0x276d   :  { %v5008_v37 = vpop.eup %5007 }
0x276e   :  { %v5010_v20 = vpop.eup %5009  ;;  %2029 = vrot.lane.b32.xlu0 %v5008_v37, %s5438_s12 }
0x276f   :  { %2031 = vrot.lane.b32.xlu1 %v5010_v20, %s5438_s12  ;;  %v5012_v26 = vpop.eup %5011 }
0x2770   :  { %v5014_v40 = vpop.eup %5013  ;;  %v2011_v41 = vadd.f32 1.0, %v5012_v26 }
0x2771   :  { %v2012_v42 = vadd.f32 1.0, %v5014_v40 }
0x2772   :  { %5015 = vrcp.f32 %v2011_v41 }
0x2773   :  { %5017 = vrcp.f32 %v2012_v42 }
0x277f   :  { %v5016_v43 = vpop.eup %5015 }
0x2780   :  { %v5018_v54 = vpop.eup %5017  ;;  %v2025_v11 = vmul.f32 %v5016_v43, %v2021_v4 }
0x2781   :  { %v2026_v14 = vmul.f32 %v5018_v54, %v2022_v10 }
0x27e0   :  { %v2030_v47 = vpop.permute.xlu0 %2029 }
0x27e1   :  { %v2032_v60 = vpop.permute.xlu1 %2031  ;;  %v2035_v1 = vmul.f32 %v5016_v43, %v2030_v47 }
0x27e2   :  { %v2036_v36 = vmul.f32 %v5018_v54, %v2032_v60 }
0x27e3   :  { %2039 = vrot.lane.b32.xlu0 %v2035_v1, %s5439_s13 }
0x27e4   :  { %2041 = vrot.lane.b32.xlu1 %v2036_v36, %s5439_s13 }
0x2855   :  { %v2040_v15 = vpop.permute.xlu0 %2039 }
0x2856   :  { %v2042_v50 = vpop.permute.xlu1 %2041  ;;  %v2045_v21 = vadd.f32 %v2040_v15, %v2025_v11 }
0x2857   :  { %v2046_v16 = vadd.f32 %v2042_v50, %v2026_v14 }
0x2858   :  { %5019 = vtanh.f32 %v2045_v21 }
0x2859   :  { %5021 = vtanh.f32 %v2046_v16 }
0x2865   :  { %v5020_v27 = vpop.eup %5019 }
0x2866   :  { %v5022_v28 = vpop.eup %5021  ;;  %2051 = vrot.lane.b32.xlu0 %v5020_v27, %s5440_s16 }
0x2867   :  { %2053 = vrot.lane.b32.xlu1 %v5022_v28, %s5440_s16 }
0x28d8   :  { %v2052_v29 = vpop.permute.xlu0 %2051 }
0x28d9   :  { %v2054_v30 = vpop.permute.xlu1 %2053  ;;  %v5908_v8 = vmul.f32 %v5016_v43, %v2052_v29 }
0x28da   :  { %v5910_v45 = vmul.f32 %v5018_v54, %v2054_v30 }
0x28db   :  { %v2069_v46 = vpack.c.bf16 %v5908_v8, %v5908_v8 }
0x28dc   :  { %v2070_v2 = vpack.c.bf16 %v5910_v45, %v5910_v45 }
0x28dd   :  { %v2073_v32 = vunpack.c.l.b16 %v2069_v46 }
0x28de   :  { %v2074_v44 = vunpack.c.l.b16 %v2070_v2  ;;  %v2147_v2 = vrot.slane %v2045_v21, 7 }
0x28df   :  { %v2075_v37 = vrot.slane %v2073_v32, 6  ;;  %v2148_v32 = vrot.slane %v2046_v16, 7 }
0x28e0   :  { %v2076_v20 = vrot.slane %v2074_v44, 5 }
0x28e2   :  { %v2077_v17 = vsel %vm311_vm2, %v2076_v20, %v2075_v37 }
0x28e3   :  { %v2078_v38 = vpack.c.b16 %v2077_v17, %v2077_v17 }
0x28e5   :  { %2079 = vrot.lane.b32.xlu0 %v2078_v38, %s5441_s17 }
0x2957   :  { %v2080_v26 = vpop.permute.xlu0 %2079 }
0x2958   :  { %4649 = vmatmul.mubr.msk.bf16.vlgmr.msra.gmra.mxu1 %vm195_vm3, %v2080_v26 }
0x2959   :  { %4660 = vmatprep.mubr.msk.bf16.mxu1 %vm5436_vm0, %v5435_v0 }
0x2a18   :  { %v2118_v40 = vpop.f32.mrf.mxu1 }
0x2a19   :  { %v2125_v41 = vrot.slane %v2118_v40, 1  ;;  %v2126_v42 = vrot.slane %v2118_v40, 2 }
0x2a1a   :  { %v4650_v43 = vpop.f32.mrf.mxu1 }
0x2a1b   :  { %v2129_v47 = vadd.f32 %v2125_v41, %v5756_v19  ;;  %v2130_v54 = vadd.f32 %v2126_v42, %v5549_v24 }
0x2a1c   :  { %v2121_v60 = vpop.f32.mrf.mxu1 }
0x2a1d   :  { %5023 = vtanh.f32 %v2129_v47  ;;  %v4416_v10 = vmul.f32 -1.442695, %v2129_v47  ;;  %v4417_v11 = vmul.f32 -1.442695, %v2130_v54 }
0x2a1e   :  { %5025 = vtanh.f32 %v2130_v54  ;;  %v4651_v1 = vpop.f32.mrf.mxu1 }
0x2a1f   :  { %5027 = vpow2.f32 %v4416_v10 }
0x2a20   :  { %5029 = vpow2.f32 %v4417_v11 }
0x2a2a   :  { %v5024_v36 = vpop.eup %5023 }
0x2a2b   :  { %v5026_v4 = vpop.eup %5025  ;;  %2155 = vrot.lane.b32.xlu1 %v5024_v36, %s5438_s12 }
0x2a2c   :  { %2157 = vrot.lane.b32.xlu0 %v5026_v4, %s5438_s12  ;;  %v5028_v14 = vpop.eup %5027 }
0x2a2d   :  { %v5030_v15 = vpop.eup %5029  ;;  %v2137_v50 = vadd.f32 1.0, %v5028_v14 }
0x2a2e   :  { %v2138_v19 = vadd.f32 1.0, %v5030_v15 }
0x2a2f   :  { %5031 = vrcp.f32 %v2137_v50 }
0x2a30   :  { %5033 = vrcp.f32 %v2138_v19 }
0x2a3c   :  { %v5925_v24 = vpop.eup %5031 }
0x2a3d   :  { %v5927_v28 = vpop.eup %5033  ;;  %v2151_v44 = vmul.f32 %v5925_v24, %v2147_v2 }
0x2a3e   :  { %v2152_v37 = vmul.f32 %v5927_v28, %v2148_v32 }
0x2a9d   :  { %v2156_v27 = vpop.permute.xlu1 %2155 }
0x2a9e   :  { %v2158_v29 = vpop.permute.xlu0 %2157  ;;  %v2161_v30 = vmul.f32 %v5925_v24, %v2156_v27  ;;  %v6055_v27 = vld [vmem:[%s6547_s6] ss:$0 sm:$0xff] }
0x2a9f   :  { %v2162_v46 = vmul.f32 %v5927_v28, %v2158_v29 }
0x2aa0   :  { %2165 = vrot.lane.b32.xlu1 %v2161_v30, %s5439_s13 }
0x2aa1   :  { %2167 = vrot.lane.b32.xlu0 %v2162_v46, %s5439_s13 }
0x2aa5   :  { %421 = vrot.lane.b32.xlu0 %v5593_v35, %s5441_s17 }
0x2b12   :  { %v2166_v20 = vpop.permute.xlu1 %2165 }
0x2b13   :  { %v2168_v17 = vpop.permute.xlu0 %2167  ;;  %v2171_v38 = vadd.f32 %v2166_v20, %v2151_v44 }
0x2b14   :  { %v2172_v26 = vadd.f32 %v2168_v17, %v2152_v37 }
0x2b15   :  { %5035 = vtanh.f32 %v2171_v38 }
0x2b16   :  { %5037 = vtanh.f32 %v2172_v26 }
0x2b17   :  { %v422_v40 = vpop.permute.xlu0 %421 }
0x2b18   :  { %428 = vst.msk [vmem:[#allocation2] sm:$0x2] %vm427_vm4, %v422_v40 }
0x2b22   :  { %v5036_v41 = vpop.eup %5035 }
0x2b23   :  { %v5038_v42 = vpop.eup %5037  ;;  %2177 = vrot.lane.b32.xlu1 %v5036_v41, %s5440_s16 }
0x2b24   :  { %2179 = vrot.lane.b32.xlu0 %v5038_v42, %s5440_s16 }
0x2b27   :  { %295 = vrot.lane.b32.xlu1 %v5567_v52, %s5441_s17  ;;  %v6001_v52 = vld [vmem:[%s6546_s5] sm:$0xff]  }
0x2b28   :  { %674 = vrot.lane.b32.xlu0 %v5640_v12, %s5441_s17  ;;  %4659 = vmatpush3.bf16.msra.mxu1 %v6001_v52 }
0x2b29   :  { %4670 = vmatprep.subr.bf16.mxu1 %v5435_v0 }
0x2b2b   :  { %547 = vrot.lane.b32.xlu1 %v5617_v22, %s5441_s17  ;;  %4661 = vmatmul.mubr.bf16.vlgmr.msra.gmra.mxu1 %v5437_v9 }
0x2b2c   :  { %928 = vrot.lane.b32.xlu0 %v5686_v3, %s5441_s17  ;;  %4671 = vmatpush3.bf16.msra.mxu1 %v6001_v52 }
0x2b2d   :  { %4672 = vmatprep.mubr.msk.bf16.mxu1 %vm5436_vm0, %v5435_v0  ;;  %4682 = vmatprep.subr.bf16.mxu1 %v5435_v0 }
0x2b2f   :  { %801 = vrot.lane.b32.xlu1 %v5663_v7, %s5441_s17 }
0x2b30   :  { %1182 = vrot.lane.b32.xlu0 %v5735_v55, %s5441_s17 }
0x2b33   :  { %1055 = vrot.lane.b32.xlu1 %v5709_v62, %s5441_s17 }
0x2b34   :  { %1432 = vrot.lane.b32.xlu0 %v5799_v49, %s5441_s17 }
0x2b37   :  { %1308 = vrot.lane.b32.xlu1 %v5770_v51, %s5441_s17 }
0x2b38   :  { %1683 = vrot.lane.b32.xlu0 %v5844_v31, %s5441_s17 }
0x2b3b   :  { %1557 = vrot.lane.b32.xlu1 %v5821_v18, %s5441_s17 }
0x2b3c   :  { %1935 = vrot.lane.b32.xlu0 %v5889_v58, %s5441_s17 }
0x2b3f   :  { %1809 = vrot.lane.b32.xlu1 %v5866_v39, %s5441_s17 }
0x2b40   :  { %423 = vrot.lane.b32.xlu0 %v5591_v33, %s5441_s17 }
0x2b43   :  { %2061 = vrot.lane.b32.xlu1 %v5908_v8, %s5441_s17 }
0x2b44   :  { %676 = vrot.lane.b32.xlu0 %v5642_v13, %s5441_s17 }
0x2b47   :  { %297 = vrot.lane.b32.xlu1 %v5563_v48, %s5441_s17  ;;  %v4780_v48 = vld [vmem:[#allocation9] sm:$0xff]  }
0x2b48   :  { %930 = vrot.lane.b32.xlu0 %v5688_v61, %s5441_s17  ;;  %4652 = vmatprep.subr.bf16.mxu0 %v4780_v48 }
0x2b49   :  { %4653 = vmatpush3.bf16.msra.mxu0 %v4780_v48 }
0x2b4a   :  { %4664 = vmatprep.subr.bf16.mxu0 %v5435_v0 }
0x2b4b   :  { %549 = vrot.lane.b32.xlu1 %v5619_v23, %s5441_s17 }
0x2b4c   :  { %1184 = vrot.lane.b32.xlu0 %v5737_v56, %s5441_s17 }
0x2b4f   :  { %803 = vrot.lane.b32.xlu1 %v5665_v5, %s5441_s17 }
0x2b50   :  { %1434 = vrot.lane.b32.xlu0 %v5797_v59, %s5441_s17 }
0x2b53   :  { %1057 = vrot.lane.b32.xlu1 %v5711_v57, %s5441_s17 }
0x2b54   :  { %1685 = vrot.lane.b32.xlu0 %v5846_v6, %s5441_s17 }
0x2b57   :  { %1310 = vrot.lane.b32.xlu1 %v5772_v53, %s5441_s17 }
0x2b58   :  { %1937 = vrot.lane.b32.xlu0 %v5891_v34, %s5441_s17 }
0x2b5b   :  { %1559 = vrot.lane.b32.xlu1 %v5823_v63, %s5441_s17 }
0x2b5f   :  { %1811 = vrot.lane.b32.xlu1 %v5868_v25, %s5441_s17 }
0x2b63   :  { %2063 = vrot.lane.b32.xlu1 %v5910_v45, %s5441_s17 }
0x2b95   :  { %v2178_v33 = vpop.permute.xlu1 %2177 }
0x2b96   :  { %v2180_v35 = vpop.permute.xlu0 %2179  ;;  %v2183_v22 = vmul.f32 %v5925_v24, %v2178_v33 }
0x2b97   :  { %v2184_v12 = vmul.f32 %v5927_v28, %v2180_v35 }
0x2b98   :  { %2187 = vrot.lane.b32.xlu0 %v2183_v22, %s5441_s17 }
0x2b99   :  { %v296_v23 = vpop.permute.xlu1 %295 }
0x2b9a   :  { %v675_v13 = vpop.permute.xlu0 %674  ;;  %302 = vst.msk [vmem:[#allocation2] sm:$0x1] %vm301_vm5, %v296_v23 }
0x2b9b   :  { %681 = vst.msk [vmem:[#allocation2] sm:$0x8] %vm680_vm6, %v675_v13 }
0x2b9c   :  { %2189 = vrot.lane.b32.xlu0 %v2184_v12, %s5441_s17 }
0x2b9d   :  { %v548_v9 = vpop.permute.xlu1 %547 }
0x2b9e   :  { %v929_v7 = vpop.permute.xlu0 %928  ;;  %554 = vst.msk [vmem:[#allocation2] sm:$0x4] %vm553_vm7, %v548_v9 }
0x2b9f   :  { %935 = vst.msk [vmem:[#allocation2] sm:$0x20] %vm934_vm8, %v929_v7 }
0x2ba1   :  { %v802_v5 = vpop.permute.xlu1 %801 }
0x2ba2   :  { %v1183_v3 = vpop.permute.xlu0 %1182  ;;  %808 = vst.msk [vmem:[#allocation2] sm:$0x10] %vm807_vm9, %v802_v5 }
0x2ba3   :  { %1189 = vst.msk [vmem:[#allocation2] sm:$0x80] %vm1188_vm10, %v1183_v3 }
0x2ba5   :  { %v1056_v61 = vpop.permute.xlu1 %1055 }
0x2ba6   :  { %v1433_v62 = vpop.permute.xlu0 %1432  ;;  %1062 = vst.msk [vmem:[#allocation2] sm:$0x40] %vm1061_vm11, %v1056_v61 }
0x2ba7   :  { %1438 = vst.msk [vmem:[#allocation2 + $0x8] sm:$0x2] %vm427_vm4, %v1433_v62 }
0x2ba9   :  { %v1309_v57 = vpop.permute.xlu1 %1308 }
0x2baa   :  { %v1684_v55 = vpop.permute.xlu0 %1683  ;;  %1314 = vst.msk [vmem:[#allocation2 + $0x8] sm:$0x1] %vm301_vm5, %v1309_v57 }
0x2bab   :  { %1689 = vst.msk [vmem:[#allocation2 + $0x8] sm:$0x8] %vm680_vm6, %v1684_v55 }
0x2bad   :  { %v1558_v56 = vpop.permute.xlu1 %1557  ;;  %v2195_v1 = vld [vmem:[#allocation2] sm:$0xff] }
0x2bae   :  { %v1936_v51 = vpop.permute.xlu0 %1935  ;;  %1563 = vst.msk [vmem:[#allocation2 + $0x8] sm:$0x4] %vm553_vm7, %v1558_v56 }
0x2baf   :  { %1941 = vst.msk [vmem:[#allocation2 + $0x8] sm:$0x20] %vm934_vm8, %v1936_v51 }
0x2bb1   :  { %v1810_v53 = vpop.permute.xlu1 %1809 }
0x2bb2   :  { %v424_v59 = vpop.permute.xlu0 %423  ;;  %1815 = vst.msk [vmem:[#allocation2 + $0x8] sm:$0x10] %vm807_vm9, %v1810_v53 }
0x2bb3   :  { %429 = vst.msk [vmem:[#allocation2 + $0x10] sm:$0x2] %vm427_vm4, %v424_v59 }
0x2bb5   :  { %v2062_v49 = vpop.permute.xlu1 %2061 }
0x2bb6   :  { %v677_v18 = vpop.permute.xlu0 %676  ;;  %2067 = vst.msk [vmem:[#allocation2 + $0x8] sm:$0x40] %vm1061_vm11, %v2062_v49 }
0x2bb7   :  { %682 = vst.msk [vmem:[#allocation2 + $0x10] sm:$0x8] %vm680_vm6, %v677_v18 }
0x2bb9   :  { %v298_v63 = vpop.permute.xlu1 %297 }
0x2bba   :  { %v931_v31 = vpop.permute.xlu0 %930  ;;  %303 = vst.msk [vmem:[#allocation2 + $0x10] sm:$0x1] %vm301_vm5, %v298_v63 }
0x2bbb   :  { %936 = vst.msk [vmem:[#allocation2 + $0x10] sm:$0x20] %vm934_vm8, %v931_v31 }
0x2bbd   :  { %v550_v6 = vpop.permute.xlu1 %549 }
0x2bbe   :  { %v1185_v39 = vpop.permute.xlu0 %1184  ;;  %555 = vst.msk [vmem:[#allocation2 + $0x10] sm:$0x4] %vm553_vm7, %v550_v6 }
0x2bbf   :  { %1190 = vst.msk [vmem:[#allocation2 + $0x10] sm:$0x80] %vm1188_vm10, %v1185_v39 }
0x2bc1   :  { %v804_v25 = vpop.permute.xlu1 %803 }
0x2bc2   :  { %v1435_v58 = vpop.permute.xlu0 %1434  ;;  %809 = vst.msk [vmem:[#allocation2 + $0x10] sm:$0x10] %vm807_vm9, %v804_v25 }
0x2bc3   :  { %1439 = vst.msk [vmem:[#allocation2 + $0x18] sm:$0x2] %vm427_vm4, %v1435_v58 }
0x2bc5   :  { %v1058_v34 = vpop.permute.xlu1 %1057 }
0x2bc6   :  { %v1686_v21 = vpop.permute.xlu0 %1685  ;;  %1063 = vst.msk [vmem:[#allocation2 + $0x10] sm:$0x40] %vm1061_vm11, %v1058_v34 }
0x2bc7   :  { %1690 = vst.msk [vmem:[#allocation2 + $0x18] sm:$0x8] %vm680_vm6, %v1686_v21 }
0x2bc9   :  { %v1311_v16 = vpop.permute.xlu1 %1310 }
0x2bca   :  { %v1938_v8 = vpop.permute.xlu0 %1937  ;;  %1315 = vst.msk [vmem:[#allocation2 + $0x18] sm:$0x1] %vm301_vm5, %v1311_v16 }
0x2bcb   :  { %1942 = vst.msk [vmem:[#allocation2 + $0x18] sm:$0x20] %vm934_vm8, %v1938_v8 }
0x2bcd   :  { %v1560_v45 = vpop.permute.xlu1 %1559  ;;  %v2197_v10 = vld [vmem:[#allocation2 + $0x10] sm:$0xff] }
0x2bce   :  { %1564 = vst.msk [vmem:[#allocation2 + $0x18] sm:$0x4] %vm553_vm7, %v1560_v45 }
0x2bd1   :  { %v1812_v43 = vpop.permute.xlu1 %1811 }
0x2bd2   :  { %1816 = vst.msk [vmem:[#allocation2 + $0x18] sm:$0x10] %vm807_vm9, %v1812_v43 }
0x2bd5   :  { %v2064_v47 = vpop.permute.xlu1 %2063 }
0x2bd6   :  { %2068 = vst.msk [vmem:[#allocation2 + $0x18] sm:$0x40] %vm1061_vm11, %v2064_v47 }
0x2beb   :  { %v2313_v15 = vpop.f32.mrf.mxu1 }
0x2bec   :  { %v2320_v28 = vrot.slane %v2313_v15, 1 }
0x2bed   :  { %v4662_v50 = vpop.f32.mrf.mxu1 }
0x2bef   :  { %v2316_v19 = vpop.f32.mrf.mxu1 }
0x2bf1   :  { %v4663_v24 = vpop.f32.mrf.mxu1 }
0x2c0a   :  { %v2188_v54 = vpop.permute.xlu0 %2187 }
0x2c0b   :  { %2193 = vst.msk [vmem:[#allocation2 + $0x8] sm:$0x80] %vm1188_vm10, %v2188_v54 }
0x2c0e   :  { %v2190_v60 = vpop.permute.xlu0 %2189 }
0x2c0f   :  { %2194 = vst.msk [vmem:[#allocation2 + $0x18] sm:$0x80] %vm1188_vm10, %v2190_v60 }
0x2c12   :  { %v2196_v36 = vld [vmem:[#allocation2 + $0x8] sm:$0xff] }
0x2c13   :  { %v2199_v4 = vpack.c.bf16 %v2196_v36, %v2195_v1 }
0x2c15   :  { %4654 = vmatprep.mubr.msk.bf16.mxu0 %vm195_vm3, %v2199_v4 }
0x2c16   :  { %v2198_v11 = vld [vmem:[#allocation2 + $0x18] sm:$0xff] }
0x2c17   :  { %v2200_v14 = vpack.c.bf16 %v2198_v11, %v2197_v10 }
0x2c19   :  { %4655 = vmatmul.mubr.msk.bf16.vlgmr.msra.gmra.mxu0 %vm195_vm3, %v2200_v14 }
0x2c1a   :  { %4665 = vmatpush3.bf16.msra.mxu0 %v6001_v52  ;;  %4666 = vmatprep.mubr.msk.bf16.mxu0 %vm5436_vm0, %v5435_v0 }
0x2c1b   :  { %4676 = vmatprep.subr.bf16.mxu0 %v5435_v0 }
0x2cd9   :  { %v4656_v29 = vpop.f32.mrf.mxu0 }
0x2cda   :  { %v6058_v30 = vadd.f32 %v4656_v29, %v6055_v27 }
0x2cdb   :  { %v2256_v46 = vpop.f32.mrf.mxu0 }
0x2cdc   :  { %v2324_v2 = vadd.f32 %v2320_v28, %v6058_v30  ;;  %v6062_v32 = vadd.f32 %v6055_v27, %v2256_v46 }
0x2cdd   :  { %v4657_v44 = vpop.f32.mrf.mxu0 }
0x2cde   :  { %5039 = vtanh.f32 %v2324_v2  ;;  %v2323_v37 = vadd.f32 %v2313_v15, %v6062_v32  ;;  %v6066_v20 = vadd.f32 %v4657_v44, %v6055_v27  ;;  %v4424_v26 = vmul.f32 -1.442695, %v2324_v2 }
0x2cdf   :  { %v6089_v21 = vpop.f32.mrf.mxu0 }
0x2ce0   :  { %5041 = vtanh.f32 %v2323_v37  ;;  %v4423_v40 = vmul.f32 -1.442695, %v2323_v37 }
0x2ce1   :  { %5043 = vpow2.f32 %v4424_v26 }
0x2ce2   :  { %5045 = vpow2.f32 %v4423_v40 }
0x2ceb   :  { %v5040_v17 = vpop.eup %5039 }
0x2cec   :  { %2345 = vrot.lane.b32.xlu1 %v5040_v17, %s5438_s12 }
0x2ced   :  { %v5042_v38 = vpop.eup %5041 }
0x2cee   :  { %2343 = vrot.lane.b32.xlu0 %v5042_v38, %s5438_s12  ;;  %v5044_v41 = vpop.eup %5043 }
0x2cef   :  { %v5046_v42 = vpop.eup %5045  ;;  %v2332_v48 = vadd.f32 1.0, %v5044_v41 }
0x2cf0   :  { %v2331_v33 = vadd.f32 1.0, %v5046_v42 }
0x2cf1   :  { %5047 = vrcp.f32 %v2332_v48 }
0x2cf2   :  { %5049 = vrcp.f32 %v2331_v33 }
0x2cfe   :  { %v5048_v35 = vpop.eup %5047 }
0x2cff   :  { %v5050_v12 = vpop.eup %5049  ;;  %v2340_v7 = vmul.f32 0.0, %v5048_v35 }
0x2d00   :  { %v2339_v61 = vmul.f32 0.0, %v5050_v12 }
0x2d5e   :  { %v2346_v22 = vpop.permute.xlu1 %2345 }
0x2d5f   :  { %v2350_v23 = vmul.f32 %v5048_v35, %v2346_v22 }
0x2d60   :  { %v2344_v13 = vpop.permute.xlu0 %2343 }
0x2d61   :  { %2355 = vrot.lane.b32.xlu1 %v2350_v23, %s5439_s13  ;;  %v2349_v9 = vmul.f32 %v5050_v12, %v2344_v13 }
0x2d63   :  { %2353 = vrot.lane.b32.xlu0 %v2349_v9, %s5439_s13 }
0x2dd3   :  { %v2356_v5 = vpop.permute.xlu1 %2355 }
0x2dd4   :  { %v2360_v3 = vadd.f32 %v2356_v5, %v2340_v7 }
0x2dd5   :  { %v2354_v62 = vpop.permute.xlu0 %2353 }
0x2dd6   :  { %5051 = vtanh.f32 %v2360_v3  ;;  %v2359_v57 = vadd.f32 %v2354_v62, %v2339_v61  ;;  %v2460_v44 = vrot.slane %v2360_v3, 7 }
0x2dd8   :  { %5053 = vtanh.f32 %v2359_v57  ;;  %v2459_v17 = vrot.slane %v2359_v57, 7 }
0x2de3   :  { %v5052_v55 = vpop.eup %5051 }
0x2de4   :  { %2367 = vrot.lane.b32.xlu1 %v5052_v55, %s5440_s16 }
0x2de5   :  { %v5054_v56 = vpop.eup %5053 }
0x2de6   :  { %2365 = vrot.lane.b32.xlu0 %v5054_v56, %s5440_s16 }
0x2e56   :  { %v2368_v51 = vpop.permute.xlu1 %2367 }
0x2e57   :  { %v6074_v53 = vmul.f32 %v5048_v35, %v2368_v51 }
0x2e58   :  { %v2366_v49 = vpop.permute.xlu0 %2365 }
0x2e59   :  { %v2384_v59 = vpack.c.bf16 %v6074_v53, %v6074_v53  ;;  %v6078_v18 = vmul.f32 %v5050_v12, %v2366_v49 }
0x2e5b   :  { %v2388_v63 = vunpack.c.l.b16 %v2384_v59  ;;  %v2383_v31 = vpack.c.bf16 %v6078_v18, %v6078_v18 }
0x2e5d   :  { %v2389_v6 = vrot.slane %v2388_v63, 7  ;;  %v2387_v39 = vunpack.c.l.b16 %v2383_v31 }
0x2e5f   :  { %v2390_v25 = vsel %vm311_vm2, %v2389_v6, %v2387_v39 }
0x2e60   :  { %v2391_v58 = vpack.c.b16 %v2390_v25, %v2390_v25 }
0x2e62   :  { %2392 = vrot.lane.b32.xlu1 %v2391_v58, %s5441_s17 }
0x2ed4   :  { %v2393_v34 = vpop.permute.xlu1 %2392 }
0x2ed5   :  { %4667 = vmatmul.mubr.msk.bf16.vlgmr.msra.gmra.mxu0 %vm195_vm3, %v2393_v34 }
0x2ed6   :  { %4677 = vmatpush3.bf16.msra.mxu0 %v6001_v52  ;;  %4678 = vmatprep.mubr.msk.bf16.mxu0 %vm5436_vm0, %v5435_v0 }
0x2ed7   :  { %4688 = vmatprep.subr.bf16.mxu0 %v5435_v0 }
0x2f95   :  { %v2431_v16 = vpop.f32.mrf.mxu0 }
0x2f96   :  { %v2438_v8 = vrot.slane %v2431_v16, 7  ;;  %v2442_v45 = vadd.f32 %v2431_v16, %v6058_v30 }
0x2f97   :  { %v4668_v43 = vpop.f32.mrf.mxu0 }
0x2f98   :  { %v2441_v47 = vadd.f32 %v2438_v8, %v6062_v32  ;;  %5055 = vtanh.f32 %v2442_v45  ;;  %v4427_v4 = vmul.f32 -1.442695, %v2442_v45 }
0x2f99   :  { %v2434_v54 = vpop.f32.mrf.mxu0 }
0x2f9a   :  { %5057 = vtanh.f32 %v2441_v47  ;;  %v4426_v10 = vmul.f32 -1.442695, %v2441_v47 }
0x2f9b   :  { %v4669_v60 = vpop.f32.mrf.mxu0  ;;  %5059 = vpow2.f32 %v4427_v4 }
0x2f9c   :  { %5061 = vpow2.f32 %v4426_v10 }
0x2fa5   :  { %v5056_v1 = vpop.eup %5055 }
0x2fa6   :  { %2469 = vrot.lane.b32.xlu1 %v5056_v1, %s5438_s12 }
0x2fa7   :  { %v5058_v36 = vpop.eup %5057 }
0x2fa8   :  { %2467 = vrot.lane.b32.xlu0 %v5058_v36, %s5438_s12  ;;  %v5060_v11 = vpop.eup %5059 }
0x2fa9   :  { %v5062_v14 = vpop.eup %5061  ;;  %v2450_v15 = vadd.f32 1.0, %v5060_v11 }
0x2faa   :  { %v2449_v50 = vadd.f32 1.0, %v5062_v14 }
0x2fab   :  { %5063 = vrcp.f32 %v2450_v15 }
0x2fac   :  { %5065 = vrcp.f32 %v2449_v50 }
0x2fb8   :  { %v5064_v19 = vpop.eup %5063 }
0x2fb9   :  { %v5066_v29 = vpop.eup %5065  ;;  %v2464_v37 = vmul.f32 %v5064_v19, %v2460_v44 }
0x2fba   :  { %v2463_v40 = vmul.f32 %v5066_v29, %v2459_v17 }
0x3018   :  { %v2470_v24 = vpop.permute.xlu1 %2469 }
0x3019   :  { %v2474_v28 = vmul.f32 %v5064_v19, %v2470_v24 }
0x301a   :  { %v2468_v46 = vpop.permute.xlu0 %2467 }
0x301b   :  { %2479 = vrot.lane.b32.xlu1 %v2474_v28, %s5439_s13  ;;  %v2473_v2 = vmul.f32 %v5066_v29, %v2468_v46 }
0x301d   :  { %2477 = vrot.lane.b32.xlu0 %v2473_v2, %s5439_s13 }
0x308d   :  { %v2480_v38 = vpop.permute.xlu1 %2479 }
0x308e   :  { %v6097_v26 = vadd.f32 %v2480_v38, %v2464_v37 }
0x308f   :  { %v2478_v41 = vpop.permute.xlu0 %2477 }
0x3090   :  { %5067 = vtanh.f32 %v6097_v26  ;;  %v2483_v42 = vadd.f32 %v2478_v41, %v2463_v40  ;;  %v2585_v11 = vrot.slane %v6097_v26, 7 }
0x3092   :  { %5069 = vtanh.f32 %v2483_v42  ;;  %v2584_v10 = vrot.slane %v2483_v42, 7 }
0x309d   :  { %v5068_v48 = vpop.eup %5067 }
0x309e   :  { %2491 = vrot.lane.b32.xlu1 %v5068_v48, %s5440_s16 }
0x309f   :  { %v5070_v33 = vpop.eup %5069 }
0x30a0   :  { %2489 = vrot.lane.b32.xlu0 %v5070_v33, %s5440_s16 }
0x3110   :  { %v2492_v35 = vpop.permute.xlu1 %2491 }
0x3111   :  { %v6102_v22 = vmul.f32 %v5064_v19, %v2492_v35 }
0x3112   :  { %v2490_v23 = vpop.permute.xlu0 %2489 }
0x3113   :  { %v6104_v12 = vmul.f32 %v5066_v29, %v2490_v23  ;;  %v2508_v13 = vpack.c.bf16 %v6102_v22, %v6102_v22 }
0x3115   :  { %v2507_v9 = vpack.c.bf16 %v6104_v12, %v6104_v12  ;;  %v2512_v5 = vunpack.c.l.b16 %v2508_v13 }
0x3117   :  { %v2511_v7 = vunpack.c.l.b16 %v2507_v9 }
0x3119   :  { %v2513_v3 = vrot.slane %v2511_v7, 1 }
0x311b   :  { %v2514_v61 = vsel %vm311_vm2, %v2512_v5, %v2513_v3 }
0x311c   :  { %v2515_v62 = vpack.c.b16 %v2514_v61, %v2514_v61 }
0x311e   :  { %2516 = vrot.lane.b32.xlu0 %v2515_v62, %s5441_s17 }
0x3190   :  { %v2517_v57 = vpop.permute.xlu0 %2516 }
0x3191   :  { %4673 = vmatmul.mubr.msk.bf16.vlgmr.msra.gmra.mxu1 %vm195_vm3, %v2517_v57 }
0x3192   :  { %4683 = vmatpush3.bf16.msra.mxu1 %v6001_v52  ;;  %4684 = vmatprep.mubr.msk.bf16.mxu1 %vm5436_vm0, %v5435_v0 }
0x3193   :  { %4694 = vmatprep.subr.bf16.mxu1 %v5435_v0 }
0x3251   :  { %v2555_v55 = vpop.f32.mrf.mxu1 }
0x3252   :  { %v2562_v56 = vrot.slane %v2555_v55, 6  ;;  %v2563_v51 = vrot.slane %v2555_v55, 7 }
0x3253   :  { %v4674_v59 = vpop.f32.mrf.mxu1 }
0x3254   :  { %v2566_v49 = vadd.f32 %v2562_v56, %v6062_v32  ;;  %v2567_v63 = vadd.f32 %v2563_v51, %v6058_v30 }
0x3255   :  { %v2558_v31 = vpop.f32.mrf.mxu1 }
0x3256   :  { %5071 = vtanh.f32 %v2566_v49  ;;  %v4429_v58 = vmul.f32 -1.442695, %v2566_v49  ;;  %v4430_v34 = vmul.f32 -1.442695, %v2567_v63 }
0x3257   :  { %5073 = vtanh.f32 %v2567_v63  ;;  %v4675_v6 = vpop.f32.mrf.mxu1 }
0x3258   :  { %5075 = vpow2.f32 %v4429_v58 }
0x3259   :  { %5077 = vpow2.f32 %v4430_v34 }
0x3263   :  { %v5072_v39 = vpop.eup %5071 }
0x3264   :  { %v5074_v25 = vpop.eup %5073  ;;  %2592 = vrot.lane.b32.xlu1 %v5072_v39, %s5438_s12 }
0x3265   :  { %2594 = vrot.lane.b32.xlu0 %v5074_v25, %s5438_s12  ;;  %v5076_v16 = vpop.eup %5075 }
0x3266   :  { %v5078_v8 = vpop.eup %5077  ;;  %v2574_v45 = vadd.f32 1.0, %v5076_v16 }
0x3267   :  { %v2575_v43 = vadd.f32 1.0, %v5078_v8 }
0x3268   :  { %5079 = vrcp.f32 %v2574_v45 }
0x3269   :  { %5081 = vrcp.f32 %v2575_v43 }
0x3275   :  { %v5080_v47 = vpop.eup %5079 }
0x3276   :  { %v5082_v60 = vpop.eup %5081  ;;  %v2588_v14 = vmul.f32 %v5080_v47, %v2584_v10 }
0x3277   :  { %v2589_v15 = vmul.f32 %v5082_v60, %v2585_v11 }
0x32d6   :  { %v2593_v54 = vpop.permute.xlu1 %2592 }
0x32d7   :  { %v2595_v1 = vpop.permute.xlu0 %2594  ;;  %v2598_v36 = vmul.f32 %v5080_v47, %v2593_v54 }
0x32d8   :  { %v2599_v4 = vmul.f32 %v5082_v60, %v2595_v1 }
0x32d9   :  { %2602 = vrot.lane.b32.xlu1 %v2598_v36, %s5439_s13 }
0x32da   :  { %2604 = vrot.lane.b32.xlu0 %v2599_v4, %s5439_s13 }
0x334b   :  { %v2603_v50 = vpop.permute.xlu1 %2602 }
0x334c   :  { %v2605_v19 = vpop.permute.xlu0 %2604  ;;  %v2608_v24 = vadd.f32 %v2603_v50, %v2588_v14 }
0x334d   :  { %v2609_v28 = vadd.f32 %v2605_v19, %v2589_v15 }
0x334e   :  { %5083 = vtanh.f32 %v2608_v24  ;;  %v2710_v45 = vrot.slane %v2608_v24, 7 }
0x334f   :  { %5085 = vtanh.f32 %v2609_v28  ;;  %v2711_v43 = vrot.slane %v2609_v28, 7 }
0x335b   :  { %v5084_v29 = vpop.eup %5083 }
0x335c   :  { %v5086_v46 = vpop.eup %5085  ;;  %2614 = vrot.lane.b32.xlu1 %v5084_v29, %s5440_s16 }
0x335d   :  { %2616 = vrot.lane.b32.xlu0 %v5086_v46, %s5440_s16 }
0x33ce   :  { %v2615_v2 = vpop.permute.xlu1 %2614 }
0x33cf   :  { %v2617_v44 = vpop.permute.xlu0 %2616  ;;  %v6126_v37 = vmul.f32 %v5080_v47, %v2615_v2 }
0x33d0   :  { %v6128_v17 = vmul.f32 %v5082_v60, %v2617_v44 }
0x33d1   :  { %v2632_v38 = vpack.c.bf16 %v6126_v37, %v6126_v37 }
0x33d2   :  { %v2633_v26 = vpack.c.bf16 %v6128_v17, %v6128_v17 }
0x33d3   :  { %v2636_v40 = vunpack.c.l.b16 %v2632_v38 }
0x33d4   :  { %v2637_v41 = vunpack.c.l.b16 %v2633_v26 }
0x33d5   :  { %v2638_v42 = vrot.slane %v2636_v40, 2 }
0x33d6   :  { %v2639_v48 = vrot.slane %v2637_v41, 1 }
0x33d8   :  { %v2640_v33 = vsel %vm311_vm2, %v2639_v48, %v2638_v42 }
0x33d9   :  { %v2641_v35 = vpack.c.b16 %v2640_v33, %v2640_v33 }
0x33db   :  { %2642 = vrot.lane.b32.xlu1 %v2641_v35, %s5441_s17 }
0x344d   :  { %v2643_v23 = vpop.permute.xlu1 %2642 }
0x344e   :  { %4679 = vmatmul.mubr.msk.bf16.vlgmr.msra.gmra.mxu0 %vm195_vm3, %v2643_v23 }
0x344f   :  { %4689 = vmatpush3.bf16.msra.mxu0 %v6001_v52  ;;  %4690 = vmatprep.mubr.msk.bf16.mxu0 %vm5436_vm0, %v5435_v0 }
0x3450   :  { %4700 = vmatprep.subr.bf16.mxu0 %v5435_v0 }
0x350e   :  { %v2681_v13 = vpop.f32.mrf.mxu0 }
0x350f   :  { %v2688_v9 = vrot.slane %v2681_v13, 5  ;;  %v2689_v7 = vrot.slane %v2681_v13, 6 }
0x3510   :  { %v4680_v5 = vpop.f32.mrf.mxu0 }
0x3511   :  { %v2692_v3 = vadd.f32 %v2688_v9, %v6062_v32  ;;  %v2693_v61 = vadd.f32 %v2689_v7, %v6058_v30 }
0x3512   :  { %v2684_v62 = vpop.f32.mrf.mxu0 }
0x3513   :  { %5087 = vtanh.f32 %v2692_v3  ;;  %v4432_v51 = vmul.f32 -1.442695, %v2692_v3  ;;  %v4433_v59 = vmul.f32 -1.442695, %v2693_v61 }
0x3514   :  { %5089 = vtanh.f32 %v2693_v61  ;;  %v4681_v57 = vpop.f32.mrf.mxu0 }
0x3515   :  { %5091 = vpow2.f32 %v4432_v51 }
0x3516   :  { %5093 = vpow2.f32 %v4433_v59 }
0x3520   :  { %v5088_v55 = vpop.eup %5087 }
0x3521   :  { %v5090_v56 = vpop.eup %5089  ;;  %2718 = vrot.lane.b32.xlu0 %v5088_v55, %s5438_s12 }
0x3522   :  { %2720 = vrot.lane.b32.xlu1 %v5090_v56, %s5438_s12  ;;  %v5092_v49 = vpop.eup %5091 }
0x3523   :  { %v5094_v63 = vpop.eup %5093  ;;  %v2700_v31 = vadd.f32 1.0, %v5092_v49 }
0x3524   :  { %v2701_v6 = vadd.f32 1.0, %v5094_v63 }
0x3525   :  { %5095 = vrcp.f32 %v2700_v31 }
0x3526   :  { %5097 = vrcp.f32 %v2701_v6 }
0x3532   :  { %v5096_v39 = vpop.eup %5095 }
0x3533   :  { %v5098_v58 = vpop.eup %5097  ;;  %v2714_v47 = vmul.f32 %v5096_v39, %v2710_v45 }
0x3534   :  { %v2715_v54 = vmul.f32 %v5098_v58, %v2711_v43 }
0x3593   :  { %v2719_v25 = vpop.permute.xlu0 %2718 }
0x3594   :  { %v2721_v34 = vpop.permute.xlu1 %2720  ;;  %v2724_v16 = vmul.f32 %v5096_v39, %v2719_v25 }
0x3595   :  { %v2725_v8 = vmul.f32 %v5098_v58, %v2721_v34 }
0x3596   :  { %2728 = vrot.lane.b32.xlu0 %v2724_v16, %s5439_s13 }
0x3597   :  { %2730 = vrot.lane.b32.xlu1 %v2725_v8, %s5439_s13 }
0x3608   :  { %v2729_v60 = vpop.permute.xlu0 %2728 }
0x3609   :  { %v2731_v1 = vpop.permute.xlu1 %2730  ;;  %v2734_v36 = vadd.f32 %v2729_v60, %v2714_v47 }
0x360a   :  { %v2735_v4 = vadd.f32 %v2731_v1, %v2715_v54 }
0x360b   :  { %5099 = vtanh.f32 %v2734_v36 }
0x360c   :  { %5101 = vtanh.f32 %v2735_v4  ;;  %v2837_v25 = vrot.slane %v2735_v4, 7 }
0x3618   :  { %v5100_v10 = vpop.eup %5099 }
0x3619   :  { %v5102_v11 = vpop.eup %5101  ;;  %2740 = vrot.lane.b32.xlu0 %v5100_v10, %s5440_s16 }
0x361a   :  { %2742 = vrot.lane.b32.xlu1 %v5102_v11, %s5440_s16 }
0x368b   :  { %v2741_v14 = vpop.permute.xlu0 %2740 }
0x368c   :  { %v2743_v15 = vpop.permute.xlu1 %2742  ;;  %v6149_v50 = vmul.f32 %v5096_v39, %v2741_v14  ;;  %v2836_v39 = vrot.slane %v2734_v36, 7 }
0x368d   :  { %v6151_v19 = vmul.f32 %v5098_v58, %v2743_v15 }
0x368e   :  { %v2758_v24 = vpack.c.bf16 %v6149_v50, %v6149_v50 }
0x368f   :  { %v2759_v28 = vpack.c.bf16 %v6151_v19, %v6151_v19 }
0x3690   :  { %v2762_v29 = vunpack.c.l.b16 %v2758_v24 }
0x3691   :  { %v2763_v46 = vunpack.c.l.b16 %v2759_v28 }
0x3692   :  { %v2764_v2 = vrot.slane %v2762_v29, 3 }
0x3693   :  { %v2765_v44 = vrot.slane %v2763_v46, 2 }
0x3695   :  { %v2766_v38 = vsel %vm311_vm2, %v2765_v44, %v2764_v2 }
0x3696   :  { %v2767_v26 = vpack.c.b16 %v2766_v38, %v2766_v38 }
0x3698   :  { %2768 = vrot.lane.b32.xlu0 %v2767_v26, %s5441_s17 }
0x370a   :  { %v2769_v40 = vpop.permute.xlu0 %2768 }
0x370b   :  { %4685 = vmatmul.mubr.msk.bf16.vlgmr.msra.gmra.mxu1 %vm195_vm3, %v2769_v40 }
0x370c   :  { %4695 = vmatpush3.bf16.msra.mxu1 %v6001_v52  ;;  %4696 = vmatprep.mubr.msk.bf16.mxu1 %vm5436_vm0, %v5435_v0 }
0x370d   :  { %4706 = vmatprep.subr.bf16.mxu1 %v5435_v0 }
0x37cb   :  { %v2807_v41 = vpop.f32.mrf.mxu1 }
0x37cc   :  { %v2814_v42 = vrot.slane %v2807_v41, 4  ;;  %v2815_v48 = vrot.slane %v2807_v41, 5 }
0x37cd   :  { %v4686_v33 = vpop.f32.mrf.mxu1 }
0x37ce   :  { %v2818_v35 = vadd.f32 %v2814_v42, %v6062_v32  ;;  %v2819_v23 = vadd.f32 %v2815_v48, %v6058_v30 }
0x37cf   :  { %v2810_v13 = vpop.f32.mrf.mxu1 }
0x37d0   :  { %5103 = vtanh.f32 %v2818_v35  ;;  %v4435_v3 = vmul.f32 -1.442695, %v2818_v35  ;;  %v4436_v61 = vmul.f32 -1.442695, %v2819_v23 }
0x37d1   :  { %5105 = vtanh.f32 %v2819_v23  ;;  %v4687_v9 = vpop.f32.mrf.mxu1 }
0x37d2   :  { %5107 = vpow2.f32 %v4435_v3 }
0x37d3   :  { %5109 = vpow2.f32 %v4436_v61 }
0x37dd   :  { %v5104_v7 = vpop.eup %5103 }
0x37de   :  { %v5106_v5 = vpop.eup %5105  ;;  %2844 = vrot.lane.b32.xlu1 %v5104_v7, %s5438_s12 }
0x37df   :  { %2846 = vrot.lane.b32.xlu0 %v5106_v5, %s5438_s12  ;;  %v5108_v62 = vpop.eup %5107 }
0x37e0   :  { %v5110_v57 = vpop.eup %5109  ;;  %v2826_v55 = vadd.f32 1.0, %v5108_v62 }
0x37e1   :  { %v2827_v56 = vadd.f32 1.0, %v5110_v57 }
0x37e2   :  { %5111 = vrcp.f32 %v2826_v55 }
0x37e3   :  { %5113 = vrcp.f32 %v2827_v56 }
0x37ef   :  { %v5112_v51 = vpop.eup %5111 }
0x37f0   :  { %v5114_v49 = vpop.eup %5113  ;;  %v2840_v58 = vmul.f32 %v5112_v51, %v2836_v39 }
0x37f1   :  { %v2841_v34 = vmul.f32 %v5114_v49, %v2837_v25 }
0x3850   :  { %v2845_v59 = vpop.permute.xlu1 %2844 }
0x3851   :  { %v2847_v63 = vpop.permute.xlu0 %2846  ;;  %v2850_v31 = vmul.f32 %v5112_v51, %v2845_v59 }
0x3852   :  { %v2851_v6 = vmul.f32 %v5114_v49, %v2847_v63 }
0x3853   :  { %2854 = vrot.lane.b32.xlu1 %v2850_v31, %s5439_s13 }
0x3854   :  { %2856 = vrot.lane.b32.xlu0 %v2851_v6, %s5439_s13 }
0x38c5   :  { %v2855_v16 = vpop.permute.xlu1 %2854 }
0x38c6   :  { %v2857_v8 = vpop.permute.xlu0 %2856  ;;  %v2860_v45 = vadd.f32 %v2855_v16, %v2840_v58 }
0x38c7   :  { %v2861_v43 = vadd.f32 %v2857_v8, %v2841_v34 }
0x38c8   :  { %5115 = vtanh.f32 %v2860_v45 }
0x38c9   :  { %5117 = vtanh.f32 %v2861_v43  ;;  %v2963_v63 = vrot.slane %v2861_v43, 7 }
0x38d5   :  { %v5116_v47 = vpop.eup %5115 }
0x38d6   :  { %v5118_v54 = vpop.eup %5117  ;;  %2866 = vrot.lane.b32.xlu1 %v5116_v47, %s5440_s16 }
0x38d7   :  { %2868 = vrot.lane.b32.xlu0 %v5118_v54, %s5440_s16 }
0x3948   :  { %v2867_v60 = vpop.permute.xlu1 %2866 }
0x3949   :  { %v2869_v1 = vpop.permute.xlu0 %2868  ;;  %v6172_v10 = vmul.f32 %v5112_v51, %v2867_v60 }
0x394a   :  { %v6174_v36 = vmul.f32 %v5114_v49, %v2869_v1  ;;  %v2962_v49 = vrot.slane %v2860_v45, 7 }
0x394b   :  { %v2884_v4 = vpack.c.bf16 %v6172_v10, %v6172_v10 }
0x394c   :  { %v2885_v11 = vpack.c.bf16 %v6174_v36, %v6174_v36 }
0x394d   :  { %v2888_v14 = vunpack.c.l.b16 %v2884_v4 }
0x394e   :  { %v2889_v15 = vunpack.c.l.b16 %v2885_v11 }
0x394f   :  { %v2890_v24 = vrot.slane %v2888_v14, 4 }
0x3950   :  { %v2891_v28 = vrot.slane %v2889_v15, 3 }
0x3952   :  { %v2892_v29 = vsel %vm311_vm2, %v2891_v28, %v2890_v24 }
0x3953   :  { %v2893_v46 = vpack.c.b16 %v2892_v29, %v2892_v29 }
0x3955   :  { %2894 = vrot.lane.b32.xlu1 %v2893_v46, %s5441_s17 }
0x39c7   :  { %v2895_v2 = vpop.permute.xlu1 %2894 }
0x39c8   :  { %4691 = vmatmul.mubr.msk.bf16.vlgmr.msra.gmra.mxu0 %vm195_vm3, %v2895_v2 }
0x39c9   :  { %4701 = vmatpush3.bf16.msra.mxu0 %v6001_v52  ;;  %4702 = vmatprep.mubr.msk.bf16.mxu0 %vm5436_vm0, %v5435_v0 }
0x39ca   :  { %4712 = vmatprep.subr.bf16.mxu0 %v5435_v0 }
0x3a88   :  { %v2933_v44 = vpop.f32.mrf.mxu0 }
0x3a89   :  { %v2940_v38 = vrot.slane %v2933_v44, 3  ;;  %v2941_v26 = vrot.slane %v2933_v44, 4 }
0x3a8a   :  { %v4692_v40 = vpop.f32.mrf.mxu0 }
0x3a8b   :  { %v2944_v41 = vadd.f32 %v2940_v38, %v6062_v32  ;;  %v2945_v42 = vadd.f32 %v2941_v26, %v6058_v30 }
0x3a8c   :  { %v2936_v48 = vpop.f32.mrf.mxu0 }
0x3a8d   :  { %5119 = vtanh.f32 %v2944_v41  ;;  %v4438_v13 = vmul.f32 -1.442695, %v2944_v41  ;;  %v4439_v9 = vmul.f32 -1.442695, %v2945_v42 }
0x3a8e   :  { %5121 = vtanh.f32 %v2945_v42  ;;  %v4693_v33 = vpop.f32.mrf.mxu0 }
0x3a8f   :  { %5123 = vpow2.f32 %v4438_v13 }
0x3a90   :  { %5125 = vpow2.f32 %v4439_v9 }
0x3a9a   :  { %v5120_v35 = vpop.eup %5119 }
0x3a9b   :  { %v5122_v23 = vpop.eup %5121  ;;  %2970 = vrot.lane.b32.xlu0 %v5120_v35, %s5438_s12 }
0x3a9c   :  { %2972 = vrot.lane.b32.xlu1 %v5122_v23, %s5438_s12  ;;  %v5124_v7 = vpop.eup %5123 }
0x3a9d   :  { %v5126_v5 = vpop.eup %5125  ;;  %v2952_v3 = vadd.f32 1.0, %v5124_v7 }
0x3a9e   :  { %v2953_v61 = vadd.f32 1.0, %v5126_v5 }
0x3a9f   :  { %5127 = vrcp.f32 %v2952_v3 }
0x3aa0   :  { %5129 = vrcp.f32 %v2953_v61 }
0x3aac   :  { %v5128_v62 = vpop.eup %5127 }
0x3aad   :  { %v5130_v55 = vpop.eup %5129  ;;  %v2966_v31 = vmul.f32 %v5128_v62, %v2962_v49 }
0x3aae   :  { %v2967_v6 = vmul.f32 %v5130_v55, %v2963_v63 }
0x3b0d   :  { %v2971_v57 = vpop.permute.xlu0 %2970 }
0x3b0e   :  { %v2973_v56 = vpop.permute.xlu1 %2972  ;;  %v2976_v51 = vmul.f32 %v5128_v62, %v2971_v57 }
0x3b0f   :  { %v2977_v59 = vmul.f32 %v5130_v55, %v2973_v56 }
0x3b10   :  { %2980 = vrot.lane.b32.xlu0 %v2976_v51, %s5439_s13 }
0x3b11   :  { %2982 = vrot.lane.b32.xlu1 %v2977_v59, %s5439_s13 }
0x3b82   :  { %v2981_v39 = vpop.permute.xlu0 %2980 }
0x3b83   :  { %v2983_v25 = vpop.permute.xlu1 %2982  ;;  %v2986_v58 = vadd.f32 %v2981_v39, %v2966_v31 }
0x3b84   :  { %v2987_v34 = vadd.f32 %v2983_v25, %v2967_v6 }
0x3b85   :  { %5131 = vtanh.f32 %v2986_v58  ;;  %v3088_v56 = vrot.slane %v2986_v58, 7 }
0x3b86   :  { %5133 = vtanh.f32 %v2987_v34  ;;  %v3089_v51 = vrot.slane %v2987_v34, 7 }
0x3b92   :  { %v5132_v16 = vpop.eup %5131 }
0x3b93   :  { %v5134_v8 = vpop.eup %5133  ;;  %2992 = vrot.lane.b32.xlu0 %v5132_v16, %s5440_s16 }
0x3b94   :  { %2994 = vrot.lane.b32.xlu1 %v5134_v8, %s5440_s16 }
0x3c05   :  { %v2993_v47 = vpop.permute.xlu0 %2992 }
0x3c06   :  { %v2995_v54 = vpop.permute.xlu1 %2994  ;;  %v6195_v60 = vmul.f32 %v5128_v62, %v2993_v47 }
0x3c07   :  { %v6197_v45 = vmul.f32 %v5130_v55, %v2995_v54 }
0x3c08   :  { %v3010_v43 = vpack.c.bf16 %v6195_v60, %v6195_v60 }
0x3c09   :  { %v3011_v1 = vpack.c.bf16 %v6197_v45, %v6197_v45 }
0x3c0a   :  { %v3014_v4 = vunpack.c.l.b16 %v3010_v43 }
0x3c0b   :  { %v3015_v11 = vunpack.c.l.b16 %v3011_v1 }
0x3c0c   :  { %v3016_v14 = vrot.slane %v3014_v4, 5 }
0x3c0d   :  { %v3017_v15 = vrot.slane %v3015_v11, 4 }
0x3c0f   :  { %v3018_v24 = vsel %vm311_vm2, %v3017_v15, %v3016_v14 }
0x3c10   :  { %v3019_v28 = vpack.c.b16 %v3018_v24, %v3018_v24 }
0x3c12   :  { %3020 = vrot.lane.b32.xlu0 %v3019_v28, %s5441_s17 }
0x3c84   :  { %v3021_v29 = vpop.permute.xlu0 %3020 }
0x3c85   :  { %4697 = vmatmul.mubr.msk.bf16.vlgmr.msra.gmra.mxu1 %vm195_vm3, %v3021_v29  ;;  %v6232_v29 = vld [vmem:[%s6546_s5] sm:$0xff]  }
0x3c86   :  { %4707 = vmatpush3.bf16.msra.mxu1 %v6001_v52  ;;  %4708 = vmatprep.mubr.msk.bf16.mxu1 %vm5436_vm0, %v5435_v0 }
0x3c87   :  { %4718 = vmatprep.subr.bf16.mxu1 %v5435_v0 }
0x3d45   :  { %v3059_v46 = vpop.f32.mrf.mxu1 }
0x3d46   :  { %v3066_v2 = vrot.slane %v3059_v46, 2  ;;  %v3067_v44 = vrot.slane %v3059_v46, 3 }
0x3d47   :  { %v4698_v38 = vpop.f32.mrf.mxu1 }
0x3d48   :  { %v3070_v26 = vadd.f32 %v3066_v2, %v6062_v32  ;;  %v3071_v40 = vadd.f32 %v3067_v44, %v6058_v30 }
0x3d49   :  { %v3062_v41 = vpop.f32.mrf.mxu1 }
0x3d4a   :  { %5135 = vtanh.f32 %v3070_v26  ;;  %v4441_v52 = vmul.f32 -1.442695, %v3070_v26  ;;  %v4442_v35 = vmul.f32 -1.442695, %v3071_v40 }
0x3d4b   :  { %5137 = vtanh.f32 %v3071_v40  ;;  %v4699_v42 = vpop.f32.mrf.mxu1 }
0x3d4c   :  { %5139 = vpow2.f32 %v4441_v52 }
0x3d4d   :  { %5141 = vpow2.f32 %v4442_v35 }
0x3d57   :  { %v5136_v48 = vpop.eup %5135 }
0x3d58   :  { %v5138_v33 = vpop.eup %5137  ;;  %3096 = vrot.lane.b32.xlu1 %v5136_v48, %s5438_s12 }
0x3d59   :  { %3098 = vrot.lane.b32.xlu0 %v5138_v33, %s5438_s12  ;;  %v5140_v23 = vpop.eup %5139 }
0x3d5a   :  { %v5142_v13 = vpop.eup %5141  ;;  %v3078_v9 = vadd.f32 1.0, %v5140_v23 }
0x3d5b   :  { %v3079_v7 = vadd.f32 1.0, %v5142_v13 }
0x3d5c   :  { %5143 = vrcp.f32 %v3078_v9 }
0x3d5d   :  { %5145 = vrcp.f32 %v3079_v7 }
0x3d69   :  { %v5144_v5 = vpop.eup %5143 }
0x3d6a   :  { %v5146_v61 = vpop.eup %5145  ;;  %v3092_v59 = vmul.f32 %v5144_v5, %v3088_v56 }
0x3d6b   :  { %v3093_v49 = vmul.f32 %v5146_v61, %v3089_v51 }
0x3dca   :  { %v3097_v3 = vpop.permute.xlu1 %3096 }
0x3dcb   :  { %v3099_v62 = vpop.permute.xlu0 %3098  ;;  %v3102_v57 = vmul.f32 %v5144_v5, %v3097_v3 }
0x3dcc   :  { %v3103_v55 = vmul.f32 %v5146_v61, %v3099_v62 }
0x3dcd   :  { %3106 = vrot.lane.b32.xlu1 %v3102_v57, %s5439_s13 }
0x3dce   :  { %3108 = vrot.lane.b32.xlu0 %v3103_v55, %s5439_s13 }
0x3e3f   :  { %v3107_v63 = vpop.permute.xlu1 %3106 }
0x3e40   :  { %v3109_v31 = vpop.permute.xlu0 %3108  ;;  %v3112_v6 = vadd.f32 %v3107_v63, %v3092_v59 }
0x3e41   :  { %v3113_v39 = vadd.f32 %v3109_v31, %v3093_v49 }
0x3e42   :  { %5147 = vtanh.f32 %v3112_v6  ;;  %v3214_v57 = vrot.slane %v3112_v6, 7 }
0x3e43   :  { %5149 = vtanh.f32 %v3113_v39  ;;  %v3215_v55 = vrot.slane %v3113_v39, 7 }
0x3e4f   :  { %v5148_v25 = vpop.eup %5147 }
0x3e50   :  { %v5150_v16 = vpop.eup %5149  ;;  %3118 = vrot.lane.b32.xlu1 %v5148_v25, %s5440_s16 }
0x3e51   :  { %3120 = vrot.lane.b32.xlu0 %v5150_v16, %s5440_s16 }
0x3ec2   :  { %v3119_v8 = vpop.permute.xlu1 %3118 }
0x3ec3   :  { %v3121_v47 = vpop.permute.xlu0 %3120  ;;  %v6218_v54 = vmul.f32 %v5144_v5, %v3119_v8 }
0x3ec4   :  { %v6220_v58 = vmul.f32 %v5146_v61, %v3121_v47 }
0x3ec5   :  { %v3136_v34 = vpack.c.bf16 %v6218_v54, %v6218_v54 }
0x3ec6   :  { %v3137_v43 = vpack.c.bf16 %v6220_v58, %v6220_v58 }
0x3ec7   :  { %v3140_v1 = vunpack.c.l.b16 %v3136_v34 }
0x3ec8   :  { %v3141_v4 = vunpack.c.l.b16 %v3137_v43 }
0x3ec9   :  { %v3142_v11 = vrot.slane %v3140_v1, 6 }
0x3eca   :  { %v3143_v14 = vrot.slane %v3141_v4, 5 }
0x3ecc   :  { %v3144_v15 = vsel %vm311_vm2, %v3143_v14, %v3142_v11 }
0x3ecd   :  { %v3145_v24 = vpack.c.b16 %v3144_v15, %v3144_v15 }
0x3ecf   :  { %3146 = vrot.lane.b32.xlu1 %v3145_v24, %s5441_s17 }
0x3f41   :  { %v3147_v28 = vpop.permute.xlu1 %3146 }
0x3f42   :  { %4703 = vmatmul.mubr.msk.bf16.vlgmr.msra.gmra.mxu0 %vm195_vm3, %v3147_v28 }
0x3f43   :  { %4713 = vmatpush3.bf16.msra.mxu0 %v6232_v29  ;;  %4714 = vmatprep.mubr.msk.bf16.mxu0 %vm5436_vm0, %v5435_v0 }
0x3f44   :  { %4724 = vmatprep.subr.bf16.mxu0 %v5435_v0 }
0x4002   :  { %v3185_v46 = vpop.f32.mrf.mxu0 }
0x4003   :  { %v3192_v2 = vrot.slane %v3185_v46, 1  ;;  %v3193_v44 = vrot.slane %v3185_v46, 2  ;;  %v6266_v46 = vadd.f32 %v6055_v27, %v6089_v21 }
0x4004   :  { %v4704_v38 = vpop.f32.mrf.mxu0 }
0x4005   :  { %v3196_v26 = vadd.f32 %v3192_v2, %v6062_v32  ;;  %v3197_v40 = vadd.f32 %v3193_v44, %v6058_v30 }
0x4006   :  { %v3188_v41 = vpop.f32.mrf.mxu0 }
0x4007   :  { %5151 = vtanh.f32 %v3196_v26  ;;  %v4444_v52 = vmul.f32 -1.442695, %v3196_v26  ;;  %v4445_v35 = vmul.f32 -1.442695, %v3197_v40 }
0x4008   :  { %5153 = vtanh.f32 %v3197_v40  ;;  %v4705_v42 = vpop.f32.mrf.mxu0 }
0x4009   :  { %5155 = vpow2.f32 %v4444_v52 }
0x400a   :  { %5157 = vpow2.f32 %v4445_v35 }
0x4014   :  { %v5152_v48 = vpop.eup %5151 }
0x4015   :  { %v5154_v33 = vpop.eup %5153  ;;  %3222 = vrot.lane.b32.xlu0 %v5152_v48, %s5438_s12 }
0x4016   :  { %3224 = vrot.lane.b32.xlu1 %v5154_v33, %s5438_s12  ;;  %v5156_v23 = vpop.eup %5155 }
0x4017   :  { %v5158_v13 = vpop.eup %5157  ;;  %v3204_v9 = vadd.f32 1.0, %v5156_v23 }
0x4018   :  { %v3205_v32 = vadd.f32 1.0, %v5158_v13 }
0x4019   :  { %5159 = vrcp.f32 %v3204_v9 }
0x401a   :  { %5161 = vrcp.f32 %v3205_v32 }
0x4026   :  { %v5160_v30 = vpop.eup %5159 }
0x4027   :  { %v5162_v5 = vpop.eup %5161  ;;  %v3218_v56 = vmul.f32 %v5160_v30, %v3214_v57 }
0x4028   :  { %v3219_v51 = vmul.f32 %v5162_v5, %v3215_v55 }
0x4087   :  { %v3223_v7 = vpop.permute.xlu0 %3222 }
0x4088   :  { %v3225_v3 = vpop.permute.xlu1 %3224  ;;  %v3228_v61 = vmul.f32 %v5160_v30, %v3223_v7 }
0x4089   :  { %v3229_v62 = vmul.f32 %v5162_v5, %v3225_v3 }
0x408a   :  { %3232 = vrot.lane.b32.xlu0 %v3228_v61, %s5439_s13 }
0x408b   :  { %3234 = vrot.lane.b32.xlu1 %v3229_v62, %s5439_s13 }
0x40fc   :  { %v3233_v59 = vpop.permute.xlu0 %3232 }
0x40fd   :  { %v3235_v49 = vpop.permute.xlu1 %3234  ;;  %v3238_v63 = vadd.f32 %v3233_v59, %v3218_v56 }
0x40fe   :  { %v6244_v31 = vadd.f32 %v3235_v49, %v3219_v51 }
0x40ff   :  { %5163 = vtanh.f32 %v3238_v63  ;;  %v3339_v61 = vrot.slane %v3238_v63, 7 }
0x4100   :  { %5165 = vtanh.f32 %v6244_v31  ;;  %v3340_v57 = vrot.slane %v6244_v31, 7 }
0x410c   :  { %v5164_v25 = vpop.eup %5163 }
0x410d   :  { %v5166_v16 = vpop.eup %5165  ;;  %3244 = vrot.lane.b32.xlu0 %v5164_v25, %s5440_s16 }
0x410e   :  { %3246 = vrot.lane.b32.xlu1 %v5166_v16, %s5440_s16 }
0x417f   :  { %v3245_v8 = vpop.permute.xlu0 %3244 }
0x4180   :  { %v3247_v47 = vpop.permute.xlu1 %3246  ;;  %v6249_v6 = vmul.f32 %v5160_v30, %v3245_v8 }
0x4181   :  { %v6251_v39 = vmul.f32 %v5162_v5, %v3247_v47 }
0x4182   :  { %v3262_v34 = vpack.c.bf16 %v6249_v6, %v6249_v6 }
0x4183   :  { %v3263_v43 = vpack.c.bf16 %v6251_v39, %v6251_v39 }
0x4184   :  { %v3266_v1 = vunpack.c.l.b16 %v3262_v34 }
0x4185   :  { %v3267_v4 = vunpack.c.l.b16 %v3263_v43 }
0x4186   :  { %v3268_v11 = vrot.slane %v3266_v1, 7 }
0x4187   :  { %v3269_v14 = vrot.slane %v3267_v4, 6 }
0x4189   :  { %v3270_v15 = vsel %vm311_vm2, %v3269_v14, %v3268_v11 }
0x418a   :  { %v3271_v24 = vpack.c.b16 %v3270_v15, %v3270_v15 }
0x418c   :  { %3272 = vrot.lane.b32.xlu0 %v3271_v24, %s5441_s17 }
0x41fe   :  { %v3273_v28 = vpop.permute.xlu0 %3272 }
0x41ff   :  { %4709 = vmatmul.mubr.msk.bf16.vlgmr.msra.gmra.mxu1 %vm195_vm3, %v3273_v28 }
0x4200   :  { %4719 = vmatpush3.bf16.msra.mxu1 %v6232_v29  ;;  %4720 = vmatprep.mubr.msk.bf16.mxu1 %vm5436_vm0, %v5435_v0 }
0x4201   :  { %4730 = vmatprep.subr.bf16.mxu1 %v5435_v0 }
0x42bf   :  { %v3311_v2 = vpop.f32.mrf.mxu1 }
0x42c0   :  { %v3318_v44 = vrot.slane %v3311_v2, 1  ;;  %v3321_v38 = vadd.f32 %v3311_v2, %v6266_v46 }
0x42c1   :  { %v4710_v26 = vpop.f32.mrf.mxu1 }
0x42c2   :  { %v3322_v40 = vadd.f32 %v3318_v44, %v6066_v20  ;;  %5167 = vtanh.f32 %v3321_v38  ;;  %v4447_v52 = vmul.f32 -1.442695, %v3321_v38 }
0x42c3   :  { %v3314_v41 = vpop.f32.mrf.mxu1 }
0x42c4   :  { %5169 = vtanh.f32 %v3322_v40  ;;  %v4448_v27 = vmul.f32 -1.442695, %v3322_v40 }
0x42c5   :  { %v4711_v42 = vpop.f32.mrf.mxu1  ;;  %5171 = vpow2.f32 %v4447_v52 }
0x42c6   :  { %5173 = vpow2.f32 %v4448_v27 }
0x42cf   :  { %v5168_v48 = vpop.eup %5167 }
0x42d0   :  { %3347 = vrot.lane.b32.xlu0 %v5168_v48, %s5438_s12 }
0x42d1   :  { %v5170_v33 = vpop.eup %5169 }
0x42d2   :  { %3349 = vrot.lane.b32.xlu1 %v5170_v33, %s5438_s12  ;;  %v5172_v21 = vpop.eup %5171 }
0x42d3   :  { %v5174_v35 = vpop.eup %5173  ;;  %v3329_v23 = vadd.f32 1.0, %v5172_v21 }
0x42d4   :  { %v3330_v13 = vadd.f32 1.0, %v5174_v35 }
0x42d5   :  { %5175 = vrcp.f32 %v3329_v23 }
0x42d6   :  { %5177 = vrcp.f32 %v3330_v13 }
0x42e2   :  { %v5176_v9 = vpop.eup %5175 }
0x42e3   :  { %v5178_v7 = vpop.eup %5177  ;;  %v3343_v62 = vmul.f32 %v5176_v9, %v3339_v61 }
0x42e4   :  { %v3344_v51 = vmul.f32 %v5178_v7, %v3340_v57 }
0x4342   :  { %v3348_v32 = vpop.permute.xlu0 %3347 }
0x4343   :  { %v3353_v30 = vmul.f32 %v5176_v9, %v3348_v32 }
0x4344   :  { %v3350_v5 = vpop.permute.xlu1 %3349 }
0x4345   :  { %3357 = vrot.lane.b32.xlu0 %v3353_v30, %s5439_s13  ;;  %v3354_v3 = vmul.f32 %v5178_v7, %v3350_v5 }
0x4347   :  { %3359 = vrot.lane.b32.xlu1 %v3354_v3, %s5439_s13 }
0x43b7   :  { %v3358_v55 = vpop.permute.xlu0 %3357 }
0x43b8   :  { %v6275_v56 = vadd.f32 %v3358_v55, %v3343_v62 }
0x43b9   :  { %v3360_v59 = vpop.permute.xlu1 %3359 }
0x43ba   :  { %5179 = vtanh.f32 %v6275_v56  ;;  %v3364_v49 = vadd.f32 %v3360_v59, %v3344_v51  ;;  %v3463_v62 = vrot.slane %v6275_v56, 7 }
0x43bc   :  { %5181 = vtanh.f32 %v3364_v49  ;;  %v3464_v3 = vrot.slane %v3364_v49, 7 }
0x43c7   :  { %v5180_v25 = vpop.eup %5179 }
0x43c8   :  { %3369 = vrot.lane.b32.xlu0 %v5180_v25, %s5440_s16 }
0x43c9   :  { %v5182_v16 = vpop.eup %5181 }
0x43ca   :  { %3371 = vrot.lane.b32.xlu1 %v5182_v16, %s5440_s16 }
0x443a   :  { %v3370_v8 = vpop.permute.xlu0 %3369 }
0x443b   :  { %v6280_v63 = vmul.f32 %v5176_v9, %v3370_v8 }
0x443c   :  { %v3372_v47 = vpop.permute.xlu1 %3371 }
0x443d   :  { %v6282_v31 = vmul.f32 %v5178_v7, %v3372_v47  ;;  %v3387_v34 = vpack.c.bf16 %v6280_v63, %v6280_v63 }
0x443f   :  { %v3388_v43 = vpack.c.bf16 %v6282_v31, %v6282_v31  ;;  %v3391_v4 = vunpack.c.l.b16 %v3387_v34 }
0x4441   :  { %v3392_v1 = vunpack.c.l.b16 %v3388_v43 }
0x4443   :  { %v3393_v11 = vrot.slane %v3392_v1, 7 }
0x4445   :  { %v3394_v14 = vsel %vm311_vm2, %v3393_v11, %v3391_v4 }
0x4446   :  { %v3395_v15 = vpack.c.b16 %v3394_v14, %v3394_v14 }
0x4448   :  { %3396 = vrot.lane.b32.xlu1 %v3395_v15, %s5441_s17 }
0x44ba   :  { %v3397_v24 = vpop.permute.xlu1 %3396 }
0x44bb   :  { %4715 = vmatmul.mubr.msk.bf16.vlgmr.msra.gmra.mxu0 %vm195_vm3, %v3397_v24 }
0x44bc   :  { %4725 = vmatpush3.bf16.msra.mxu0 %v6232_v29  ;;  %4726 = vmatprep.mubr.msk.bf16.mxu0 %vm5436_vm0, %v5435_v0 }
0x44bd   :  { %4736 = vmatprep.subr.bf16.mxu0 %v5435_v0 }
0x457b   :  { %v3435_v28 = vpop.f32.mrf.mxu0 }
0x457c   :  { %v3442_v2 = vrot.slane %v3435_v28, 7  ;;  %v3446_v44 = vadd.f32 %v3435_v28, %v6066_v20 }
0x457d   :  { %v4716_v38 = vpop.f32.mrf.mxu0 }
0x457e   :  { %v3445_v26 = vadd.f32 %v3442_v2, %v6266_v46  ;;  %5183 = vtanh.f32 %v3446_v44  ;;  %v4451_v33 = vmul.f32 -1.442695, %v3446_v44 }
0x457f   :  { %v3438_v40 = vpop.f32.mrf.mxu0 }
0x4580   :  { %5185 = vtanh.f32 %v3445_v26  ;;  %v4450_v52 = vmul.f32 -1.442695, %v3445_v26 }
0x4581   :  { %v4717_v41 = vpop.f32.mrf.mxu0  ;;  %5187 = vpow2.f32 %v4451_v33 }
0x4582   :  { %5189 = vpow2.f32 %v4450_v52 }
0x458b   :  { %v5184_v42 = vpop.eup %5183 }
0x458c   :  { %3473 = vrot.lane.b32.xlu1 %v5184_v42, %s5438_s12 }
0x458d   :  { %v5186_v48 = vpop.eup %5185 }
0x458e   :  { %3471 = vrot.lane.b32.xlu0 %v5186_v48, %s5438_s12  ;;  %v5188_v27 = vpop.eup %5187 }
0x458f   :  { %v5190_v21 = vpop.eup %5189  ;;  %v3454_v35 = vadd.f32 1.0, %v5188_v27 }
0x4590   :  { %v3453_v23 = vadd.f32 1.0, %v5190_v21 }
0x4591   :  { %5191 = vrcp.f32 %v3454_v35 }
0x4592   :  { %5193 = vrcp.f32 %v3453_v23 }
0x459e   :  { %v5192_v13 = vpop.eup %5191 }
0x459f   :  { %v5194_v30 = vpop.eup %5193  ;;  %v3468_v61 = vmul.f32 %v5192_v13, %v3464_v3 }
0x45a0   :  { %v3467_v51 = vmul.f32 %v5194_v30, %v3463_v62 }
0x45fe   :  { %v3474_v9 = vpop.permute.xlu1 %3473 }
0x45ff   :  { %v3478_v32 = vmul.f32 %v5192_v13, %v3474_v9 }
0x4600   :  { %v3472_v7 = vpop.permute.xlu0 %3471 }
0x4601   :  { %3483 = vrot.lane.b32.xlu1 %v3478_v32, %s5439_s13  ;;  %v3477_v5 = vmul.f32 %v5194_v30, %v3472_v7 }
0x4603   :  { %3481 = vrot.lane.b32.xlu0 %v3477_v5, %s5439_s13 }
0x4673   :  { %v3484_v57 = vpop.permute.xlu1 %3483 }
0x4674   :  { %v6302_v55 = vadd.f32 %v3484_v57, %v3468_v61 }
0x4675   :  { %v3482_v59 = vpop.permute.xlu0 %3481 }
0x4676   :  { %5195 = vtanh.f32 %v6302_v55  ;;  %v3487_v25 = vadd.f32 %v3482_v59, %v3467_v51  ;;  %v3589_v57 = vrot.slane %v6302_v55, 7 }
0x4678   :  { %5197 = vtanh.f32 %v3487_v25  ;;  %v3588_v62 = vrot.slane %v3487_v25, 7 }
0x4683   :  { %v5196_v16 = vpop.eup %5195 }
0x4684   :  { %3495 = vrot.lane.b32.xlu1 %v5196_v16, %s5440_s16 }
0x4685   :  { %v5198_v8 = vpop.eup %5197 }
0x4686   :  { %3493 = vrot.lane.b32.xlu0 %v5198_v8, %s5440_s16 }
0x46f6   :  { %v3496_v47 = vpop.permute.xlu1 %3495 }
0x46f7   :  { %v6307_v49 = vmul.f32 %v5192_v13, %v3496_v47 }
0x46f8   :  { %v3494_v34 = vpop.permute.xlu0 %3493 }
0x46f9   :  { %v6309_v56 = vmul.f32 %v5194_v30, %v3494_v34  ;;  %v3512_v43 = vpack.c.bf16 %v6307_v49, %v6307_v49 }
0x46fb   :  { %v3511_v1 = vpack.c.bf16 %v6309_v56, %v6309_v56  ;;  %v3516_v11 = vunpack.c.l.b16 %v3512_v43 }
0x46fd   :  { %v3515_v4 = vunpack.c.l.b16 %v3511_v1 }
0x46ff   :  { %v3517_v14 = vrot.slane %v3515_v4, 1 }
0x4701   :  { %v3518_v15 = vsel %vm311_vm2, %v3516_v11, %v3517_v14 }
0x4702   :  { %v3519_v24 = vpack.c.b16 %v3518_v15, %v3518_v15 }
0x4704   :  { %3520 = vrot.lane.b32.xlu0 %v3519_v24, %s5441_s17 }
0x4776   :  { %v3521_v28 = vpop.permute.xlu0 %3520 }
0x4777   :  { %4721 = vmatmul.mubr.msk.bf16.vlgmr.msra.gmra.mxu1 %vm195_vm3, %v3521_v28 }
0x4778   :  { %4731 = vmatpush3.bf16.msra.mxu1 %v6232_v29  ;;  %4732 = vmatprep.mubr.msk.bf16.mxu1 %vm5436_vm0, %v5435_v0 }
0x4779   :  { %4742 = vmatprep.subr.bf16.mxu1 %v5435_v0 }
0x4837   :  { %v3559_v2 = vpop.f32.mrf.mxu1 }
0x4838   :  { %v3566_v44 = vrot.slane %v3559_v2, 6  ;;  %v3567_v38 = vrot.slane %v3559_v2, 7 }
0x4839   :  { %v4722_v26 = vpop.f32.mrf.mxu1 }
0x483a   :  { %v3570_v40 = vadd.f32 %v3566_v44, %v6266_v46  ;;  %v3571_v41 = vadd.f32 %v3567_v38, %v6066_v20 }
0x483b   :  { %v3562_v42 = vpop.f32.mrf.mxu1 }
0x483c   :  { %5199 = vtanh.f32 %v3570_v40  ;;  %v4453_v27 = vmul.f32 -1.442695, %v3570_v40  ;;  %v4454_v21 = vmul.f32 -1.442695, %v3571_v41 }
0x483d   :  { %5201 = vtanh.f32 %v3571_v41  ;;  %v4723_v48 = vpop.f32.mrf.mxu1 }
0x483e   :  { %5203 = vpow2.f32 %v4453_v27 }
0x483f   :  { %5205 = vpow2.f32 %v4454_v21 }
0x4849   :  { %v5200_v33 = vpop.eup %5199 }
0x484a   :  { %v5202_v52 = vpop.eup %5201  ;;  %3596 = vrot.lane.b32.xlu1 %v5200_v33, %s5438_s12 }
0x484b   :  { %3598 = vrot.lane.b32.xlu0 %v5202_v52, %s5438_s12  ;;  %v5204_v35 = vpop.eup %5203 }
0x484c   :  { %v5206_v23 = vpop.eup %5205  ;;  %v3578_v13 = vadd.f32 1.0, %v5204_v35 }
0x484d   :  { %v3579_v9 = vadd.f32 1.0, %v5206_v23 }
0x484e   :  { %5207 = vrcp.f32 %v3578_v13 }
0x484f   :  { %5209 = vrcp.f32 %v3579_v9 }
0x485b   :  { %v5208_v32 = vpop.eup %5207 }
0x485c   :  { %v5210_v7 = vpop.eup %5209  ;;  %v3592_v51 = vmul.f32 %v5208_v32, %v3588_v62 }
0x485d   :  { %v3593_v59 = vmul.f32 %v5210_v7, %v3589_v57 }
0x48bc   :  { %v3597_v30 = vpop.permute.xlu1 %3596 }
0x48bd   :  { %v3599_v5 = vpop.permute.xlu0 %3598  ;;  %v3602_v3 = vmul.f32 %v5208_v32, %v3597_v30 }
0x48be   :  { %v3603_v61 = vmul.f32 %v5210_v7, %v3599_v5 }
0x48bf   :  { %3606 = vrot.lane.b32.xlu1 %v3602_v3, %s5439_s13 }
0x48c0   :  { %3608 = vrot.lane.b32.xlu0 %v3603_v61, %s5439_s13 }
0x4931   :  { %v3607_v16 = vpop.permute.xlu1 %3606 }
0x4932   :  { %v3609_v8 = vpop.permute.xlu0 %3608  ;;  %v3612_v47 = vadd.f32 %v3607_v16, %v3592_v51 }
0x4933   :  { %v3613_v34 = vadd.f32 %v3609_v8, %v3593_v59 }
0x4934   :  { %5211 = vtanh.f32 %v3612_v47  ;;  %v3714_v8 = vrot.slane %v3612_v47, 7 }
0x4935   :  { %5213 = vtanh.f32 %v3613_v34 }
0x4941   :  { %v5212_v43 = vpop.eup %5211 }
0x4942   :  { %v5214_v1 = vpop.eup %5213  ;;  %3618 = vrot.lane.b32.xlu1 %v5212_v43, %s5440_s16  ;;  %v3715_v43 = vrot.slane %v3613_v34, 7 }
0x4943   :  { %3620 = vrot.lane.b32.xlu0 %v5214_v1, %s5440_s16 }
0x49b4   :  { %v3619_v4 = vpop.permute.xlu1 %3618 }
0x49b5   :  { %v3621_v11 = vpop.permute.xlu0 %3620  ;;  %v6331_v14 = vmul.f32 %v5208_v32, %v3619_v4 }
0x49b6   :  { %v6333_v25 = vmul.f32 %v5210_v7, %v3621_v11 }
0x49b7   :  { %v3636_v55 = vpack.c.bf16 %v6331_v14, %v6331_v14 }
0x49b8   :  { %v3637_v15 = vpack.c.bf16 %v6333_v25, %v6333_v25 }
0x49b9   :  { %v3640_v24 = vunpack.c.l.b16 %v3636_v55 }
0x49ba   :  { %v3641_v28 = vunpack.c.l.b16 %v3637_v15 }
0x49bb   :  { %v3642_v2 = vrot.slane %v3640_v24, 2 }
0x49bc   :  { %v3643_v44 = vrot.slane %v3641_v28, 1 }
0x49be   :  { %v3644_v38 = vsel %vm311_vm2, %v3643_v44, %v3642_v2 }
0x49bf   :  { %v3645_v26 = vpack.c.b16 %v3644_v38, %v3644_v38 }
0x49c1   :  { %3646 = vrot.lane.b32.xlu1 %v3645_v26, %s5441_s17 }
0x4a33   :  { %v3647_v40 = vpop.permute.xlu1 %3646 }
0x4a34   :  { %4727 = vmatmul.mubr.msk.bf16.vlgmr.msra.gmra.mxu0 %vm195_vm3, %v3647_v40 }
0x4a35   :  { %4737 = vmatpush3.bf16.msra.mxu0 %v6232_v29  ;;  %4738 = vmatprep.mubr.msk.bf16.mxu0 %vm5436_vm0, %v5435_v0 }
0x4a36   :  { %4748 = vmatprep.subr.bf16.mxu0 %v5435_v0 }
0x4af4   :  { %v3685_v41 = vpop.f32.mrf.mxu0 }
0x4af5   :  { %v3692_v42 = vrot.slane %v3685_v41, 5  ;;  %v3693_v48 = vrot.slane %v3685_v41, 6 }
0x4af6   :  { %v4728_v33 = vpop.f32.mrf.mxu0 }
0x4af7   :  { %v3696_v52 = vadd.f32 %v3692_v42, %v6266_v46  ;;  %v3697_v27 = vadd.f32 %v3693_v48, %v6066_v20 }
0x4af8   :  { %v3688_v21 = vpop.f32.mrf.mxu0 }
0x4af9   :  { %5215 = vtanh.f32 %v3696_v52  ;;  %v4456_v9 = vmul.f32 -1.442695, %v3696_v52  ;;  %v4457_v32 = vmul.f32 -1.442695, %v3697_v27 }
0x4afa   :  { %5217 = vtanh.f32 %v3697_v27  ;;  %v4729_v35 = vpop.f32.mrf.mxu0 }
0x4afb   :  { %5219 = vpow2.f32 %v4456_v9 }
0x4afc   :  { %5221 = vpow2.f32 %v4457_v32 }
0x4b06   :  { %v5216_v23 = vpop.eup %5215 }
0x4b07   :  { %v5218_v13 = vpop.eup %5217  ;;  %3722 = vrot.lane.b32.xlu0 %v5216_v23, %s5438_s12 }
0x4b08   :  { %3724 = vrot.lane.b32.xlu1 %v5218_v13, %s5438_s12  ;;  %v5220_v30 = vpop.eup %5219 }
0x4b09   :  { %v5222_v7 = vpop.eup %5221  ;;  %v3704_v5 = vadd.f32 1.0, %v5220_v30 }
0x4b0a   :  { %v3705_v3 = vadd.f32 1.0, %v5222_v7 }
0x4b0b   :  { %5223 = vrcp.f32 %v3704_v5 }
0x4b0c   :  { %5225 = vrcp.f32 %v3705_v3 }
0x4b18   :  { %v5224_v61 = vpop.eup %5223 }
0x4b19   :  { %v5226_v57 = vpop.eup %5225  ;;  %v3718_v1 = vmul.f32 %v5224_v61, %v3714_v8 }
0x4b1a   :  { %v3719_v4 = vmul.f32 %v5226_v57, %v3715_v43 }
0x4b79   :  { %v3723_v62 = vpop.permute.xlu0 %3722 }
0x4b7a   :  { %v3725_v51 = vpop.permute.xlu1 %3724  ;;  %v3728_v59 = vmul.f32 %v5224_v61, %v3723_v62 }
0x4b7b   :  { %v3729_v16 = vmul.f32 %v5226_v57, %v3725_v51 }
0x4b7c   :  { %3732 = vrot.lane.b32.xlu0 %v3728_v59, %s5439_s13 }
0x4b7d   :  { %3734 = vrot.lane.b32.xlu1 %v3729_v16, %s5439_s13 }
0x4bee   :  { %v3733_v11 = vpop.permute.xlu0 %3732 }
0x4bef   :  { %v3735_v55 = vpop.permute.xlu1 %3734  ;;  %v3738_v15 = vadd.f32 %v3733_v11, %v3718_v1 }
0x4bf0   :  { %v3739_v24 = vadd.f32 %v3735_v55, %v3719_v4 }
0x4bf1   :  { %5227 = vtanh.f32 %v3738_v15 }
0x4bf2   :  { %5229 = vtanh.f32 %v3739_v24 }
0x4bfe   :  { %v5228_v28 = vpop.eup %5227 }
0x4bff   :  { %v5230_v2 = vpop.eup %5229  ;;  %3744 = vrot.lane.b32.xlu0 %v5228_v28, %s5440_s16 }
0x4c00   :  { %3746 = vrot.lane.b32.xlu1 %v5230_v2, %s5440_s16  ;;  %v3840_v2 = vrot.slane %v3738_v15, 7 }
0x4c71   :  { %v3745_v44 = vpop.permute.xlu0 %3744 }
0x4c72   :  { %v3747_v38 = vpop.permute.xlu1 %3746  ;;  %v6354_v26 = vmul.f32 %v5224_v61, %v3745_v44  ;;  %v3841_v44 = vrot.slane %v3739_v24, 7 }
0x4c73   :  { %v6356_v47 = vmul.f32 %v5226_v57, %v3747_v38 }
0x4c74   :  { %v3762_v34 = vpack.c.bf16 %v6354_v26, %v6354_v26 }
0x4c75   :  { %v3763_v40 = vpack.c.bf16 %v6356_v47, %v6356_v47 }
0x4c76   :  { %v3766_v41 = vunpack.c.l.b16 %v3762_v34 }
0x4c77   :  { %v3767_v42 = vunpack.c.l.b16 %v3763_v40 }
0x4c78   :  { %v3768_v48 = vrot.slane %v3766_v41, 3 }
0x4c79   :  { %v3769_v33 = vrot.slane %v3767_v42, 2 }
0x4c7b   :  { %v3770_v52 = vsel %vm311_vm2, %v3769_v33, %v3768_v48 }
0x4c7c   :  { %v3771_v27 = vpack.c.b16 %v3770_v52, %v3770_v52 }
0x4c7e   :  { %3772 = vrot.lane.b32.xlu0 %v3771_v27, %s5441_s17 }
0x4cf0   :  { %v3773_v21 = vpop.permute.xlu0 %3772 }
0x4cf1   :  { %4733 = vmatmul.mubr.msk.bf16.vlgmr.msra.gmra.mxu1 %vm195_vm3, %v3773_v21 }
0x4cf2   :  { %4743 = vmatpush3.bf16.msra.mxu1 %v6232_v29  ;;  %4744 = vmatprep.mubr.msk.bf16.mxu1 %vm5436_vm0, %v5435_v0 }
0x4db1   :  { %v3811_v35 = vpop.f32.mrf.mxu1 }
0x4db2   :  { %v3818_v23 = vrot.slane %v3811_v35, 4  ;;  %v3819_v13 = vrot.slane %v3811_v35, 5 }
0x4db3   :  { %v4734_v9 = vpop.f32.mrf.mxu1 }
0x4db4   :  { %v3822_v32 = vadd.f32 %v3818_v23, %v6266_v46  ;;  %v3823_v30 = vadd.f32 %v3819_v13, %v6066_v20 }
0x4db5   :  { %v3814_v7 = vpop.f32.mrf.mxu1 }
0x4db6   :  { %5231 = vtanh.f32 %v3822_v32  ;;  %v4459_v62 = vmul.f32 -1.442695, %v3822_v32  ;;  %v4460_v57 = vmul.f32 -1.442695, %v3823_v30 }
0x4db7   :  { %5233 = vtanh.f32 %v3823_v30  ;;  %v4735_v5 = vpop.f32.mrf.mxu1 }
0x4db8   :  { %5235 = vpow2.f32 %v4459_v62 }
0x4db9   :  { %5237 = vpow2.f32 %v4460_v57 }
0x4dc3   :  { %v5232_v3 = vpop.eup %5231 }
0x4dc4   :  { %v5234_v61 = vpop.eup %5233  ;;  %3848 = vrot.lane.b32.xlu1 %v5232_v3, %s5438_s12 }
0x4dc5   :  { %3850 = vrot.lane.b32.xlu0 %v5234_v61, %s5438_s12  ;;  %v5236_v51 = vpop.eup %5235 }
0x4dc6   :  { %v5238_v59 = vpop.eup %5237  ;;  %v3830_v16 = vadd.f32 1.0, %v5236_v51 }
0x4dc7   :  { %v3831_v8 = vadd.f32 1.0, %v5238_v59 }
0x4dc8   :  { %5239 = vrcp.f32 %v3830_v16 }
0x4dc9   :  { %5241 = vrcp.f32 %v3831_v8 }
0x4dd5   :  { %v5240_v43 = vpop.eup %5239 }
0x4dd6   :  { %v5242_v4 = vpop.eup %5241  ;;  %v3844_v38 = vmul.f32 %v5240_v43, %v3840_v2 }
0x4dd7   :  { %v3845_v34 = vmul.f32 %v5242_v4, %v3841_v44 }
0x4e36   :  { %v3849_v1 = vpop.permute.xlu1 %3848 }
0x4e37   :  { %v3851_v11 = vpop.permute.xlu0 %3850  ;;  %v3854_v55 = vmul.f32 %v5240_v43, %v3849_v1 }
0x4e38   :  { %v3855_v28 = vmul.f32 %v5242_v4, %v3851_v11 }
0x4e39   :  { %3858 = vrot.lane.b32.xlu1 %v3854_v55, %s5439_s13 }
0x4e3a   :  { %3860 = vrot.lane.b32.xlu0 %v3855_v28, %s5439_s13 }
0x4eab   :  { %v3859_v40 = vpop.permute.xlu1 %3858 }
0x4eac   :  { %v3861_v41 = vpop.permute.xlu0 %3860  ;;  %v3864_v42 = vadd.f32 %v3859_v40, %v3844_v38 }
0x4ead   :  { %v3865_v48 = vadd.f32 %v3861_v41, %v3845_v34 }
0x4eae   :  { %5243 = vtanh.f32 %v3864_v42 }
0x4eaf   :  { %5245 = vtanh.f32 %v3865_v48 }
0x4ebb   :  { %v5244_v33 = vpop.eup %5243 }
0x4ebc   :  { %v5246_v52 = vpop.eup %5245  ;;  %3870 = vrot.lane.b32.xlu1 %v5244_v33, %s5440_s16 }
0x4ebd   :  { %3872 = vrot.lane.b32.xlu0 %v5246_v52, %s5440_s16  ;;  %v3966_v52 = vrot.slane %v3864_v42, 7 }
0x4f2e   :  { %v3871_v27 = vpop.permute.xlu1 %3870 }
0x4f2f   :  { %v3873_v21 = vpop.permute.xlu0 %3872  ;;  %v6376_v35 = vmul.f32 %v5240_v43, %v3871_v27  ;;  %v3967_v27 = vrot.slane %v3865_v48, 7 }
0x4f30   :  { %v6378_v15 = vmul.f32 %v5242_v4, %v3873_v21 }
0x4f31   :  { %v3888_v24 = vpack.c.bf16 %v6376_v35, %v6376_v35 }
0x4f32   :  { %v3889_v23 = vpack.c.bf16 %v6378_v15, %v6378_v15 }
0x4f33   :  { %v3892_v13 = vunpack.c.l.b16 %v3888_v24 }
0x4f34   :  { %v3893_v9 = vunpack.c.l.b16 %v3889_v23 }
0x4f35   :  { %v3894_v32 = vrot.slane %v3892_v13, 4 }
0x4f36   :  { %v3895_v30 = vrot.slane %v3893_v9, 3 }
0x4f38   :  { %v3896_v7 = vsel %vm311_vm2, %v3895_v30, %v3894_v32 }
0x4f39   :  { %v3897_v5 = vpack.c.b16 %v3896_v7, %v3896_v7 }
0x4f3b   :  { %3898 = vrot.lane.b32.xlu1 %v3897_v5, %s5441_s17 }
0x4fad   :  { %v3899_v3 = vpop.permute.xlu1 %3898 }
0x4fae   :  { %4739 = vmatmul.mubr.msk.bf16.vlgmr.msra.gmra.mxu0 %vm195_vm3, %v3899_v3 }
0x4faf   :  { %4749 = vmatpush3.bf16.msra.mxu0 %v6232_v29  ;;  %4750 = vmatprep.mubr.msk.bf16.mxu0 %vm5436_vm0, %v5435_v0 }
0x506e   :  { %v3937_v61 = vpop.f32.mrf.mxu0 }
0x506f   :  { %v3944_v62 = vrot.slane %v3937_v61, 3  ;;  %v3945_v57 = vrot.slane %v3937_v61, 4 }
0x5070   :  { %v4740_v51 = vpop.f32.mrf.mxu0 }
0x5071   :  { %v3948_v59 = vadd.f32 %v3944_v62, %v6266_v46  ;;  %v3949_v16 = vadd.f32 %v3945_v57, %v6066_v20 }
0x5072   :  { %v3940_v8 = vpop.f32.mrf.mxu0 }
0x5073   :  { %5247 = vtanh.f32 %v3948_v59  ;;  %v4462_v29 = vmul.f32 -1.442695, %v3948_v59  ;;  %v4463_v0 = vmul.f32 -1.442695, %v3949_v16 }
0x5074   :  { %5249 = vtanh.f32 %v3949_v16  ;;  %v4741_v43 = vpop.f32.mrf.mxu0 }
0x5075   :  { %5251 = vpow2.f32 %v4462_v29 }
0x5076   :  { %5253 = vpow2.f32 %v4463_v0 }
0x5080   :  { %v5248_v1 = vpop.eup %5247 }
0x5081   :  { %v5250_v4 = vpop.eup %5249  ;;  %3974 = vrot.lane.b32.xlu0 %v5248_v1, %s5438_s12 }
0x5082   :  { %3976 = vrot.lane.b32.xlu1 %v5250_v4, %s5438_s12  ;;  %v5252_v11 = vpop.eup %5251 }
0x5083   :  { %v5254_v55 = vpop.eup %5253  ;;  %v3956_v28 = vadd.f32 1.0, %v5252_v11 }
0x5084   :  { %v3957_v2 = vadd.f32 1.0, %v5254_v55 }
0x5085   :  { %5255 = vrcp.f32 %v3956_v28 }
0x5086   :  { %5257 = vrcp.f32 %v3957_v2 }
0x5092   :  { %v5256_v44 = vpop.eup %5255 }
0x5093   :  { %v5258_v34 = vpop.eup %5257  ;;  %v3970_v21 = vmul.f32 %v5256_v44, %v3966_v52 }
0x5094   :  { %v3971_v24 = vmul.f32 %v5258_v34, %v3967_v27 }
0x50f3   :  { %v3975_v38 = vpop.permute.xlu0 %3974 }
0x50f4   :  { %v3977_v40 = vpop.permute.xlu1 %3976  ;;  %v3980_v41 = vmul.f32 %v5256_v44, %v3975_v38 }
0x50f5   :  { %v3981_v33 = vmul.f32 %v5258_v34, %v3977_v40 }
0x50f6   :  { %3984 = vrot.lane.b32.xlu0 %v3980_v41, %s5439_s13 }
0x50f7   :  { %3986 = vrot.lane.b32.xlu1 %v3981_v33, %s5439_s13 }
0x5168   :  { %v3985_v23 = vpop.permute.xlu0 %3984 }
0x5169   :  { %v3987_v13 = vpop.permute.xlu1 %3986  ;;  %v3990_v9 = vadd.f32 %v3985_v23, %v3970_v21 }
0x516a   :  { %v3991_v32 = vadd.f32 %v3987_v13, %v3971_v24 }
0x516b   :  { %5259 = vtanh.f32 %v3990_v9 }
0x516c   :  { %5261 = vtanh.f32 %v3991_v32 }
0x5178   :  { %v5260_v30 = vpop.eup %5259 }
0x5179   :  { %v5262_v7 = vpop.eup %5261  ;;  %3996 = vrot.lane.b32.xlu0 %v5260_v30, %s5440_s16 }
0x517a   :  { %3998 = vrot.lane.b32.xlu1 %v5262_v7, %s5440_s16 }
0x51eb   :  { %v3997_v5 = vpop.permute.xlu0 %3996 }
0x51ec   :  { %v3999_v3 = vpop.permute.xlu1 %3998  ;;  %v6398_v61 = vmul.f32 %v5256_v44, %v3997_v5 }
0x51ed   :  { %v6400_v42 = vmul.f32 %v5258_v34, %v3999_v3  ;;  %v4092_v3 = vrot.slane %v3990_v9, 7 }
0x51ee   :  { %v4014_v48 = vpack.c.bf16 %v6398_v61, %v6398_v61 }
0x51ef   :  { %v4015_v62 = vpack.c.bf16 %v6400_v42, %v6400_v42 }
0x51f0   :  { %v4018_v57 = vunpack.c.l.b16 %v4014_v48  ;;  %v4093_v48 = vrot.slane %v3991_v32, 7 }
0x51f1   :  { %v4019_v51 = vunpack.c.l.b16 %v4015_v62 }
0x51f2   :  { %v4020_v59 = vrot.slane %v4018_v57, 5 }
0x51f3   :  { %v4021_v16 = vrot.slane %v4019_v51, 4 }
0x51f5   :  { %v4022_v8 = vsel %vm311_vm2, %v4021_v16, %v4020_v59 }
0x51f6   :  { %v4023_v43 = vpack.c.b16 %v4022_v8, %v4022_v8 }
0x51f8   :  { %4024 = vrot.lane.b32.xlu0 %v4023_v43, %s5441_s17 }
0x526a   :  { %v4025_v1 = vpop.permute.xlu0 %4024 }
0x526b   :  { %4745 = vmatmul.mubr.msk.bf16.vlgmr.msra.gmra.mxu1 %vm195_vm3, %v4025_v1 }
0x532b   :  { %v4063_v4 = vpop.f32.mrf.mxu1 }
0x532c   :  { %v4070_v29 = vrot.slane %v4063_v4, 2  ;;  %v4071_v0 = vrot.slane %v4063_v4, 3 }
0x532d   :  { %v4746_v11 = vpop.f32.mrf.mxu1 }
0x532e   :  { %v4074_v55 = vadd.f32 %v4070_v29, %v6266_v46  ;;  %v4075_v28 = vadd.f32 %v4071_v0, %v6066_v20 }
0x532f   :  { %v4066_v2 = vpop.f32.mrf.mxu1 }
0x5330   :  { %5263 = vtanh.f32 %v4074_v55  ;;  %v4465_v40 = vmul.f32 -1.442695, %v4074_v55  ;;  %v4466_v41 = vmul.f32 -1.442695, %v4075_v28 }
0x5331   :  { %5265 = vtanh.f32 %v4075_v28  ;;  %v4747_v44 = vpop.f32.mrf.mxu1 }
0x5332   :  { %5267 = vpow2.f32 %v4465_v40 }
0x5333   :  { %5269 = vpow2.f32 %v4466_v41 }
0x533d   :  { %v5264_v38 = vpop.eup %5263 }
0x533e   :  { %v5266_v34 = vpop.eup %5265  ;;  %4100 = vrot.lane.b32.xlu1 %v5264_v38, %s5438_s12 }
0x533f   :  { %4102 = vrot.lane.b32.xlu0 %v5266_v34, %s5438_s12  ;;  %v5268_v33 = vpop.eup %5267 }
0x5340   :  { %v5270_v52 = vpop.eup %5269  ;;  %v4082_v27 = vadd.f32 1.0, %v5268_v33 }
0x5341   :  { %v4083_v21 = vadd.f32 1.0, %v5270_v52 }
0x5342   :  { %5271 = vrcp.f32 %v4082_v27 }
0x5343   :  { %5273 = vrcp.f32 %v4083_v21 }
0x534f   :  { %v5272_v24 = vpop.eup %5271 }
0x5350   :  { %v5274_v13 = vpop.eup %5273  ;;  %v4096_v62 = vmul.f32 %v5272_v24, %v4092_v3 }
0x5351   :  { %v4097_v57 = vmul.f32 %v5274_v13, %v4093_v48 }
0x53b0   :  { %v4101_v23 = vpop.permute.xlu1 %4100 }
0x53b1   :  { %v4103_v30 = vpop.permute.xlu0 %4102  ;;  %v4106_v7 = vmul.f32 %v5272_v24, %v4101_v23 }
0x53b2   :  { %v4107_v5 = vmul.f32 %v5274_v13, %v4103_v30 }
0x53b3   :  { %4110 = vrot.lane.b32.xlu1 %v4106_v7, %s5439_s13 }
0x53b4   :  { %4112 = vrot.lane.b32.xlu0 %v4107_v5, %s5439_s13 }
0x5425   :  { %v4111_v51 = vpop.permute.xlu1 %4110 }
0x5426   :  { %v4113_v59 = vpop.permute.xlu0 %4112  ;;  %v4116_v16 = vadd.f32 %v4111_v51, %v4096_v62 }
0x5427   :  { %v4117_v8 = vadd.f32 %v4113_v59, %v4097_v57 }
0x5428   :  { %5275 = vtanh.f32 %v4116_v16 }
0x5429   :  { %5277 = vtanh.f32 %v4117_v8 }
0x5435   :  { %v5276_v43 = vpop.eup %5275 }
0x5436   :  { %v5278_v1 = vpop.eup %5277  ;;  %4122 = vrot.lane.b32.xlu1 %v5276_v43, %s5440_s16 }
0x5437   :  { %4124 = vrot.lane.b32.xlu0 %v5278_v1, %s5440_s16 }
0x54a8   :  { %v4123_v4 = vpop.permute.xlu1 %4122 }
0x54a9   :  { %v4125_v29 = vpop.permute.xlu0 %4124  ;;  %v6417_v0 = vmul.f32 %v5272_v24, %v4123_v4 }
0x54aa   :  { %v6419_v9 = vmul.f32 %v5274_v13, %v4125_v29  ;;  %v4218_v29 = vrot.slane %v4116_v16, 7 }
0x54ab   :  { %v4140_v32 = vpack.c.bf16 %v6417_v0, %v6417_v0 }
0x54ac   :  { %v4141_v11 = vpack.c.bf16 %v6419_v9, %v6419_v9 }
0x54ad   :  { %v4144_v55 = vunpack.c.l.b16 %v4140_v32  ;;  %v4219_v32 = vrot.slane %v4117_v8, 7 }
0x54ae   :  { %v4145_v28 = vunpack.c.l.b16 %v4141_v11 }
0x54af   :  { %v4146_v2 = vrot.slane %v4144_v55, 6 }
0x54b0   :  { %v4147_v44 = vrot.slane %v4145_v28, 5 }
0x54b2   :  { %v4148_v38 = vsel %vm311_vm2, %v4147_v44, %v4146_v2 }
0x54b3   :  { %v4149_v34 = vpack.c.b16 %v4148_v38, %v4148_v38 }
0x54b5   :  { %4150 = vrot.lane.b32.xlu1 %v4149_v34, %s5441_s17 }
0x5527   :  { %v4151_v40 = vpop.permute.xlu1 %4150 }
0x5528   :  { %4751 = vmatmul.mubr.msk.bf16.vlgmr.msra.gmra.mxu0 %vm195_vm3, %v4151_v40 }
0x55e8   :  { %v4189_v41 = vpop.f32.mrf.mxu0 }
0x55e9   :  { %v4196_v33 = vrot.slane %v4189_v41, 1  ;;  %v4197_v52 = vrot.slane %v4189_v41, 2 }
0x55ea   :  { %v4752_v27 = vpop.f32.mrf.mxu0 }
0x55eb   :  { %v4200_v21 = vadd.f32 %v4196_v33, %v6266_v46  ;;  %v4201_v24 = vadd.f32 %v4197_v52, %v6066_v20 }
0x55ec   :  { %v4192_v23 = vpop.f32.mrf.mxu0 }
0x55ed   :  { %5279 = vtanh.f32 %v4200_v21  ;;  %v4468_v5 = vmul.f32 -1.442695, %v4200_v21  ;;  %v4469_v3 = vmul.f32 -1.442695, %v4201_v24 }
0x55ee   :  { %5281 = vtanh.f32 %v4201_v24  ;;  %v4753_v13 = vpop.f32.mrf.mxu0 }
0x55ef   :  { %5283 = vpow2.f32 %v4468_v5 }
0x55f0   :  { %5285 = vpow2.f32 %v4469_v3  ;;  %v4470_v3 = vld [vmem:[%s6549_s8] ss:$0 sm:$0xff] }
0x55fa   :  { %v5280_v30 = vpop.eup %5279 }
0x55fb   :  { %v5282_v7 = vpop.eup %5281  ;;  %4226 = vrot.lane.b32.xlu0 %v5280_v30, %s5438_s12 }
0x55fc   :  { %4228 = vrot.lane.b32.xlu1 %v5282_v7, %s5438_s12  ;;  %v5284_v48 = vpop.eup %5283 }
0x55fd   :  { %v5286_v62 = vpop.eup %5285  ;;  %v4208_v57 = vadd.f32 1.0, %v5284_v48 }
0x55fe   :  { %v4209_v46 = vadd.f32 1.0, %v5286_v62 }
0x55ff   :  { %5287 = vrcp.f32 %v4208_v57 }
0x5600   :  { %5289 = vrcp.f32 %v4209_v46 }
0x560c   :  { %v5288_v20 = vpop.eup %5287 }
0x560d   :  { %v5290_v59 = vpop.eup %5289  ;;  %v4222_v11 = vmul.f32 %v5288_v20, %v4218_v29 }
0x560e   :  { %v4223_v55 = vmul.f32 %v5290_v59, %v4219_v32 }
0x566d   :  { %v4227_v51 = vpop.permute.xlu0 %4226 }
0x566e   :  { %v4229_v43 = vpop.permute.xlu1 %4228  ;;  %v4232_v1 = vmul.f32 %v5288_v20, %v4227_v51 }
0x566f   :  { %v4233_v4 = vmul.f32 %v5290_v59, %v4229_v43 }
0x5670   :  { %4236 = vrot.lane.b32.xlu0 %v4232_v1, %s5439_s13 }
0x5671   :  { %4238 = vrot.lane.b32.xlu1 %v4233_v4, %s5439_s13 }
0x5675   :  { %2499 = vrot.lane.b32.xlu1 %v6104_v12, %s5441_s17 }
0x56e2   :  { %v4237_v28 = vpop.permute.xlu0 %4236 }
0x56e3   :  { %v4239_v2 = vpop.permute.xlu1 %4238  ;;  %v4242_v44 = vadd.f32 %v4237_v28, %v4222_v11 }
0x56e4   :  { %v4243_v38 = vadd.f32 %v4239_v2, %v4223_v55 }
0x56e5   :  { %5291 = vtanh.f32 %v4242_v44 }
0x56e6   :  { %5293 = vtanh.f32 %v4243_v38 }
0x56e7   :  { %v2500_v34 = vpop.permute.xlu1 %2499 }
0x56e8   :  { %2505 = vst.msk [vmem:[#allocation2] sm:$0x2] %vm427_vm4, %v2500_v34 }
0x56f2   :  { %v5292_v40 = vpop.eup %5291 }
0x56f3   :  { %v5294_v41 = vpop.eup %5293  ;;  %4248 = vrot.lane.b32.xlu0 %v5292_v40, %s5440_s16 }
0x56f4   :  { %4250 = vrot.lane.b32.xlu1 %v5294_v41, %s5440_s16 }
0x56f7   :  { %2375 = vrot.lane.b32.xlu0 %v6078_v18, %s5441_s17 }
0x56f8   :  { %2750 = vrot.lane.b32.xlu1 %v6149_v50, %s5441_s17 }
0x56fb   :  { %2624 = vrot.lane.b32.xlu0 %v6126_v37, %s5441_s17 }
0x56fc   :  { %3002 = vrot.lane.b32.xlu1 %v6195_v60, %s5441_s17 }
0x56ff   :  { %2876 = vrot.lane.b32.xlu0 %v6172_v10, %s5441_s17 }
0x5700   :  { %3254 = vrot.lane.b32.xlu1 %v6249_v6, %s5441_s17 }
0x5703   :  { %3128 = vrot.lane.b32.xlu0 %v6218_v54, %s5441_s17 }
0x5704   :  { %3503 = vrot.lane.b32.xlu1 %v6309_v56, %s5441_s17 }
0x5707   :  { %3379 = vrot.lane.b32.xlu0 %v6280_v63, %s5441_s17 }
0x5708   :  { %3754 = vrot.lane.b32.xlu1 %v6354_v26, %s5441_s17 }
0x570b   :  { %3628 = vrot.lane.b32.xlu0 %v6331_v14, %s5441_s17 }
0x570c   :  { %4006 = vrot.lane.b32.xlu1 %v6398_v61, %s5441_s17 }
0x570f   :  { %3880 = vrot.lane.b32.xlu0 %v6376_v35, %s5441_s17 }
0x5710   :  { %2501 = vrot.lane.b32.xlu1 %v6102_v22, %s5441_s17 }
0x5713   :  { %4132 = vrot.lane.b32.xlu0 %v6417_v0, %s5441_s17 }
0x5714   :  { %2752 = vrot.lane.b32.xlu1 %v6151_v19, %s5441_s17 }
0x5717   :  { %2377 = vrot.lane.b32.xlu0 %v6074_v53, %s5441_s17  ;;  %v4782_v53 = vld [vmem:[#allocation11] sm:$0xff]  }
0x5718   :  { %3004 = vrot.lane.b32.xlu1 %v6197_v45, %s5441_s17  ;;  %4754 = vmatprep.subr.bf16.mxu1 %v4782_v53 }
0x5719   :  { %4755 = vmatpush3.bf16.msra.mxu1 %v4782_v53 }
0x571b   :  { %2626 = vrot.lane.b32.xlu0 %v6128_v17, %s5441_s17 }
0x571c   :  { %3256 = vrot.lane.b32.xlu1 %v6251_v39, %s5441_s17 }
0x571f   :  { %2878 = vrot.lane.b32.xlu0 %v6174_v36, %s5441_s17 }
0x5720   :  { %3505 = vrot.lane.b32.xlu1 %v6307_v49, %s5441_s17 }
0x5723   :  { %3130 = vrot.lane.b32.xlu0 %v6220_v58, %s5441_s17 }
0x5724   :  { %3756 = vrot.lane.b32.xlu1 %v6356_v47, %s5441_s17 }
0x5727   :  { %3381 = vrot.lane.b32.xlu0 %v6282_v31, %s5441_s17 }
0x5728   :  { %4008 = vrot.lane.b32.xlu1 %v6400_v42, %s5441_s17 }
0x572b   :  { %3630 = vrot.lane.b32.xlu0 %v6333_v25, %s5441_s17 }
0x572f   :  { %3882 = vrot.lane.b32.xlu0 %v6378_v15, %s5441_s17 }
0x5733   :  { %4134 = vrot.lane.b32.xlu0 %v6419_v9, %s5441_s17 }
0x5765   :  { %v4249_v18 = vpop.permute.xlu0 %4248 }
0x5766   :  { %v4251_v22 = vpop.permute.xlu1 %4250  ;;  %v4254_v12 = vmul.f32 %v5288_v20, %v4249_v18 }
0x5767   :  { %v4255_v17 = vmul.f32 %v5290_v59, %v4251_v22 }
0x5768   :  { %4258 = vrot.lane.b32.xlu1 %v4254_v12, %s5441_s17 }
0x5769   :  { %v2376_v37 = vpop.permute.xlu0 %2375 }
0x576a   :  { %v2751_v50 = vpop.permute.xlu1 %2750  ;;  %2381 = vst.msk [vmem:[#allocation2] sm:$0x1] %vm301_vm5, %v2376_v37 }
0x576b   :  { %2756 = vst.msk [vmem:[#allocation2] sm:$0x8] %vm680_vm6, %v2751_v50 }
0x576c   :  { %4260 = vrot.lane.b32.xlu1 %v4255_v17, %s5441_s17 }
0x576d   :  { %v2625_v19 = vpop.permute.xlu0 %2624 }
0x576e   :  { %v3003_v10 = vpop.permute.xlu1 %3002  ;;  %2630 = vst.msk [vmem:[#allocation2] sm:$0x4] %vm553_vm7, %v2625_v19 }
0x576f   :  { %3008 = vst.msk [vmem:[#allocation2] sm:$0x20] %vm934_vm8, %v3003_v10 }
0x5771   :  { %v2877_v36 = vpop.permute.xlu0 %2876 }
0x5772   :  { %v3255_v60 = vpop.permute.xlu1 %3254  ;;  %2882 = vst.msk [vmem:[#allocation2] sm:$0x10] %vm807_vm9, %v2877_v36 }
0x5773   :  { %3260 = vst.msk [vmem:[#allocation2] sm:$0x80] %vm1188_vm10, %v3255_v60 }
0x5775   :  { %v3129_v45 = vpop.permute.xlu0 %3128 }
0x5776   :  { %v3504_v54 = vpop.permute.xlu1 %3503  ;;  %3134 = vst.msk [vmem:[#allocation2] sm:$0x40] %vm1061_vm11, %v3129_v45 }
0x5777   :  { %3509 = vst.msk [vmem:[#allocation2 + $0x8] sm:$0x2] %vm427_vm4, %v3504_v54 }
0x5779   :  { %v3380_v58 = vpop.permute.xlu0 %3379 }
0x577a   :  { %v3755_v6 = vpop.permute.xlu1 %3754  ;;  %3385 = vst.msk [vmem:[#allocation2 + $0x8] sm:$0x1] %vm301_vm5, %v3380_v58 }
0x577b   :  { %3760 = vst.msk [vmem:[#allocation2 + $0x8] sm:$0x8] %vm680_vm6, %v3755_v6 }
0x577d   :  { %v3629_v39 = vpop.permute.xlu0 %3628  ;;  %v4266_v24 = vld [vmem:[#allocation2] sm:$0xff] }
0x577e   :  { %v4007_v63 = vpop.permute.xlu1 %4006  ;;  %3634 = vst.msk [vmem:[#allocation2 + $0x8] sm:$0x4] %vm553_vm7, %v3629_v39 }
0x577f   :  { %4012 = vst.msk [vmem:[#allocation2 + $0x8] sm:$0x20] %vm934_vm8, %v4007_v63 }
0x5781   :  { %v3881_v31 = vpop.permute.xlu0 %3880 }
0x5782   :  { %v2502_v49 = vpop.permute.xlu1 %2501  ;;  %3886 = vst.msk [vmem:[#allocation2 + $0x8] sm:$0x10] %vm807_vm9, %v3881_v31 }
0x5783   :  { %2506 = vst.msk [vmem:[#allocation2 + $0x10] sm:$0x2] %vm427_vm4, %v2502_v49 }
0x5785   :  { %v4133_v56 = vpop.permute.xlu0 %4132 }
0x5786   :  { %v2753_v14 = vpop.permute.xlu1 %2752  ;;  %4138 = vst.msk [vmem:[#allocation2 + $0x8] sm:$0x40] %vm1061_vm11, %v4133_v56 }
0x5787   :  { %2757 = vst.msk [vmem:[#allocation2 + $0x10] sm:$0x8] %vm680_vm6, %v2753_v14 }
0x5789   :  { %v2378_v25 = vpop.permute.xlu0 %2377 }
0x578a   :  { %v3005_v26 = vpop.permute.xlu1 %3004  ;;  %2382 = vst.msk [vmem:[#allocation2 + $0x10] sm:$0x1] %vm301_vm5, %v2378_v25 }
0x578b   :  { %3009 = vst.msk [vmem:[#allocation2 + $0x10] sm:$0x20] %vm934_vm8, %v3005_v26 }
0x578d   :  { %v2627_v47 = vpop.permute.xlu0 %2626 }
0x578e   :  { %v3257_v35 = vpop.permute.xlu1 %3256  ;;  %2631 = vst.msk [vmem:[#allocation2 + $0x10] sm:$0x4] %vm553_vm7, %v2627_v47 }
0x578f   :  { %3261 = vst.msk [vmem:[#allocation2 + $0x10] sm:$0x80] %vm1188_vm10, %v3257_v35 }
0x5791   :  { %v2879_v15 = vpop.permute.xlu0 %2878 }
0x5792   :  { %v3506_v61 = vpop.permute.xlu1 %3505  ;;  %2883 = vst.msk [vmem:[#allocation2 + $0x10] sm:$0x10] %vm807_vm9, %v2879_v15 }
0x5793   :  { %3510 = vst.msk [vmem:[#allocation2 + $0x18] sm:$0x2] %vm427_vm4, %v3506_v61 }
0x5795   :  { %v3131_v42 = vpop.permute.xlu0 %3130 }
0x5796   :  { %v3757_v16 = vpop.permute.xlu1 %3756  ;;  %3135 = vst.msk [vmem:[#allocation2 + $0x10] sm:$0x40] %vm1061_vm11, %v3131_v42 }
0x5797   :  { %3761 = vst.msk [vmem:[#allocation2 + $0x18] sm:$0x8] %vm680_vm6, %v3757_v16 }
0x5799   :  { %v3382_v8 = vpop.permute.xlu0 %3381 }
0x579a   :  { %v4009_v0 = vpop.permute.xlu1 %4008  ;;  %3386 = vst.msk [vmem:[#allocation2 + $0x18] sm:$0x1] %vm301_vm5, %v3382_v8 }
0x579b   :  { %4013 = vst.msk [vmem:[#allocation2 + $0x18] sm:$0x20] %vm934_vm8, %v4009_v0 }
0x579d   :  { %v3631_v9 = vpop.permute.xlu0 %3630  ;;  %v4268_v30 = vld [vmem:[#allocation2 + $0x10] sm:$0xff] }
0x579e   :  { %3635 = vst.msk [vmem:[#allocation2 + $0x18] sm:$0x4] %vm553_vm7, %v3631_v9 }
0x57a1   :  { %v3883_v33 = vpop.permute.xlu0 %3882 }
0x57a2   :  { %3887 = vst.msk [vmem:[#allocation2 + $0x18] sm:$0x10] %vm807_vm9, %v3883_v33 }
0x57a5   :  { %v4135_v52 = vpop.permute.xlu0 %4134 }
0x57a6   :  { %4139 = vst.msk [vmem:[#allocation2 + $0x18] sm:$0x40] %vm1061_vm11, %v4135_v52 }
0x57da   :  { %v4259_v27 = vpop.permute.xlu1 %4258 }
0x57db   :  { %4264 = vst.msk [vmem:[#allocation2 + $0x8] sm:$0x80] %vm1188_vm10, %v4259_v27 }
0x57de   :  { %v4261_v21 = vpop.permute.xlu1 %4260 }
0x57df   :  { %4265 = vst.msk [vmem:[#allocation2 + $0x18] sm:$0x80] %vm1188_vm10, %v4261_v21 }
0x57e2   :  { %v4267_v23 = vld [vmem:[#allocation2 + $0x8] sm:$0xff] }
0x57e3   :  { %v4270_v13 = vpack.c.bf16 %v4267_v23, %v4266_v24 }
0x57e5   :  { %4756 = vmatprep.mubr.msk.bf16.mxu1 %vm195_vm3, %v4270_v13 }
0x57e6   :  { %v4269_v7 = vld [vmem:[#allocation2 + $0x18] sm:$0xff] }
0x57e7   :  { %v4271_v5 = vpack.c.bf16 %v4269_v7, %v4268_v30 }
0x57e9   :  { %4757 = vmatmul.mubr.msk.bf16.vlgmr.msra.gmra.mxu1 %vm195_vm3, %v4271_v5 }
0x58a9   :  { %v4758_v48 = vpop.f32.mrf.mxu1 }
0x58aa   :  { %v4336_v62 = vadd.f32 %v4758_v48, %v4470_v3 }
0x58ab   :  { %v4327_v57 = vpop.f32.mrf.mxu1 }
0x58ac   :  { %4344 = vst [vmem:[#allocation12 + $0x10] sm:$0xff] %v4336_v62  ;;  %v4328_v46 = vadd.f32 %v4470_v3, %v4327_v57 }
0x58ad   :  { %v4759_v20 = vpop.f32.mrf.mxu1 }
0x58ae   :  { %4342 = vst [vmem:[#allocation12] sm:$0xff] %v4328_v46  ;;  %v4339_v51 = vadd.f32 %v4759_v20, %v4470_v3 }
0x58af   :  { %v4330_v59 = vpop.f32.mrf.mxu1 }
0x58b0   :  { %4345 = vst [vmem:[#allocation12 + $0x18] sm:$0xff] %v4339_v51  ;;  %v4331_v43 = vadd.f32 %v4470_v3, %v4330_v59 }
0x58b2   :  { %4343 = vst [vmem:[#allocation12 + $0x8] sm:$0xff] %v4331_v43 }
0x58b3   :  { %5409 = shalt.err (!%p5406_p1)
}
0x58b4   :  { %4357 = dma.vmem_to_hbm [thread:$0]  %s4352_s27, 512, %s6550_s9, [#allocation5], %s5431_s23, %s5431_s23, %s5432_s24  }
0x58b5   :  { %5424 = dma.done.wait [#allocation5], 512  }
0x58b6   :  { %5425 = vsyncadd [#allocation5], 4294966784 }
0x58b7   :  { %4361 = vsyncpa [#allocation4], 1 }
0x58b8   :  { %4362 = vsyncpa [#allocation7], 1 }
0x58b9   :  { %4363 = vsyncpa [#allocation10], 1 }
0x58ba   :  { %4364 = vsyncpa [#allocation5], 1 }

</bundles_post_ra>
